<compile_context>
chip_gen: v5e
topology: v5e:2x2
jax: 0.10.0
libtpu: 0.0.40
codegen_flags: <defaults>
</compile_context>

<pallas_src>
import functools

import jax
import jax.numpy as jnp
from jax.experimental import pallas as pl
from jax.experimental.pallas import tpu as pltpu

# ----------------------------- problem sizes --------------------------------
DEST = 2                      # args['output_size']
HID = 32                      # hidden_size
INIT_LEN = 2                  # init_length
B, T, C = 2, 8, 8             # batch, temporal, cells
F = 5 * DEST + 6              # input_size (= 16); state feature dim S = F - 5*DEST
S = F - 5 * DEST
NBC = B * C                   # batch folded into rows (16)
T_OUT = T - INIT_LEN - 1      # 5
NPRE = (T - 1) * NBC          # 112 rows of hoisted x-only work

# -------------------- packed parameter slab layout --------------------------
# All weight blocks start at 8-aligned rows, left-justified in the 128 lanes.
R_INIT = 0                    # (F, HID)        init_graph gcn weight
R_ASG = 16                    # (F, 4*DEST)     fused [att_fwd | att_bwd | state_gate]
R_FBD = 32                    # (2H, 2H)        block-diag [[W_fg,0],[0,W_bg]]
R_MRG = 96                    # (2H, H)         sptial_merge (contiguous)
R_GH = 160                    # (H, 4H)         GRU hidden-path [r|z|0|n]
R_GI = 192                    # (2*DEST, 4H)    GRU input-path  [r|z|n|0]
R_OUT = 200                   # (H, 128)        output_layer (lanes 0..DEST-1)
R_BIAS = 232                  # one bias per row
B_INIT, B_ASG, B_FB, B_MERGE, B_GRU, B_OUT = (R_BIAS + i for i in range(6))
WB_ROWS = 240
WB_COLS = 128                 # == 4 * HID

# ------------------------- parameter specification --------------------------
PARAM_SPECS = [
    # init_graph: gcn(input_size -> hidden)
    ("w_init", (F, HID)), ("b_init", (HID,)),
    # attention_on_node (placeholder): per-node fwd/bwd attention over encoding
    ("w_att_f", (4 * DEST, DEST)), ("b_att_f", (DEST,)),
    ("w_att_b", (4 * DEST, DEST)), ("b_att_b", (DEST,)),
    # state_gate: Linear(S, 2*DEST)
    ("w_sg", (S, 2 * DEST)), ("b_sg", (2 * DEST,)),
    # forward_gnn / backward_gnn: gcn(hidden -> hidden)
    ("w_fg", (HID, HID)), ("b_fg", (HID,)),
    ("w_bg", (HID, HID)), ("b_bg", (HID,)),
    # sptial_merge: Linear(2*hidden, hidden)
    ("w_merge", (2 * HID, HID)), ("b_merge", (HID,)),
    # GRUCell(2*DEST, HID): gi = x @ w_ih + b_ih, gh = h @ w_hh + b_hh (r|z|n)
    ("w_ih", (2 * DEST, 3 * HID)), ("b_ih", (3 * HID,)),
    ("w_hh", (HID, 3 * HID)), ("b_hh", (3 * HID,)),
    # output_layer: Linear(hidden, DEST)
    ("w_out", (HID, DEST)), ("b_out", (DEST,)),
]


def init_params():
    key = jax.random.PRNGKey(0)
    params = {}
    for i, (name, shape) in enumerate(PARAM_SPECS):
        k = jax.random.fold_in(key, i)
        params[name] = 0.1 * jax.random.normal(k, shape, jnp.float32)
    return params


def pack_params(p):
    """Fuse all module weights/biases into a single (240, 128) f32 VMEM slab."""
    wb = jnp.zeros((WB_ROWS, WB_COLS), jnp.float32)
    # init_graph weight
    wb = wb.at[R_INIT:R_INIT + F, 0:HID].set(p["w_init"])
    # fused attention + state-gate projection over the full feature vector
    # (rows for the dyn features stay zero -> identical to slicing emb/state).
    wb = wb.at[R_ASG + DEST:R_ASG + 5 * DEST, 0:DEST].set(p["w_att_f"])
    wb = wb.at[R_ASG + DEST:R_ASG + 5 * DEST, DEST:2 * DEST].set(p["w_att_b"])
    wb = wb.at[R_ASG + 5 * DEST:R_ASG + F, 2 * DEST:4 * DEST].set(p["w_sg"])
    # block-diagonal forward|backward gnn weights: [[W_fg, 0], [0, W_bg]]
    wb = wb.at[R_FBD:R_FBD + HID, 0:HID].set(p["w_fg"])
    wb = wb.at[R_FBD + HID:R_FBD + 2 * HID, HID:2 * HID].set(p["w_bg"])
    # spatial merge, one contiguous (2H, H) block
    wb = wb.at[R_MRG:R_MRG + 2 * HID, 0:HID].set(p["w_merge"])
    # GRU hidden-path weights: columns [r | z | 0 | n]
    wb = wb.at[R_GH:R_GH + HID, 0:2 * HID].set(p["w_hh"][:, 0:2 * HID])
    wb = wb.at[R_GH:R_GH + HID, 3 * HID:4 * HID].set(p["w_hh"][:, 2 * HID:3 * HID])
    # GRU input-path weights (rows: [tmp_f(2); tmp_b(2)]): columns [r | z | n | 0]
    wb = wb.at[R_GI:R_GI + 2 * DEST, 0:3 * HID].set(p["w_ih"])
    # output layer, zero-padded to 128 lanes
    wb = wb.at[R_OUT:R_OUT + HID, 0:DEST].set(p["w_out"])
    # biases (one row each)
    wb = wb.at[B_INIT, 0:HID].set(p["b_init"])
    wb = wb.at[B_ASG, 0:DEST].set(p["b_att_f"])
    wb = wb.at[B_ASG, DEST:2 * DEST].set(p["b_att_b"])
    wb = wb.at[B_ASG, 2 * DEST:4 * DEST].set(p["b_sg"])
    wb = wb.at[B_FB, 0:HID].set(p["b_fg"])
    wb = wb.at[B_FB, HID:2 * HID].set(p["b_bg"])
    wb = wb.at[B_MERGE, 0:HID].set(p["b_merge"])
    wb = wb.at[B_GRU, 0:2 * HID].set(p["b_ih"][0:2 * HID] + p["b_hh"][0:2 * HID])
    wb = wb.at[B_GRU, 2 * HID:3 * HID].set(p["b_ih"][2 * HID:3 * HID])
    wb = wb.at[B_GRU, 3 * HID:4 * HID].set(p["b_hh"][2 * HID:3 * HID])
    wb = wb.at[B_OUT, 0:DEST].set(p["b_out"])
    return wb


# ------------------------------- the kernel ---------------------------------
def fused_kernel(x_ref, lbig_ref, wb_ref, out_ref, gx_scr, h_scr):
    """Whole forward pass (all batches, all time steps) in one invocation.

    x_ref   : (T*NBC, F)           time-major features, batch folded into rows
    lbig_ref: (T, 2*NBC, 2*NBC)    per-step diag(L_fwd_blk, L_bwd_blk)
    wb_ref  : (240, 128)           packed weight/bias slab
    out_ref : (T_OUT*NBC, 128)     lane-dense output (first DEST lanes valid)
    gx_scr  : (NPRE, 4*HID)        VMEM scratch: precomputed GRU input path
    h_scr   : (T_OUT*NBC, HID)     VMEM scratch: per-step hiddens for output
    """
    def dot(a, b):
        return jnp.dot(a, b, preferred_element_type=jnp.float32)

    def relu(v):
        return jnp.maximum(v, 0.0)

    sig = jax.nn.sigmoid

    # =========================== x-only pre-pass ============================
    # Fused attention + state-gate projection, batched over all T-1 steps.
    # TODO(synk): attention_on_node source unavailable; per-node sigmoid
    # attention over the encoding features followed by graph aggregation.
    xa = x_ref[0:NPRE, :]                                  # (112, F)
    w_asg = wb_ref[R_ASG:R_ASG + F, :4 * DEST]
    b_asg = wb_ref[B_ASG:B_ASG + 1, :4 * DEST]
    asg = sig(dot(xa, w_asg) + b_asg)                      # (112, 4*DEST)
    dyn = xa[:, :DEST]                                     # (112, DEST)
    gaf = dyn * asg[:, 0:DEST]                             # dyn * a_fwd
    gab = dyn * asg[:, DEST:2 * DEST]                      # dyn * a_bwd
    sgf = asg[:, 2 * DEST:3 * DEST]                        # state gate (fwd half)
    sgb = asg[:, 3 * DEST:4 * DEST]                        # state gate (bwd half)

    # Per-step Laplacian aggregation of the gated dyn features (independent of
    # the carried hidden -> off the serial chain; one fused diag(Lf,Lb) matmul
    # per step over the row-stacked fwd/bwd features).
    tmpf_parts, tmpb_parts = [], []
    for t in range(T - 1):
        r0 = t * NBC
        gstk = jnp.concatenate([gaf[r0:r0 + NBC], gab[r0:r0 + NBC]], axis=0)
        agg = dot(lbig_ref[t], gstk)                       # (2*NBC, DEST)
        tmpf_parts.append(agg[:NBC] * sgf[r0:r0 + NBC])
        tmpb_parts.append(agg[NBC:] * sgb[r0:r0 + NBC])
    tmp_cat = jnp.concatenate(
        [jnp.concatenate(tmpf_parts, axis=0),
         jnp.concatenate(tmpb_parts, axis=0)], axis=1)     # (112, 2*DEST)

    # One batched GRU input-path projection, biases folded in; stash in VMEM.
    w_gi = wb_ref[R_GI:R_GI + 2 * DEST, :]                 # (4, 4*HID)
    b_gru = wb_ref[B_GRU:B_GRU + 1, :]                     # (1, 4*HID)
    gx_scr[...] = dot(tmp_cat, w_gi) + b_gru               # (112, 4*HID)

    # ---- hidden = init_graph(input[:, 0], L_fwd[0]) -------------------------
    # TODO(synk): gcn source unavailable; using relu(L @ (x @ W) + b).
    w_init = wb_ref[R_INIT:R_INIT + F, :HID]
    b_init = wb_ref[B_INIT:B_INIT + 1, :HID]
    x0 = x_ref[0:NBC, :]
    lf0 = lbig_ref[0][:NBC, :NBC]
    hidden = relu(dot(lf0, dot(x0, w_init)) + b_init)      # (NBC, HID)

    # Loop-invariant bias broadcasts, materialised once (no per-step broadcast).
    bfb_b = jnp.broadcast_to(wb_ref[B_FB:B_FB + 1, :2 * HID], (NBC, 2 * HID))
    bm_b = jnp.broadcast_to(wb_ref[B_MERGE:B_MERGE + 1, :HID], (NBC, HID))

    # ================= recurrence over time (serial chain) ==================
    # 4 MXU pushes per step; x-only work already precomputed above.
    for t in range(T - 1):
        # weight slices re-read from VMEM each step (short live ranges).
        w_fbd = wb_ref[R_FBD:R_FBD + 2 * HID, :2 * HID]    # (2H, 2H)
        w_mrg = wb_ref[R_MRG:R_MRG + 2 * HID, :HID]        # (2H, H)
        w_gh = wb_ref[R_GH:R_GH + HID, :]                  # (H, 4H)

        # fused forward/backward GCN: diag(Lf,Lb) @ [h; h], then block-diag W.
        hidden2 = jnp.concatenate([hidden, hidden], axis=0)      # (2*NBC, H)
        lhid = dot(lbig_ref[t], hidden2)                         # (2*NBC, H)
        lcat = jnp.concatenate([lhid[:NBC], lhid[NBC:]], axis=1)  # (NBC, 2H)
        fb = relu(dot(lcat, w_fbd) + bfb_b)                      # [fwd_h | bwd_h]

        # spatial merge: single contiguous (2H, H) matmul.
        h_space = dot(fb, w_mrg) + bm_b                          # (NBC, H)

        # GRU cell: precomputed input path + one hidden-path matmul.
        g = gx_scr[t * NBC:(t + 1) * NBC, :] + dot(h_space, w_gh)
        r = sig(g[:, 0:HID])
        z = sig(g[:, HID:2 * HID])
        n = jnp.tanh(g[:, 2 * HID:3 * HID] + r * g[:, 3 * HID:4 * HID])
        hidden = (1.0 - z) * n + z * h_space

        # stage hidden for the batched output projection (static offsets).
        if t >= INIT_LEN:
            r0 = (t - INIT_LEN) * NBC
            h_scr[r0:r0 + NBC, :] = hidden

    # ============== batched output projection, one lane-dense store =========
    w_out = wb_ref[R_OUT:R_OUT + HID, :]                   # (H, 128) zero-padded
    b_out = wb_ref[B_OUT:B_OUT + 1, :]                     # (1, 128)
    out_ref[...] = dot(h_scr[...], w_out) + b_out          # (80, 128)


# ------------------------------- host glue ----------------------------------
def adj_to_laplace(adj):
    # TODO(synk): adj_to_laplace source unavailable; using row-normalised
    # adjacency with self loops, L = D^{-1} (A + I).
    eye = jnp.eye(adj.shape[-1], dtype=adj.dtype)
    a_hat = adj + eye[None]
    deg = jnp.sum(a_hat, axis=-1, keepdims=True)
    return a_hat / jnp.maximum(deg, 1e-6)


@functools.partial(jax.jit, static_argnames=("input_cells",))
def single_attention_forward(params, input_data, adj_list, input_cells):
    """input_data: (B, T, C, F) as in PyTorch, adj_list: (T, C, C)."""
    lf = adj_to_laplace(adj_list)                                   # (T, C, C)
    lb = adj_to_laplace(jnp.transpose(adj_list, (0, 2, 1)))         # (T, C, C)

    # Block-diagonal Laplacians so batch can be folded into the row dimension,
    # then block-diagonal over direction: lbig[t] = diag(Lf_blk[t], Lb_blk[t]).
    eye_b = jnp.eye(B, dtype=jnp.float32)
    lf_blk = jnp.einsum("ab,tcd->tacbd", eye_b, lf).reshape(T, NBC, NBC)
    lb_blk = jnp.einsum("ab,tcd->tacbd", eye_b, lb).reshape(T, NBC, NBC)
    lbig = jnp.zeros((T, 2 * NBC, 2 * NBC), jnp.float32)
    lbig = lbig.at[:, :NBC, :NBC].set(lf_blk)
    lbig = lbig.at[:, NBC:, NBC:].set(lb_blk)

    x_tm = jnp.transpose(input_data, (1, 0, 2, 3)).astype(jnp.float32)  # (T,B,C,F)
    x_flat = x_tm.reshape(T * NBC, F)                                   # row = t*NBC + b*C + c

    wb = pack_params(params)

    pred_pad = pl.pallas_call(
        fused_kernel,
        out_shape=jax.ShapeDtypeStruct((T_OUT * NBC, WB_COLS), jnp.float32),
        scratch_shapes=[
            pltpu.VMEM((NPRE, 4 * HID), jnp.float32),      # precomputed GRU input path
            pltpu.VMEM((T_OUT * NBC, HID), jnp.float32),   # staged hiddens
        ],
    )(x_flat, lbig, wb)

    pred = pred_pad[:, :DEST].reshape(T_OUT, B, C, DEST)

    # output[:, t, input_cells, :] is teacher-forced ground truth (train mode);
    # output[:, t, predict_cells, :] comes from the output_layer (kernel pred).
    gt = x_tm[INIT_LEN + 1:, :, :, :DEST]                           # (T_OUT,B,C,DEST)
    mask = jnp.zeros((C,), dtype=bool).at[jnp.array(input_cells)].set(True)
    out = jnp.where(mask[None, None, :, None], gt, pred)
    return jnp.transpose(out, (1, 0, 2, 3))                         # (B,T_OUT,C,DEST)


# --------------------------------- main --------------------------------------
if __name__ == "__main__":
    key = jax.random.PRNGKey(0)
    kx, ka = jax.random.split(key)

    input_data = jax.random.normal(kx, (B, T, C, F), jnp.float32)
    adj_list = (jax.random.uniform(ka, (T, C, C)) > 0.5).astype(jnp.float32)
    input_cells = (0, 3)   # set_input_cells([...])

    params = init_params()
    out = single_attention_forward(params, input_data, adj_list, input_cells)
    out = jax.block_until_ready(out)
    assert out.shape == (B, T - INIT_LEN - 1, C, DEST), out.shape
    assert jnp.all(jnp.isfinite(out))
    print("KERNEL_OK")
</pallas_src>

<mosaic_0001>
module attributes {stable_mosaic.version = 11 : i64} {
  func.func @fused_kernel(%arg0: memref<128x16xf32, #tpu.memory_space<vmem>>, %arg1: memref<8x32x32xf32, #tpu.memory_space<vmem>>, %arg2: memref<240x128xf32, #tpu.memory_space<vmem>>, %arg3: memref<80x128xf32, #tpu.memory_space<vmem>>, %arg4: memref<112x128xf32, #tpu.memory_space<vmem>>, %arg5: memref<80x32xf32, #tpu.memory_space<vmem>>) attributes {dimension_semantics = [], scalar_prefetch = 0 : i64, scratch_operands = 2 : i64, tpu.core_type = #tpu.core_type<tc>} {
    %c0 = arith.constant 0 : index
    %c0_0 = arith.constant 0 : index
    %0 = vector.load %arg0[%c0, %c0_0] : memref<128x16xf32, #tpu.memory_space<vmem>>, vector<112x16xf32>
    %c16 = arith.constant 16 : index
    %c0_1 = arith.constant 0 : index
    %1 = vector.load %arg2[%c16, %c0_1] : memref<240x128xf32, #tpu.memory_space<vmem>>, vector<16x8xf32>
    %c233 = arith.constant 233 : index
    %c0_2 = arith.constant 0 : index
    %2 = vector.load %arg2[%c233, %c0_2] : memref<240x128xf32, #tpu.memory_space<vmem>>, vector<1x8xf32>
    %cst = arith.constant dense<0.000000e+00> : vector<112x8xf32>
    %3 = tpu.matmul %0, %1, %cst {dimension_numbers = #tpu.dot_dimension_numbers<[1], [0], [0], [1], [0, 0, 1, 1], [], []>} : vector<112x16xf32>, vector<16x8xf32>, vector<112x8xf32> -> vector<112x8xf32>
    %4 = vector.broadcast %2 : vector<1x8xf32> to vector<112x8xf32>
    %5 = arith.addf %3, %4 : vector<112x8xf32>
    %6 = arith.negf %5 : vector<112x8xf32>
    %7 = math.exp %6 : vector<112x8xf32>
    %cst_3 = arith.constant 1.000000e+00 : f32
    %8 = vector.broadcast %cst_3 : f32 to vector<112x8xf32>
    %9 = arith.addf %8, %7 : vector<112x8xf32>
    %10 = arith.divf %8, %9 : vector<112x8xf32>
    %11 = vector.extract_strided_slice %0 {offsets = [0, 0], sizes = [112, 2], strides = [1, 1]} : vector<112x16xf32> to vector<112x2xf32>
    %12 = vector.extract_strided_slice %10 {offsets = [0, 0], sizes = [112, 2], strides = [1, 1]} : vector<112x8xf32> to vector<112x2xf32>
    %13 = arith.mulf %11, %12 : vector<112x2xf32>
    %14 = vector.extract_strided_slice %10 {offsets = [0, 2], sizes = [112, 2], strides = [1, 1]} : vector<112x8xf32> to vector<112x2xf32>
    %15 = arith.mulf %11, %14 : vector<112x2xf32>
    %16 = vector.extract_strided_slice %10 {offsets = [0, 4], sizes = [112, 2], strides = [1, 1]} : vector<112x8xf32> to vector<112x2xf32>
    %17 = vector.extract_strided_slice %10 {offsets = [0, 6], sizes = [112, 2], strides = [1, 1]} : vector<112x8xf32> to vector<112x2xf32>
    %18 = vector.extract_strided_slice %13 {offsets = [0, 0], sizes = [16, 2], strides = [1, 1]} : vector<112x2xf32> to vector<16x2xf32>
    %19 = vector.extract_strided_slice %15 {offsets = [0, 0], sizes = [16, 2], strides = [1, 1]} : vector<112x2xf32> to vector<16x2xf32>
    %20 = tpu.concatenate %18, %19 in 0 : vector<16x2xf32>, vector<16x2xf32> -> vector<32x2xf32>
    %c0_4 = arith.constant 0 : index
    %c0_5 = arith.constant 0 : index
    %c0_6 = arith.constant 0 : index
    %21 = vector.load %arg1[%c0_4, %c0_5, %c0_6] : memref<8x32x32xf32, #tpu.memory_space<vmem>>, vector<1x32x32xf32>
    %22 = vector.shape_cast %21 : vector<1x32x32xf32> to vector<32x32xf32>
    %cst_7 = arith.constant dense<0.000000e+00> : vector<32x2xf32>
    %23 = tpu.matmul %22, %20, %cst_7 {dimension_numbers = #tpu.dot_dimension_numbers<[1], [0], [0], [1], [0, 0, 1, 1], [], []>} : vector<32x32xf32>, vector<32x2xf32>, vector<32x2xf32> -> vector<32x2xf32>
    %24 = vector.extract_strided_slice %23 {offsets = [0, 0], sizes = [16, 2], strides = [1, 1]} : vector<32x2xf32> to vector<16x2xf32>
    %25 = vector.extract_strided_slice %16 {offsets = [0, 0], sizes = [16, 2], strides = [1, 1]} : vector<112x2xf32> to vector<16x2xf32>
    %26 = arith.mulf %24, %25 : vector<16x2xf32>
    %27 = vector.extract_strided_slice %23 {offsets = [16, 0], sizes = [16, 2], strides = [1, 1]} : vector<32x2xf32> to vector<16x2xf32>
    %28 = vector.extract_strided_slice %17 {offsets = [0, 0], sizes = [16, 2], strides = [1, 1]} : vector<112x2xf32> to vector<16x2xf32>
    %29 = arith.mulf %27, %28 : vector<16x2xf32>
    %30 = vector.extract_strided_slice %13 {offsets = [16, 0], sizes = [16, 2], strides = [1, 1]} : vector<112x2xf32> to vector<16x2xf32>
    %31 = vector.extract_strided_slice %15 {offsets = [16, 0], sizes = [16, 2], strides = [1, 1]} : vector<112x2xf32> to vector<16x2xf32>
    %32 = tpu.concatenate %30, %31 in 0 : vector<16x2xf32>, vector<16x2xf32> -> vector<32x2xf32>
    %c1 = arith.constant 1 : index
    %c0_8 = arith.constant 0 : index
    %c0_9 = arith.constant 0 : index
    %33 = vector.load %arg1[%c1, %c0_8, %c0_9] : memref<8x32x32xf32, #tpu.memory_space<vmem>>, vector<1x32x32xf32>
    %34 = vector.shape_cast %33 : vector<1x32x32xf32> to vector<32x32xf32>
    %cst_10 = arith.constant dense<0.000000e+00> : vector<32x2xf32>
    %35 = tpu.matmul %34, %32, %cst_10 {dimension_numbers = #tpu.dot_dimension_numbers<[1], [0], [0], [1], [0, 0, 1, 1], [], []>} : vector<32x32xf32>, vector<32x2xf32>, vector<32x2xf32> -> vector<32x2xf32>
    %36 = vector.extract_strided_slice %35 {offsets = [0, 0], sizes = [16, 2], strides = [1, 1]} : vector<32x2xf32> to vector<16x2xf32>
    %37 = vector.extract_strided_slice %16 {offsets = [16, 0], sizes = [16, 2], strides = [1, 1]} : vector<112x2xf32> to vector<16x2xf32>
    %38 = arith.mulf %36, %37 : vector<16x2xf32>
    %39 = vector.extract_strided_slice %35 {offsets = [16, 0], sizes = [16, 2], strides = [1, 1]} : vector<32x2xf32> to vector<16x2xf32>
    %40 = vector.extract_strided_slice %17 {offsets = [16, 0], sizes = [16, 2], strides = [1, 1]} : vector<112x2xf32> to vector<16x2xf32>
    %41 = arith.mulf %39, %40 : vector<16x2xf32>
    %42 = vector.extract_strided_slice %13 {offsets = [32, 0], sizes = [16, 2], strides = [1, 1]} : vector<112x2xf32> to vector<16x2xf32>
    %43 = vector.extract_strided_slice %15 {offsets = [32, 0], sizes = [16, 2], strides = [1, 1]} : vector<112x2xf32> to vector<16x2xf32>
    %44 = tpu.concatenate %42, %43 in 0 : vector<16x2xf32>, vector<16x2xf32> -> vector<32x2xf32>
    %c2 = arith.constant 2 : index
    %c0_11 = arith.constant 0 : index
    %c0_12 = arith.constant 0 : index
    %45 = vector.load %arg1[%c2, %c0_11, %c0_12] : memref<8x32x32xf32, #tpu.memory_space<vmem>>, vector<1x32x32xf32>
    %46 = vector.shape_cast %45 : vector<1x32x32xf32> to vector<32x32xf32>
    %cst_13 = arith.constant dense<0.000000e+00> : vector<32x2xf32>
    %47 = tpu.matmul %46, %44, %cst_13 {dimension_numbers = #tpu.dot_dimension_numbers<[1], [0], [0], [1], [0, 0, 1, 1], [], []>} : vector<32x32xf32>, vector<32x2xf32>, vector<32x2xf32> -> vector<32x2xf32>
    %48 = vector.extract_strided_slice %47 {offsets = [0, 0], sizes = [16, 2], strides = [1, 1]} : vector<32x2xf32> to vector<16x2xf32>
    %49 = vector.extract_strided_slice %16 {offsets = [32, 0], sizes = [16, 2], strides = [1, 1]} : vector<112x2xf32> to vector<16x2xf32>
    %50 = arith.mulf %48, %49 : vector<16x2xf32>
    %51 = vector.extract_strided_slice %47 {offsets = [16, 0], sizes = [16, 2], strides = [1, 1]} : vector<32x2xf32> to vector<16x2xf32>
    %52 = vector.extract_strided_slice %17 {offsets = [32, 0], sizes = [16, 2], strides = [1, 1]} : vector<112x2xf32> to vector<16x2xf32>
    %53 = arith.mulf %51, %52 : vector<16x2xf32>
    %54 = vector.extract_strided_slice %13 {offsets = [48, 0], sizes = [16, 2], strides = [1, 1]} : vector<112x2xf32> to vector<16x2xf32>
    %55 = vector.extract_strided_slice %15 {offsets = [48, 0], sizes = [16, 2], strides = [1, 1]} : vector<112x2xf32> to vector<16x2xf32>
    %56 = tpu.concatenate %54, %55 in 0 : vector<16x2xf32>, vector<16x2xf32> -> vector<32x2xf32>
    %c3 = arith.constant 3 : index
    %c0_14 = arith.constant 0 : index
    %c0_15 = arith.constant 0 : index
    %57 = vector.load %arg1[%c3, %c0_14, %c0_15] : memref<8x32x32xf32, #tpu.memory_space<vmem>>, vector<1x32x32xf32>
    %58 = vector.shape_cast %57 : vector<1x32x32xf32> to vector<32x32xf32>
    %cst_16 = arith.constant dense<0.000000e+00> : vector<32x2xf32>
    %59 = tpu.matmul %58, %56, %cst_16 {dimension_numbers = #tpu.dot_dimension_numbers<[1], [0], [0], [1], [0, 0, 1, 1], [], []>} : vector<32x32xf32>, vector<32x2xf32>, vector<32x2xf32> -> vector<32x2xf32>
    %60 = vector.extract_strided_slice %59 {offsets = [0, 0], sizes = [16, 2], strides = [1, 1]} : vector<32x2xf32> to vector<16x2xf32>
    %61 = vector.extract_strided_slice %16 {offsets = [48, 0], sizes = [16, 2], strides = [1, 1]} : vector<112x2xf32> to vector<16x2xf32>
    %62 = arith.mulf %60, %61 : vector<16x2xf32>
    %63 = vector.extract_strided_slice %59 {offsets = [16, 0], sizes = [16, 2], strides = [1, 1]} : vector<32x2xf32> to vector<16x2xf32>
    %64 = vector.extract_strided_slice %17 {offsets = [48, 0], sizes = [16, 2], strides = [1, 1]} : vector<112x2xf32> to vector<16x2xf32>
    %65 = arith.mulf %63, %64 : vector<16x2xf32>
    %66 = vector.extract_strided_slice %13 {offsets = [64, 0], sizes = [16, 2], strides = [1, 1]} : vector<112x2xf32> to vector<16x2xf32>
    %67 = vector.extract_strided_slice %15 {offsets = [64, 0], sizes = [16, 2], strides = [1, 1]} : vector<112x2xf32> to vector<16x2xf32>
    %68 = tpu.concatenate %66, %67 in 0 : vector<16x2xf32>, vector<16x2xf32> -> vector<32x2xf32>
    %c4 = arith.constant 4 : index
    %c0_17 = arith.constant 0 : index
    %c0_18 = arith.constant 0 : index
    %69 = vector.load %arg1[%c4, %c0_17, %c0_18] : memref<8x32x32xf32, #tpu.memory_space<vmem>>, vector<1x32x32xf32>
    %70 = vector.shape_cast %69 : vector<1x32x32xf32> to vector<32x32xf32>
    %cst_19 = arith.constant dense<0.000000e+00> : vector<32x2xf32>
    %71 = tpu.matmul %70, %68, %cst_19 {dimension_numbers = #tpu.dot_dimension_numbers<[1], [0], [0], [1], [0, 0, 1, 1], [], []>} : vector<32x32xf32>, vector<32x2xf32>, vector<32x2xf32> -> vector<32x2xf32>
    %72 = vector.extract_strided_slice %71 {offsets = [0, 0], sizes = [16, 2], strides = [1, 1]} : vector<32x2xf32> to vector<16x2xf32>
    %73 = vector.extract_strided_slice %16 {offsets = [64, 0], sizes = [16, 2], strides = [1, 1]} : vector<112x2xf32> to vector<16x2xf32>
    %74 = arith.mulf %72, %73 : vector<16x2xf32>
    %75 = vector.extract_strided_slice %71 {offsets = [16, 0], sizes = [16, 2], strides = [1, 1]} : vector<32x2xf32> to vector<16x2xf32>
    %76 = vector.extract_strided_slice %17 {offsets = [64, 0], sizes = [16, 2], strides = [1, 1]} : vector<112x2xf32> to vector<16x2xf32>
    %77 = arith.mulf %75, %76 : vector<16x2xf32>
    %78 = vector.extract_strided_slice %13 {offsets = [80, 0], sizes = [16, 2], strides = [1, 1]} : vector<112x2xf32> to vector<16x2xf32>
    %79 = vector.extract_strided_slice %15 {offsets = [80, 0], sizes = [16, 2], strides = [1, 1]} : vector<112x2xf32> to vector<16x2xf32>
    %80 = tpu.concatenate %78, %79 in 0 : vector<16x2xf32>, vector<16x2xf32> -> vector<32x2xf32>
    %c5 = arith.constant 5 : index
    %c0_20 = arith.constant 0 : index
    %c0_21 = arith.constant 0 : index
    %81 = vector.load %arg1[%c5, %c0_20, %c0_21] : memref<8x32x32xf32, #tpu.memory_space<vmem>>, vector<1x32x32xf32>
    %82 = vector.shape_cast %81 : vector<1x32x32xf32> to vector<32x32xf32>
    %cst_22 = arith.constant dense<0.000000e+00> : vector<32x2xf32>
    %83 = tpu.matmul %82, %80, %cst_22 {dimension_numbers = #tpu.dot_dimension_numbers<[1], [0], [0], [1], [0, 0, 1, 1], [], []>} : vector<32x32xf32>, vector<32x2xf32>, vector<32x2xf32> -> vector<32x2xf32>
    %84 = vector.extract_strided_slice %83 {offsets = [0, 0], sizes = [16, 2], strides = [1, 1]} : vector<32x2xf32> to vector<16x2xf32>
    %85 = vector.extract_strided_slice %16 {offsets = [80, 0], sizes = [16, 2], strides = [1, 1]} : vector<112x2xf32> to vector<16x2xf32>
    %86 = arith.mulf %84, %85 : vector<16x2xf32>
    %87 = vector.extract_strided_slice %83 {offsets = [16, 0], sizes = [16, 2], strides = [1, 1]} : vector<32x2xf32> to vector<16x2xf32>
    %88 = vector.extract_strided_slice %17 {offsets = [80, 0], sizes = [16, 2], strides = [1, 1]} : vector<112x2xf32> to vector<16x2xf32>
    %89 = arith.mulf %87, %88 : vector<16x2xf32>
    %90 = vector.extract_strided_slice %13 {offsets = [96, 0], sizes = [16, 2], strides = [1, 1]} : vector<112x2xf32> to vector<16x2xf32>
    %91 = vector.extract_strided_slice %15 {offsets = [96, 0], sizes = [16, 2], strides = [1, 1]} : vector<112x2xf32> to vector<16x2xf32>
    %92 = tpu.concatenate %90, %91 in 0 : vector<16x2xf32>, vector<16x2xf32> -> vector<32x2xf32>
    %c6 = arith.constant 6 : index
    %c0_23 = arith.constant 0 : index
    %c0_24 = arith.constant 0 : index
    %93 = vector.load %arg1[%c6, %c0_23, %c0_24] : memref<8x32x32xf32, #tpu.memory_space<vmem>>, vector<1x32x32xf32>
    %94 = vector.shape_cast %93 : vector<1x32x32xf32> to vector<32x32xf32>
    %cst_25 = arith.constant dense<0.000000e+00> : vector<32x2xf32>
    %95 = tpu.matmul %94, %92, %cst_25 {dimension_numbers = #tpu.dot_dimension_numbers<[1], [0], [0], [1], [0, 0, 1, 1], [], []>} : vector<32x32xf32>, vector<32x2xf32>, vector<32x2xf32> -> vector<32x2xf32>
    %96 = vector.extract_strided_slice %95 {offsets = [0, 0], sizes = [16, 2], strides = [1, 1]} : vector<32x2xf32> to vector<16x2xf32>
    %97 = vector.extract_strided_slice %16 {offsets = [96, 0], sizes = [16, 2], strides = [1, 1]} : vector<112x2xf32> to vector<16x2xf32>
    %98 = arith.mulf %96, %97 : vector<16x2xf32>
    %99 = vector.extract_strided_slice %95 {offsets = [16, 0], sizes = [16, 2], strides = [1, 1]} : vector<32x2xf32> to vector<16x2xf32>
    %100 = vector.extract_strided_slice %17 {offsets = [96, 0], sizes = [16, 2], strides = [1, 1]} : vector<112x2xf32> to vector<16x2xf32>
    %101 = arith.mulf %99, %100 : vector<16x2xf32>
    %102 = tpu.concatenate %26, %38, %50, %62, %74, %86, %98 in 0 : vector<16x2xf32>, vector<16x2xf32>, vector<16x2xf32>, vector<16x2xf32>, vector<16x2xf32>, vector<16x2xf32>, vector<16x2xf32> -> vector<112x2xf32>
    %103 = tpu.concatenate %29, %41, %53, %65, %77, %89, %101 in 0 : vector<16x2xf32>, vector<16x2xf32>, vector<16x2xf32>, vector<16x2xf32>, vector<16x2xf32>, vector<16x2xf32>, vector<16x2xf32> -> vector<112x2xf32>
    %104 = tpu.concatenate %102, %103 in 1 : vector<112x2xf32>, vector<112x2xf32> -> vector<112x4xf32>
    %c192 = arith.constant 192 : index
    %c0_26 = arith.constant 0 : index
    %105 = vector.load %arg2[%c192, %c0_26] : memref<240x128xf32, #tpu.memory_space<vmem>>, vector<4x128xf32>
    %c236 = arith.constant 236 : index
    %c0_27 = arith.constant 0 : index
    %106 = vector.load %arg2[%c236, %c0_27] : memref<240x128xf32, #tpu.memory_space<vmem>>, vector<1x128xf32>
    %cst_28 = arith.constant dense<0.000000e+00> : vector<112x128xf32>
    %107 = tpu.matmul %104, %105, %cst_28 {dimension_numbers = #tpu.dot_dimension_numbers<[1], [0], [0], [1], [0, 0, 1, 1], [], []>} : vector<112x4xf32>, vector<4x128xf32>, vector<112x128xf32> -> vector<112x128xf32>
    %108 = vector.broadcast %106 : vector<1x128xf32> to vector<112x128xf32>
    %109 = arith.addf %107, %108 : vector<112x128xf32>
    %c0_29 = arith.constant 0 : index
    %c0_30 = arith.constant 0 : index
    %110 = vector.load %arg4[%c0_29, %c0_30] : memref<112x128xf32, #tpu.memory_space<vmem>>, vector<112x128xf32>
    tpu.vector_store %arg4[%c0_29, %c0_30], %109 {strides = array<i32>} : memref<112x128xf32, #tpu.memory_space<vmem>>, vector<112x128xf32>,
    %c0_31 = arith.constant 0 : index
    %c0_32 = arith.constant 0 : index
    %111 = vector.load %arg2[%c0_31, %c0_32] : memref<240x128xf32, #tpu.memory_space<vmem>>, vector<16x32xf32>
    %c232 = arith.constant 232 : index
    %c0_33 = arith.constant 0 : index
    %112 = vector.load %arg2[%c232, %c0_33] : memref<240x128xf32, #tpu.memory_space<vmem>>, vector<1x32xf32>
    %c0_34 = arith.constant 0 : index
    %c0_35 = arith.constant 0 : index
    %113 = vector.load %arg0[%c0_34, %c0_35] : memref<128x16xf32, #tpu.memory_space<vmem>>, vector<16x16xf32>
    %c0_36 = arith.constant 0 : index
    %c0_37 = arith.constant 0 : index
    %c0_38 = arith.constant 0 : index
    %114 = vector.load %arg1[%c0_36, %c0_37, %c0_38] : memref<8x32x32xf32, #tpu.memory_space<vmem>>, vector<1x32x32xf32>
    %115 = vector.shape_cast %114 : vector<1x32x32xf32> to vector<32x32xf32>
    %116 = vector.extract_strided_slice %115 {offsets = [0, 0], sizes = [16, 16], strides = [1, 1]} : vector<32x32xf32> to vector<16x16xf32>
    %cst_39 = arith.constant dense<0.000000e+00> : vector<16x32xf32>
    %117 = tpu.matmul %113, %111, %cst_39 {dimension_numbers = #tpu.dot_dimension_numbers<[1], [0], [0], [1], [0, 0, 1, 1], [], []>} : vector<16x16xf32>, vector<16x32xf32>, vector<16x32xf32> -> vector<16x32xf32>
    %cst_40 = arith.constant dense<0.000000e+00> : vector<16x32xf32>
    %118 = tpu.matmul %116, %117, %cst_40 {dimension_numbers = #tpu.dot_dimension_numbers<[1], [0], [0], [1], [0, 0, 1, 1], [], []>} : vector<16x16xf32>, vector<16x32xf32>, vector<16x32xf32> -> vector<16x32xf32>
    %119 = vector.broadcast %112 : vector<1x32xf32> to vector<16x32xf32>
    %120 = arith.addf %118, %119 : vector<16x32xf32>
    %cst_41 = arith.constant 0.000000e+00 : f32
    %121 = vector.broadcast %cst_41 : f32 to vector<16x32xf32>
    %122 = arith.maximumf %120, %121 : vector<16x32xf32>
    %c234 = arith.constant 234 : index
    %c0_42 = arith.constant 0 : index
    %123 = vector.load %arg2[%c234, %c0_42] : memref<240x128xf32, #tpu.memory_space<vmem>>, vector<1x64xf32>
    %124 = vector.shape_cast %123 : vector<1x64xf32> to vector<1x64xf32>
    %125 = vector.broadcast %124 : vector<1x64xf32> to vector<16x64xf32>
    %c235 = arith.constant 235 : index
    %c0_43 = arith.constant 0 : index
    %126 = vector.load %arg2[%c235, %c0_43] : memref<240x128xf32, #tpu.memory_space<vmem>>, vector<1x32xf32>
    %127 = vector.shape_cast %126 : vector<1x32xf32> to vector<1x32xf32>
    %128 = vector.broadcast %127 : vector<1x32xf32> to vector<16x32xf32>
    %c32 = arith.constant 32 : index
    %c0_44 = arith.constant 0 : index
    %129 = vector.load %arg2[%c32, %c0_44] : memref<240x128xf32, #tpu.memory_space<vmem>>, vector<64x64xf32>
    %c96 = arith.constant 96 : index
    %c0_45 = arith.constant 0 : index
    %130 = vector.load %arg2[%c96, %c0_45] : memref<240x128xf32, #tpu.memory_space<vmem>>, vector<64x32xf32>
    %c160 = arith.constant 160 : index
    %c0_46 = arith.constant 0 : index
    %131 = vector.load %arg2[%c160, %c0_46] : memref<240x128xf32, #tpu.memory_space<vmem>>, vector<32x128xf32>
    %132 = tpu.concatenate %122, %122 in 0 : vector<16x32xf32>, vector<16x32xf32> -> vector<32x32xf32>
    %c0_47 = arith.constant 0 : index
    %c0_48 = arith.constant 0 : index
    %c0_49 = arith.constant 0 : index
    %133 = vector.load %arg1[%c0_47, %c0_48, %c0_49] : memref<8x32x32xf32, #tpu.memory_space<vmem>>, vector<1x32x32xf32>
    %134 = vector.shape_cast %133 : vector<1x32x32xf32> to vector<32x32xf32>
    %cst_50 = arith.constant dense<0.000000e+00> : vector<32x32xf32>
    %135 = tpu.matmul %134, %132, %cst_50 {dimension_numbers = #tpu.dot_dimension_numbers<[1], [0], [0], [1], [0, 0, 1, 1], [], []>} : vector<32x32xf32>, vector<32x32xf32>, vector<32x32xf32> -> vector<32x32xf32>
    %136 = vector.extract_strided_slice %135 {offsets = [0, 0], sizes = [16, 32], strides = [1, 1]} : vector<32x32xf32> to vector<16x32xf32>
    %137 = vector.extract_strided_slice %135 {offsets = [16, 0], sizes = [16, 32], strides = [1, 1]} : vector<32x32xf32> to vector<16x32xf32>
    %138 = tpu.concatenate %136, %137 in 1 : vector<16x32xf32>, vector<16x32xf32> -> vector<16x64xf32>
    %cst_51 = arith.constant dense<0.000000e+00> : vector<16x64xf32>
    %139 = tpu.matmul %138, %129, %cst_51 {dimension_numbers = #tpu.dot_dimension_numbers<[1], [0], [0], [1], [0, 0, 1, 1], [], []>} : vector<16x64xf32>, vector<64x64xf32>, vector<16x64xf32> -> vector<16x64xf32>
    %140 = arith.addf %139, %125 : vector<16x64xf32>
    %cst_52 = arith.constant 0.000000e+00 : f32
    %141 = vector.broadcast %cst_52 : f32 to vector<16x64xf32>
    %142 = arith.maximumf %140, %141 : vector<16x64xf32>
    %cst_53 = arith.constant dense<0.000000e+00> : vector<16x32xf32>
    %143 = tpu.matmul %142, %130, %cst_53 {dimension_numbers = #tpu.dot_dimension_numbers<[1], [0], [0], [1], [0, 0, 1, 1], [], []>} : vector<16x64xf32>, vector<64x32xf32>, vector<16x32xf32> -> vector<16x32xf32>
    %144 = arith.addf %143, %128 : vector<16x32xf32>
    %c0_54 = arith.constant 0 : index
    %c0_55 = arith.constant 0 : index
    %145 = vector.load %arg4[%c0_54, %c0_55] : memref<112x128xf32, #tpu.memory_space<vmem>>, vector<16x128xf32>
    %cst_56 = arith.constant dense<0.000000e+00> : vector<16x128xf32>
    %146 = tpu.matmul %144, %131, %cst_56 {dimension_numbers = #tpu.dot_dimension_numbers<[1], [0], [0], [1], [0, 0, 1, 1], [], []>} : vector<16x32xf32>, vector<32x128xf32>, vector<16x128xf32> -> vector<16x128xf32>
    %147 = arith.addf %145, %146 : vector<16x128xf32>
    %148 = vector.extract_strided_slice %147 {offsets = [0, 0], sizes = [16, 32], strides = [1, 1]} : vector<16x128xf32> to vector<16x32xf32>
    %149 = arith.negf %148 : vector<16x32xf32>
    %150 = math.exp %149 : vector<16x32xf32>
    %cst_57 = arith.constant 1.000000e+00 : f32
    %151 = vector.broadcast %cst_57 : f32 to vector<16x32xf32>
    %152 = arith.addf %151, %150 : vector<16x32xf32>
    %153 = arith.divf %151, %152 : vector<16x32xf32>
    %154 = vector.extract_strided_slice %147 {offsets = [0, 32], sizes = [16, 32], strides = [1, 1]} : vector<16x128xf32> to vector<16x32xf32>
    %155 = arith.negf %154 : vector<16x32xf32>
    %156 = math.exp %155 : vector<16x32xf32>
    %cst_58 = arith.constant 1.000000e+00 : f32
    %157 = vector.broadcast %cst_58 : f32 to vector<16x32xf32>
    %158 = arith.addf %157, %156 : vector<16x32xf32>
    %159 = arith.divf %157, %158 : vector<16x32xf32>
    %160 = vector.extract_strided_slice %147 {offsets = [0, 64], sizes = [16, 32], strides = [1, 1]} : vector<16x128xf32> to vector<16x32xf32>
    %161 = vector.extract_strided_slice %147 {offsets = [0, 96], sizes = [16, 32], strides = [1, 1]} : vector<16x128xf32> to vector<16x32xf32>
    %162 = arith.mulf %153, %161 : vector<16x32xf32>
    %163 = arith.addf %160, %162 : vector<16x32xf32>
    %164 = math.tanh %163 : vector<16x32xf32>
    %cst_59 = arith.constant 1.000000e+00 : f32
    %165 = vector.broadcast %cst_59 : f32 to vector<16x32xf32>
    %166 = arith.subf %165, %159 : vector<16x32xf32>
    %167 = arith.mulf %166, %164 : vector<16x32xf32>
    %168 = arith.mulf %159, %144 : vector<16x32xf32>
    %169 = arith.addf %167, %168 : vector<16x32xf32>
    %c32_60 = arith.constant 32 : index
    %c0_61 = arith.constant 0 : index
    %170 = vector.load %arg2[%c32_60, %c0_61] : memref<240x128xf32, #tpu.memory_space<vmem>>, vector<64x64xf32>
    %c96_62 = arith.constant 96 : index
    %c0_63 = arith.constant 0 : index
    %171 = vector.load %arg2[%c96_62, %c0_63] : memref<240x128xf32, #tpu.memory_space<vmem>>, vector<64x32xf32>
    %c160_64 = arith.constant 160 : index
    %c0_65 = arith.constant 0 : index
    %172 = vector.load %arg2[%c160_64, %c0_65] : memref<240x128xf32, #tpu.memory_space<vmem>>, vector<32x128xf32>
    %173 = tpu.concatenate %169, %169 in 0 : vector<16x32xf32>, vector<16x32xf32> -> vector<32x32xf32>
    %c1_66 = arith.constant 1 : index
    %c0_67 = arith.constant 0 : index
    %c0_68 = arith.constant 0 : index
    %174 = vector.load %arg1[%c1_66, %c0_67, %c0_68] : memref<8x32x32xf32, #tpu.memory_space<vmem>>, vector<1x32x32xf32>
    %175 = vector.shape_cast %174 : vector<1x32x32xf32> to vector<32x32xf32>
    %cst_69 = arith.constant dense<0.000000e+00> : vector<32x32xf32>
    %176 = tpu.matmul %175, %173, %cst_69 {dimension_numbers = #tpu.dot_dimension_numbers<[1], [0], [0], [1], [0, 0, 1, 1], [], []>} : vector<32x32xf32>, vector<32x32xf32>, vector<32x32xf32> -> vector<32x32xf32>
    %177 = vector.extract_strided_slice %176 {offsets = [0, 0], sizes = [16, 32], strides = [1, 1]} : vector<32x32xf32> to vector<16x32xf32>
    %178 = vector.extract_strided_slice %176 {offsets = [16, 0], sizes = [16, 32], strides = [1, 1]} : vector<32x32xf32> to vector<16x32xf32>
    %179 = tpu.concatenate %177, %178 in 1 : vector<16x32xf32>, vector<16x32xf32> -> vector<16x64xf32>
    %cst_70 = arith.constant dense<0.000000e+00> : vector<16x64xf32>
    %180 = tpu.matmul %179, %170, %cst_70 {dimension_numbers = #tpu.dot_dimension_numbers<[1], [0], [0], [1], [0, 0, 1, 1], [], []>} : vector<16x64xf32>, vector<64x64xf32>, vector<16x64xf32> -> vector<16x64xf32>
    %181 = arith.addf %180, %125 : vector<16x64xf32>
    %cst_71 = arith.constant 0.000000e+00 : f32
    %182 = vector.broadcast %cst_71 : f32 to vector<16x64xf32>
    %183 = arith.maximumf %181, %182 : vector<16x64xf32>
    %cst_72 = arith.constant dense<0.000000e+00> : vector<16x32xf32>
    %184 = tpu.matmul %183, %171, %cst_72 {dimension_numbers = #tpu.dot_dimension_numbers<[1], [0], [0], [1], [0, 0, 1, 1], [], []>} : vector<16x64xf32>, vector<64x32xf32>, vector<16x32xf32> -> vector<16x32xf32>
    %185 = arith.addf %184, %128 : vector<16x32xf32>
    %c16_73 = arith.constant 16 : index
    %c0_74 = arith.constant 0 : index
    %186 = vector.load %arg4[%c16_73, %c0_74] : memref<112x128xf32, #tpu.memory_space<vmem>>, vector<16x128xf32>
    %cst_75 = arith.constant dense<0.000000e+00> : vector<16x128xf32>
    %187 = tpu.matmul %185, %172, %cst_75 {dimension_numbers = #tpu.dot_dimension_numbers<[1], [0], [0], [1], [0, 0, 1, 1], [], []>} : vector<16x32xf32>, vector<32x128xf32>, vector<16x128xf32> -> vector<16x128xf32>
    %188 = arith.addf %186, %187 : vector<16x128xf32>
    %189 = vector.extract_strided_slice %188 {offsets = [0, 0], sizes = [16, 32], strides = [1, 1]} : vector<16x128xf32> to vector<16x32xf32>
    %190 = arith.negf %189 : vector<16x32xf32>
    %191 = math.exp %190 : vector<16x32xf32>
    %cst_76 = arith.constant 1.000000e+00 : f32
    %192 = vector.broadcast %cst_76 : f32 to vector<16x32xf32>
    %193 = arith.addf %192, %191 : vector<16x32xf32>
    %194 = arith.divf %192, %193 : vector<16x32xf32>
    %195 = vector.extract_strided_slice %188 {offsets = [0, 32], sizes = [16, 32], strides = [1, 1]} : vector<16x128xf32> to vector<16x32xf32>
    %196 = arith.negf %195 : vector<16x32xf32>
    %197 = math.exp %196 : vector<16x32xf32>
    %cst_77 = arith.constant 1.000000e+00 : f32
    %198 = vector.broadcast %cst_77 : f32 to vector<16x32xf32>
    %199 = arith.addf %198, %197 : vector<16x32xf32>
    %200 = arith.divf %198, %199 : vector<16x32xf32>
    %201 = vector.extract_strided_slice %188 {offsets = [0, 64], sizes = [16, 32], strides = [1, 1]} : vector<16x128xf32> to vector<16x32xf32>
    %202 = vector.extract_strided_slice %188 {offsets = [0, 96], sizes = [16, 32], strides = [1, 1]} : vector<16x128xf32> to vector<16x32xf32>
    %203 = arith.mulf %194, %202 : vector<16x32xf32>
    %204 = arith.addf %201, %203 : vector<16x32xf32>
    %205 = math.tanh %204 : vector<16x32xf32>
    %cst_78 = arith.constant 1.000000e+00 : f32
    %206 = vector.broadcast %cst_78 : f32 to vector<16x32xf32>
    %207 = arith.subf %206, %200 : vector<16x32xf32>
    %208 = arith.mulf %207, %205 : vector<16x32xf32>
    %209 = arith.mulf %200, %185 : vector<16x32xf32>
    %210 = arith.addf %208, %209 : vector<16x32xf32>
    %c32_79 = arith.constant 32 : index
    %c0_80 = arith.constant 0 : index
    %211 = vector.load %arg2[%c32_79, %c0_80] : memref<240x128xf32, #tpu.memory_space<vmem>>, vector<64x64xf32>
    %c96_81 = arith.constant 96 : index
    %c0_82 = arith.constant 0 : index
    %212 = vector.load %arg2[%c96_81, %c0_82] : memref<240x128xf32, #tpu.memory_space<vmem>>, vector<64x32xf32>
    %c160_83 = arith.constant 160 : index
    %c0_84 = arith.constant 0 : index
    %213 = vector.load %arg2[%c160_83, %c0_84] : memref<240x128xf32, #tpu.memory_space<vmem>>, vector<32x128xf32>
    %214 = tpu.concatenate %210, %210 in 0 : vector<16x32xf32>, vector<16x32xf32> -> vector<32x32xf32>
    %c2_85 = arith.constant 2 : index
    %c0_86 = arith.constant 0 : index
    %c0_87 = arith.constant 0 : index
    %215 = vector.load %arg1[%c2_85, %c0_86, %c0_87] : memref<8x32x32xf32, #tpu.memory_space<vmem>>, vector<1x32x32xf32>
    %216 = vector.shape_cast %215 : vector<1x32x32xf32> to vector<32x32xf32>
    %cst_88 = arith.constant dense<0.000000e+00> : vector<32x32xf32>
    %217 = tpu.matmul %216, %214, %cst_88 {dimension_numbers = #tpu.dot_dimension_numbers<[1], [0], [0], [1], [0, 0, 1, 1], [], []>} : vector<32x32xf32>, vector<32x32xf32>, vector<32x32xf32> -> vector<32x32xf32>
    %218 = vector.extract_strided_slice %217 {offsets = [0, 0], sizes = [16, 32], strides = [1, 1]} : vector<32x32xf32> to vector<16x32xf32>
    %219 = vector.extract_strided_slice %217 {offsets = [16, 0], sizes = [16, 32], strides = [1, 1]} : vector<32x32xf32> to vector<16x32xf32>
    %220 = tpu.concatenate %218, %219 in 1 : vector<16x32xf32>, vector<16x32xf32> -> vector<16x64xf32>
    %cst_89 = arith.constant dense<0.000000e+00> : vector<16x64xf32>
    %221 = tpu.matmul %220, %211, %cst_89 {dimension_numbers = #tpu.dot_dimension_numbers<[1], [0], [0], [1], [0, 0, 1, 1], [], []>} : vector<16x64xf32>, vector<64x64xf32>, vector<16x64xf32> -> vector<16x64xf32>
    %222 = arith.addf %221, %125 : vector<16x64xf32>
    %cst_90 = arith.constant 0.000000e+00 : f32
    %223 = vector.broadcast %cst_90 : f32 to vector<16x64xf32>
    %224 = arith.maximumf %222, %223 : vector<16x64xf32>
    %cst_91 = arith.constant dense<0.000000e+00> : vector<16x32xf32>
    %225 = tpu.matmul %224, %212, %cst_91 {dimension_numbers = #tpu.dot_dimension_numbers<[1], [0], [0], [1], [0, 0, 1, 1], [], []>} : vector<16x64xf32>, vector<64x32xf32>, vector<16x32xf32> -> vector<16x32xf32>
    %226 = arith.addf %225, %128 : vector<16x32xf32>
    %c32_92 = arith.constant 32 : index
    %c0_93 = arith.constant 0 : index
    %227 = vector.load %arg4[%c32_92, %c0_93] : memref<112x128xf32, #tpu.memory_space<vmem>>, vector<16x128xf32>
    %cst_94 = arith.constant dense<0.000000e+00> : vector<16x128xf32>
    %228 = tpu.matmul %226, %213, %cst_94 {dimension_numbers = #tpu.dot_dimension_numbers<[1], [0], [0], [1], [0, 0, 1, 1], [], []>} : vector<16x32xf32>, vector<32x128xf32>, vector<16x128xf32> -> vector<16x128xf32>
    %229 = arith.addf %227, %228 : vector<16x128xf32>
    %230 = vector.extract_strided_slice %229 {offsets = [0, 0], sizes = [16, 32], strides = [1, 1]} : vector<16x128xf32> to vector<16x32xf32>
    %231 = arith.negf %230 : vector<16x32xf32>
    %232 = math.exp %231 : vector<16x32xf32>
    %cst_95 = arith.constant 1.000000e+00 : f32
    %233 = vector.broadcast %cst_95 : f32 to vector<16x32xf32>
    %234 = arith.addf %233, %232 : vector<16x32xf32>
    %235 = arith.divf %233, %234 : vector<16x32xf32>
    %236 = vector.extract_strided_slice %229 {offsets = [0, 32], sizes = [16, 32], strides = [1, 1]} : vector<16x128xf32> to vector<16x32xf32>
    %237 = arith.negf %236 : vector<16x32xf32>
    %238 = math.exp %237 : vector<16x32xf32>
    %cst_96 = arith.constant 1.000000e+00 : f32
    %239 = vector.broadcast %cst_96 : f32 to vector<16x32xf32>
    %240 = arith.addf %239, %238 : vector<16x32xf32>
    %241 = arith.divf %239, %240 : vector<16x32xf32>
    %242 = vector.extract_strided_slice %229 {offsets = [0, 64], sizes = [16, 32], strides = [1, 1]} : vector<16x128xf32> to vector<16x32xf32>
    %243 = vector.extract_strided_slice %229 {offsets = [0, 96], sizes = [16, 32], strides = [1, 1]} : vector<16x128xf32> to vector<16x32xf32>
    %244 = arith.mulf %235, %243 : vector<16x32xf32>
    %245 = arith.addf %242, %244 : vector<16x32xf32>
    %246 = math.tanh %245 : vector<16x32xf32>
    %cst_97 = arith.constant 1.000000e+00 : f32
    %247 = vector.broadcast %cst_97 : f32 to vector<16x32xf32>
    %248 = arith.subf %247, %241 : vector<16x32xf32>
    %249 = arith.mulf %248, %246 : vector<16x32xf32>
    %250 = arith.mulf %241, %226 : vector<16x32xf32>
    %251 = arith.addf %249, %250 : vector<16x32xf32>
    %c0_98 = arith.constant 0 : index
    %c0_99 = arith.constant 0 : index
    %252 = vector.load %arg5[%c0_98, %c0_99] : memref<80x32xf32, #tpu.memory_space<vmem>>, vector<16x32xf32>
    tpu.vector_store %arg5[%c0_98, %c0_99], %251 {strides = array<i32>} : memref<80x32xf32, #tpu.memory_space<vmem>>, vector<16x32xf32>,
    %c32_100 = arith.constant 32 : index
    %c0_101 = arith.constant 0 : index
    %253 = vector.load %arg2[%c32_100, %c0_101] : memref<240x128xf32, #tpu.memory_space<vmem>>, vector<64x64xf32>
    %c96_102 = arith.constant 96 : index
    %c0_103 = arith.constant 0 : index
    %254 = vector.load %arg2[%c96_102, %c0_103] : memref<240x128xf32, #tpu.memory_space<vmem>>, vector<64x32xf32>
    %c160_104 = arith.constant 160 : index
    %c0_105 = arith.constant 0 : index
    %255 = vector.load %arg2[%c160_104, %c0_105] : memref<240x128xf32, #tpu.memory_space<vmem>>, vector<32x128xf32>
    %256 = tpu.concatenate %251, %251 in 0 : vector<16x32xf32>, vector<16x32xf32> -> vector<32x32xf32>
    %c3_106 = arith.constant 3 : index
    %c0_107 = arith.constant 0 : index
    %c0_108 = arith.constant 0 : index
    %257 = vector.load %arg1[%c3_106, %c0_107, %c0_108] : memref<8x32x32xf32, #tpu.memory_space<vmem>>, vector<1x32x32xf32>
    %258 = vector.shape_cast %257 : vector<1x32x32xf32> to vector<32x32xf32>
    %cst_109 = arith.constant dense<0.000000e+00> : vector<32x32xf32>
    %259 = tpu.matmul %258, %256, %cst_109 {dimension_numbers = #tpu.dot_dimension_numbers<[1], [0], [0], [1], [0, 0, 1, 1], [], []>} : vector<32x32xf32>, vector<32x32xf32>, vector<32x32xf32> -> vector<32x32xf32>
    %260 = vector.extract_strided_slice %259 {offsets = [0, 0], sizes = [16, 32], strides = [1, 1]} : vector<32x32xf32> to vector<16x32xf32>
    %261 = vector.extract_strided_slice %259 {offsets = [16, 0], sizes = [16, 32], strides = [1, 1]} : vector<32x32xf32> to vector<16x32xf32>
    %262 = tpu.concatenate %260, %261 in 1 : vector<16x32xf32>, vector<16x32xf32> -> vector<16x64xf32>
    %cst_110 = arith.constant dense<0.000000e+00> : vector<16x64xf32>
    %263 = tpu.matmul %262, %253, %cst_110 {dimension_numbers = #tpu.dot_dimension_numbers<[1], [0], [0], [1], [0, 0, 1, 1], [], []>} : vector<16x64xf32>, vector<64x64xf32>, vector<16x64xf32> -> vector<16x64xf32>
    %264 = arith.addf %263, %125 : vector<16x64xf32>
    %cst_111 = arith.constant 0.000000e+00 : f32
    %265 = vector.broadcast %cst_111 : f32 to vector<16x64xf32>
    %266 = arith.maximumf %264, %265 : vector<16x64xf32>
    %cst_112 = arith.constant dense<0.000000e+00> : vector<16x32xf32>
    %267 = tpu.matmul %266, %254, %cst_112 {dimension_numbers = #tpu.dot_dimension_numbers<[1], [0], [0], [1], [0, 0, 1, 1], [], []>} : vector<16x64xf32>, vector<64x32xf32>, vector<16x32xf32> -> vector<16x32xf32>
    %268 = arith.addf %267, %128 : vector<16x32xf32>
    %c48 = arith.constant 48 : index
    %c0_113 = arith.constant 0 : index
    %269 = vector.load %arg4[%c48, %c0_113] : memref<112x128xf32, #tpu.memory_space<vmem>>, vector<16x128xf32>
    %cst_114 = arith.constant dense<0.000000e+00> : vector<16x128xf32>
    %270 = tpu.matmul %268, %255, %cst_114 {dimension_numbers = #tpu.dot_dimension_numbers<[1], [0], [0], [1], [0, 0, 1, 1], [], []>} : vector<16x32xf32>, vector<32x128xf32>, vector<16x128xf32> -> vector<16x128xf32>
    %271 = arith.addf %269, %270 : vector<16x128xf32>
    %272 = vector.extract_strided_slice %271 {offsets = [0, 0], sizes = [16, 32], strides = [1, 1]} : vector<16x128xf32> to vector<16x32xf32>
    %273 = arith.negf %272 : vector<16x32xf32>
    %274 = math.exp %273 : vector<16x32xf32>
    %cst_115 = arith.constant 1.000000e+00 : f32
    %275 = vector.broadcast %cst_115 : f32 to vector<16x32xf32>
    %276 = arith.addf %275, %274 : vector<16x32xf32>
    %277 = arith.divf %275, %276 : vector<16x32xf32>
    %278 = vector.extract_strided_slice %271 {offsets = [0, 32], sizes = [16, 32], strides = [1, 1]} : vector<16x128xf32> to vector<16x32xf32>
    %279 = arith.negf %278 : vector<16x32xf32>
    %280 = math.exp %279 : vector<16x32xf32>
    %cst_116 = arith.constant 1.000000e+00 : f32
    %281 = vector.broadcast %cst_116 : f32 to vector<16x32xf32>
    %282 = arith.addf %281, %280 : vector<16x32xf32>
    %283 = arith.divf %281, %282 : vector<16x32xf32>
    %284 = vector.extract_strided_slice %271 {offsets = [0, 64], sizes = [16, 32], strides = [1, 1]} : vector<16x128xf32> to vector<16x32xf32>
    %285 = vector.extract_strided_slice %271 {offsets = [0, 96], sizes = [16, 32], strides = [1, 1]} : vector<16x128xf32> to vector<16x32xf32>
    %286 = arith.mulf %277, %285 : vector<16x32xf32>
    %287 = arith.addf %284, %286 : vector<16x32xf32>
    %288 = math.tanh %287 : vector<16x32xf32>
    %cst_117 = arith.constant 1.000000e+00 : f32
    %289 = vector.broadcast %cst_117 : f32 to vector<16x32xf32>
    %290 = arith.subf %289, %283 : vector<16x32xf32>
    %291 = arith.mulf %290, %288 : vector<16x32xf32>
    %292 = arith.mulf %283, %268 : vector<16x32xf32>
    %293 = arith.addf %291, %292 : vector<16x32xf32>
    %c16_118 = arith.constant 16 : index
    %c0_119 = arith.constant 0 : index
    %294 = vector.load %arg5[%c16_118, %c0_119] : memref<80x32xf32, #tpu.memory_space<vmem>>, vector<16x32xf32>
    tpu.vector_store %arg5[%c16_118, %c0_119], %293 {strides = array<i32>} : memref<80x32xf32, #tpu.memory_space<vmem>>, vector<16x32xf32>,
    %c32_120 = arith.constant 32 : index
    %c0_121 = arith.constant 0 : index
    %295 = vector.load %arg2[%c32_120, %c0_121] : memref<240x128xf32, #tpu.memory_space<vmem>>, vector<64x64xf32>
    %c96_122 = arith.constant 96 : index
    %c0_123 = arith.constant 0 : index
    %296 = vector.load %arg2[%c96_122, %c0_123] : memref<240x128xf32, #tpu.memory_space<vmem>>, vector<64x32xf32>
    %c160_124 = arith.constant 160 : index
    %c0_125 = arith.constant 0 : index
    %297 = vector.load %arg2[%c160_124, %c0_125] : memref<240x128xf32, #tpu.memory_space<vmem>>, vector<32x128xf32>
    %298 = tpu.concatenate %293, %293 in 0 : vector<16x32xf32>, vector<16x32xf32> -> vector<32x32xf32>
    %c4_126 = arith.constant 4 : index
    %c0_127 = arith.constant 0 : index
    %c0_128 = arith.constant 0 : index
    %299 = vector.load %arg1[%c4_126, %c0_127, %c0_128] : memref<8x32x32xf32, #tpu.memory_space<vmem>>, vector<1x32x32xf32>
    %300 = vector.shape_cast %299 : vector<1x32x32xf32> to vector<32x32xf32>
    %cst_129 = arith.constant dense<0.000000e+00> : vector<32x32xf32>
    %301 = tpu.matmul %300, %298, %cst_129 {dimension_numbers = #tpu.dot_dimension_numbers<[1], [0], [0], [1], [0, 0, 1, 1], [], []>} : vector<32x32xf32>, vector<32x32xf32>, vector<32x32xf32> -> vector<32x32xf32>
    %302 = vector.extract_strided_slice %301 {offsets = [0, 0], sizes = [16, 32], strides = [1, 1]} : vector<32x32xf32> to vector<16x32xf32>
    %303 = vector.extract_strided_slice %301 {offsets = [16, 0], sizes = [16, 32], strides = [1, 1]} : vector<32x32xf32> to vector<16x32xf32>
    %304 = tpu.concatenate %302, %303 in 1 : vector<16x32xf32>, vector<16x32xf32> -> vector<16x64xf32>
    %cst_130 = arith.constant dense<0.000000e+00> : vector<16x64xf32>
    %305 = tpu.matmul %304, %295, %cst_130 {dimension_numbers = #tpu.dot_dimension_numbers<[1], [0], [0], [1], [0, 0, 1, 1], [], []>} : vector<16x64xf32>, vector<64x64xf32>, vector<16x64xf32> -> vector<16x64xf32>
    %306 = arith.addf %305, %125 : vector<16x64xf32>
    %cst_131 = arith.constant 0.000000e+00 : f32
    %307 = vector.broadcast %cst_131 : f32 to vector<16x64xf32>
    %308 = arith.maximumf %306, %307 : vector<16x64xf32>
    %cst_132 = arith.constant dense<0.000000e+00> : vector<16x32xf32>
    %309 = tpu.matmul %308, %296, %cst_132 {dimension_numbers = #tpu.dot_dimension_numbers<[1], [0], [0], [1], [0, 0, 1, 1], [], []>} : vector<16x64xf32>, vector<64x32xf32>, vector<16x32xf32> -> vector<16x32xf32>
    %310 = arith.addf %309, %128 : vector<16x32xf32>
    %c64 = arith.constant 64 : index
    %c0_133 = arith.constant 0 : index
    %311 = vector.load %arg4[%c64, %c0_133] : memref<112x128xf32, #tpu.memory_space<vmem>>, vector<16x128xf32>
    %cst_134 = arith.constant dense<0.000000e+00> : vector<16x128xf32>
    %312 = tpu.matmul %310, %297, %cst_134 {dimension_numbers = #tpu.dot_dimension_numbers<[1], [0], [0], [1], [0, 0, 1, 1], [], []>} : vector<16x32xf32>, vector<32x128xf32>, vector<16x128xf32> -> vector<16x128xf32>
    %313 = arith.addf %311, %312 : vector<16x128xf32>
    %314 = vector.extract_strided_slice %313 {offsets = [0, 0], sizes = [16, 32], strides = [1, 1]} : vector<16x128xf32> to vector<16x32xf32>
    %315 = arith.negf %314 : vector<16x32xf32>
    %316 = math.exp %315 : vector<16x32xf32>
    %cst_135 = arith.constant 1.000000e+00 : f32
    %317 = vector.broadcast %cst_135 : f32 to vector<16x32xf32>
    %318 = arith.addf %317, %316 : vector<16x32xf32>
    %319 = arith.divf %317, %318 : vector<16x32xf32>
    %320 = vector.extract_strided_slice %313 {offsets = [0, 32], sizes = [16, 32], strides = [1, 1]} : vector<16x128xf32> to vector<16x32xf32>
    %321 = arith.negf %320 : vector<16x32xf32>
    %322 = math.exp %321 : vector<16x32xf32>
    %cst_136 = arith.constant 1.000000e+00 : f32
    %323 = vector.broadcast %cst_136 : f32 to vector<16x32xf32>
    %324 = arith.addf %323, %322 : vector<16x32xf32>
    %325 = arith.divf %323, %324 : vector<16x32xf32>
    %326 = vector.extract_strided_slice %313 {offsets = [0, 64], sizes = [16, 32], strides = [1, 1]} : vector<16x128xf32> to vector<16x32xf32>
    %327 = vector.extract_strided_slice %313 {offsets = [0, 96], sizes = [16, 32], strides = [1, 1]} : vector<16x128xf32> to vector<16x32xf32>
    %328 = arith.mulf %319, %327 : vector<16x32xf32>
    %329 = arith.addf %326, %328 : vector<16x32xf32>
    %330 = math.tanh %329 : vector<16x32xf32>
    %cst_137 = arith.constant 1.000000e+00 : f32
    %331 = vector.broadcast %cst_137 : f32 to vector<16x32xf32>
    %332 = arith.subf %331, %325 : vector<16x32xf32>
    %333 = arith.mulf %332, %330 : vector<16x32xf32>
    %334 = arith.mulf %325, %310 : vector<16x32xf32>
    %335 = arith.addf %333, %334 : vector<16x32xf32>
    %c32_138 = arith.constant 32 : index
    %c0_139 = arith.constant 0 : index
    %336 = vector.load %arg5[%c32_138, %c0_139] : memref<80x32xf32, #tpu.memory_space<vmem>>, vector<16x32xf32>
    tpu.vector_store %arg5[%c32_138, %c0_139], %335 {strides = array<i32>} : memref<80x32xf32, #tpu.memory_space<vmem>>, vector<16x32xf32>,
    %c32_140 = arith.constant 32 : index
    %c0_141 = arith.constant 0 : index
    %337 = vector.load %arg2[%c32_140, %c0_141] : memref<240x128xf32, #tpu.memory_space<vmem>>, vector<64x64xf32>
    %c96_142 = arith.constant 96 : index
    %c0_143 = arith.constant 0 : index
    %338 = vector.load %arg2[%c96_142, %c0_143] : memref<240x128xf32, #tpu.memory_space<vmem>>, vector<64x32xf32>
    %c160_144 = arith.constant 160 : index
    %c0_145 = arith.constant 0 : index
    %339 = vector.load %arg2[%c160_144, %c0_145] : memref<240x128xf32, #tpu.memory_space<vmem>>, vector<32x128xf32>
    %340 = tpu.concatenate %335, %335 in 0 : vector<16x32xf32>, vector<16x32xf32> -> vector<32x32xf32>
    %c5_146 = arith.constant 5 : index
    %c0_147 = arith.constant 0 : index
    %c0_148 = arith.constant 0 : index
    %341 = vector.load %arg1[%c5_146, %c0_147, %c0_148] : memref<8x32x32xf32, #tpu.memory_space<vmem>>, vector<1x32x32xf32>
    %342 = vector.shape_cast %341 : vector<1x32x32xf32> to vector<32x32xf32>
    %cst_149 = arith.constant dense<0.000000e+00> : vector<32x32xf32>
    %343 = tpu.matmul %342, %340, %cst_149 {dimension_numbers = #tpu.dot_dimension_numbers<[1], [0], [0], [1], [0, 0, 1, 1], [], []>} : vector<32x32xf32>, vector<32x32xf32>, vector<32x32xf32> -> vector<32x32xf32>
    %344 = vector.extract_strided_slice %343 {offsets = [0, 0], sizes = [16, 32], strides = [1, 1]} : vector<32x32xf32> to vector<16x32xf32>
    %345 = vector.extract_strided_slice %343 {offsets = [16, 0], sizes = [16, 32], strides = [1, 1]} : vector<32x32xf32> to vector<16x32xf32>
    %346 = tpu.concatenate %344, %345 in 1 : vector<16x32xf32>, vector<16x32xf32> -> vector<16x64xf32>
    %cst_150 = arith.constant dense<0.000000e+00> : vector<16x64xf32>
    %347 = tpu.matmul %346, %337, %cst_150 {dimension_numbers = #tpu.dot_dimension_numbers<[1], [0], [0], [1], [0, 0, 1, 1], [], []>} : vector<16x64xf32>, vector<64x64xf32>, vector<16x64xf32> -> vector<16x64xf32>
    %348 = arith.addf %347, %125 : vector<16x64xf32>
    %cst_151 = arith.constant 0.000000e+00 : f32
    %349 = vector.broadcast %cst_151 : f32 to vector<16x64xf32>
    %350 = arith.maximumf %348, %349 : vector<16x64xf32>
    %cst_152 = arith.constant dense<0.000000e+00> : vector<16x32xf32>
    %351 = tpu.matmul %350, %338, %cst_152 {dimension_numbers = #tpu.dot_dimension_numbers<[1], [0], [0], [1], [0, 0, 1, 1], [], []>} : vector<16x64xf32>, vector<64x32xf32>, vector<16x32xf32> -> vector<16x32xf32>
    %352 = arith.addf %351, %128 : vector<16x32xf32>
    %c80 = arith.constant 80 : index
    %c0_153 = arith.constant 0 : index
    %353 = vector.load %arg4[%c80, %c0_153] : memref<112x128xf32, #tpu.memory_space<vmem>>, vector<16x128xf32>
    %cst_154 = arith.constant dense<0.000000e+00> : vector<16x128xf32>
    %354 = tpu.matmul %352, %339, %cst_154 {dimension_numbers = #tpu.dot_dimension_numbers<[1], [0], [0], [1], [0, 0, 1, 1], [], []>} : vector<16x32xf32>, vector<32x128xf32>, vector<16x128xf32> -> vector<16x128xf32>
    %355 = arith.addf %353, %354 : vector<16x128xf32>
    %356 = vector.extract_strided_slice %355 {offsets = [0, 0], sizes = [16, 32], strides = [1, 1]} : vector<16x128xf32> to vector<16x32xf32>
    %357 = arith.negf %356 : vector<16x32xf32>
    %358 = math.exp %357 : vector<16x32xf32>
    %cst_155 = arith.constant 1.000000e+00 : f32
    %359 = vector.broadcast %cst_155 : f32 to vector<16x32xf32>
    %360 = arith.addf %359, %358 : vector<16x32xf32>
    %361 = arith.divf %359, %360 : vector<16x32xf32>
    %362 = vector.extract_strided_slice %355 {offsets = [0, 32], sizes = [16, 32], strides = [1, 1]} : vector<16x128xf32> to vector<16x32xf32>
    %363 = arith.negf %362 : vector<16x32xf32>
    %364 = math.exp %363 : vector<16x32xf32>
    %cst_156 = arith.constant 1.000000e+00 : f32
    %365 = vector.broadcast %cst_156 : f32 to vector<16x32xf32>
    %366 = arith.addf %365, %364 : vector<16x32xf32>
    %367 = arith.divf %365, %366 : vector<16x32xf32>
    %368 = vector.extract_strided_slice %355 {offsets = [0, 64], sizes = [16, 32], strides = [1, 1]} : vector<16x128xf32> to vector<16x32xf32>
    %369 = vector.extract_strided_slice %355 {offsets = [0, 96], sizes = [16, 32], strides = [1, 1]} : vector<16x128xf32> to vector<16x32xf32>
    %370 = arith.mulf %361, %369 : vector<16x32xf32>
    %371 = arith.addf %368, %370 : vector<16x32xf32>
    %372 = math.tanh %371 : vector<16x32xf32>
    %cst_157 = arith.constant 1.000000e+00 : f32
    %373 = vector.broadcast %cst_157 : f32 to vector<16x32xf32>
    %374 = arith.subf %373, %367 : vector<16x32xf32>
    %375 = arith.mulf %374, %372 : vector<16x32xf32>
    %376 = arith.mulf %367, %352 : vector<16x32xf32>
    %377 = arith.addf %375, %376 : vector<16x32xf32>
    %c48_158 = arith.constant 48 : index
    %c0_159 = arith.constant 0 : index
    %378 = vector.load %arg5[%c48_158, %c0_159] : memref<80x32xf32, #tpu.memory_space<vmem>>, vector<16x32xf32>
    tpu.vector_store %arg5[%c48_158, %c0_159], %377 {strides = array<i32>} : memref<80x32xf32, #tpu.memory_space<vmem>>, vector<16x32xf32>,
    %c32_160 = arith.constant 32 : index
    %c0_161 = arith.constant 0 : index
    %379 = vector.load %arg2[%c32_160, %c0_161] : memref<240x128xf32, #tpu.memory_space<vmem>>, vector<64x64xf32>
    %c96_162 = arith.constant 96 : index
    %c0_163 = arith.constant 0 : index
    %380 = vector.load %arg2[%c96_162, %c0_163] : memref<240x128xf32, #tpu.memory_space<vmem>>, vector<64x32xf32>
    %c160_164 = arith.constant 160 : index
    %c0_165 = arith.constant 0 : index
    %381 = vector.load %arg2[%c160_164, %c0_165] : memref<240x128xf32, #tpu.memory_space<vmem>>, vector<32x128xf32>
    %382 = tpu.concatenate %377, %377 in 0 : vector<16x32xf32>, vector<16x32xf32> -> vector<32x32xf32>
    %c6_166 = arith.constant 6 : index
    %c0_167 = arith.constant 0 : index
    %c0_168 = arith.constant 0 : index
    %383 = vector.load %arg1[%c6_166, %c0_167, %c0_168] : memref<8x32x32xf32, #tpu.memory_space<vmem>>, vector<1x32x32xf32>
    %384 = vector.shape_cast %383 : vector<1x32x32xf32> to vector<32x32xf32>
    %cst_169 = arith.constant dense<0.000000e+00> : vector<32x32xf32>
    %385 = tpu.matmul %384, %382, %cst_169 {dimension_numbers = #tpu.dot_dimension_numbers<[1], [0], [0], [1], [0, 0, 1, 1], [], []>} : vector<32x32xf32>, vector<32x32xf32>, vector<32x32xf32> -> vector<32x32xf32>
    %386 = vector.extract_strided_slice %385 {offsets = [0, 0], sizes = [16, 32], strides = [1, 1]} : vector<32x32xf32> to vector<16x32xf32>
    %387 = vector.extract_strided_slice %385 {offsets = [16, 0], sizes = [16, 32], strides = [1, 1]} : vector<32x32xf32> to vector<16x32xf32>
    %388 = tpu.concatenate %386, %387 in 1 : vector<16x32xf32>, vector<16x32xf32> -> vector<16x64xf32>
    %cst_170 = arith.constant dense<0.000000e+00> : vector<16x64xf32>
    %389 = tpu.matmul %388, %379, %cst_170 {dimension_numbers = #tpu.dot_dimension_numbers<[1], [0], [0], [1], [0, 0, 1, 1], [], []>} : vector<16x64xf32>, vector<64x64xf32>, vector<16x64xf32> -> vector<16x64xf32>
    %390 = arith.addf %389, %125 : vector<16x64xf32>
    %cst_171 = arith.constant 0.000000e+00 : f32
    %391 = vector.broadcast %cst_171 : f32 to vector<16x64xf32>
    %392 = arith.maximumf %390, %391 : vector<16x64xf32>
    %cst_172 = arith.constant dense<0.000000e+00> : vector<16x32xf32>
    %393 = tpu.matmul %392, %380, %cst_172 {dimension_numbers = #tpu.dot_dimension_numbers<[1], [0], [0], [1], [0, 0, 1, 1], [], []>} : vector<16x64xf32>, vector<64x32xf32>, vector<16x32xf32> -> vector<16x32xf32>
    %394 = arith.addf %393, %128 : vector<16x32xf32>
    %c96_173 = arith.constant 96 : index
    %c0_174 = arith.constant 0 : index
    %395 = vector.load %arg4[%c96_173, %c0_174] : memref<112x128xf32, #tpu.memory_space<vmem>>, vector<16x128xf32>
    %cst_175 = arith.constant dense<0.000000e+00> : vector<16x128xf32>
    %396 = tpu.matmul %394, %381, %cst_175 {dimension_numbers = #tpu.dot_dimension_numbers<[1], [0], [0], [1], [0, 0, 1, 1], [], []>} : vector<16x32xf32>, vector<32x128xf32>, vector<16x128xf32> -> vector<16x128xf32>
    %397 = arith.addf %395, %396 : vector<16x128xf32>
    %398 = vector.extract_strided_slice %397 {offsets = [0, 0], sizes = [16, 32], strides = [1, 1]} : vector<16x128xf32> to vector<16x32xf32>
    %399 = arith.negf %398 : vector<16x32xf32>
    %400 = math.exp %399 : vector<16x32xf32>
    %cst_176 = arith.constant 1.000000e+00 : f32
    %401 = vector.broadcast %cst_176 : f32 to vector<16x32xf32>
    %402 = arith.addf %401, %400 : vector<16x32xf32>
    %403 = arith.divf %401, %402 : vector<16x32xf32>
    %404 = vector.extract_strided_slice %397 {offsets = [0, 32], sizes = [16, 32], strides = [1, 1]} : vector<16x128xf32> to vector<16x32xf32>
    %405 = arith.negf %404 : vector<16x32xf32>
    %406 = math.exp %405 : vector<16x32xf32>
    %cst_177 = arith.constant 1.000000e+00 : f32
    %407 = vector.broadcast %cst_177 : f32 to vector<16x32xf32>
    %408 = arith.addf %407, %406 : vector<16x32xf32>
    %409 = arith.divf %407, %408 : vector<16x32xf32>
    %410 = vector.extract_strided_slice %397 {offsets = [0, 64], sizes = [16, 32], strides = [1, 1]} : vector<16x128xf32> to vector<16x32xf32>
    %411 = vector.extract_strided_slice %397 {offsets = [0, 96], sizes = [16, 32], strides = [1, 1]} : vector<16x128xf32> to vector<16x32xf32>
    %412 = arith.mulf %403, %411 : vector<16x32xf32>
    %413 = arith.addf %410, %412 : vector<16x32xf32>
    %414 = math.tanh %413 : vector<16x32xf32>
    %cst_178 = arith.constant 1.000000e+00 : f32
    %415 = vector.broadcast %cst_178 : f32 to vector<16x32xf32>
    %416 = arith.subf %415, %409 : vector<16x32xf32>
    %417 = arith.mulf %416, %414 : vector<16x32xf32>
    %418 = arith.mulf %409, %394 : vector<16x32xf32>
    %419 = arith.addf %417, %418 : vector<16x32xf32>
    %c64_179 = arith.constant 64 : index
    %c0_180 = arith.constant 0 : index
    %420 = vector.load %arg5[%c64_179, %c0_180] : memref<80x32xf32, #tpu.memory_space<vmem>>, vector<16x32xf32>
    tpu.vector_store %arg5[%c64_179, %c0_180], %419 {strides = array<i32>} : memref<80x32xf32, #tpu.memory_space<vmem>>, vector<16x32xf32>,
    %c200 = arith.constant 200 : index
    %c0_181 = arith.constant 0 : index
    %421 = vector.load %arg2[%c200, %c0_181] : memref<240x128xf32, #tpu.memory_space<vmem>>, vector<32x128xf32>
    %c237 = arith.constant 237 : index
    %c0_182 = arith.constant 0 : index
    %422 = vector.load %arg2[%c237, %c0_182] : memref<240x128xf32, #tpu.memory_space<vmem>>, vector<1x128xf32>
    %c0_183 = arith.constant 0 : index
    %c0_184 = arith.constant 0 : index
    %423 = vector.load %arg5[%c0_183, %c0_184] : memref<80x32xf32, #tpu.memory_space<vmem>>, vector<80x32xf32>
    %cst_185 = arith.constant dense<0.000000e+00> : vector<80x128xf32>
    %424 = tpu.matmul %423, %421, %cst_185 {dimension_numbers = #tpu.dot_dimension_numbers<[1], [0], [0], [1], [0, 0, 1, 1], [], []>} : vector<80x32xf32>, vector<32x128xf32>, vector<80x128xf32> -> vector<80x128xf32>
    %425 = vector.broadcast %422 : vector<1x128xf32> to vector<80x128xf32>
    %426 = arith.addf %424, %425 : vector<80x128xf32>
    %c0_186 = arith.constant 0 : index
    %c0_187 = arith.constant 0 : index
    %427 = vector.load %arg3[%c0_186, %c0_187] : memref<80x128xf32, #tpu.memory_space<vmem>>, vector<80x128xf32>
    tpu.vector_store %arg3[%c0_186, %c0_187], %426 {strides = array<i32>} : memref<80x128xf32, #tpu.memory_space<vmem>>, vector<80x128xf32>,
    return
  }
}

</mosaic_0001>

<bundles_post_ra>
// kernel: single_attention_forward.1
= control target key start
LH: loop header
LB: loop body
LE: loop exit
PB: predicated region body
PF: predicated region fallthrough
CT: control target
= control target key end

     0   :  { %vm32_vm0 = vcmask 130048   ;;  %s3464_s17 = smov 126   ;;  %s3465_s13 = smov 32   ;;  %s4904_s2 = inlined_call_operand.vmem [shape: f32[240,128], index: 2, kind: input, shape index: {}]   ;;  %s4905_s0 = inlined_call_operand.vmem [shape: f32[128,16], index: 0, kind: input, shape index: {}]   ;;  %s4906_s1 = inlined_call_operand.vmem [shape: f32[8,32,32], index: 1, kind: input, shape index: {}]   ;;  %s4907_s3 = inlined_call_operand.vmem [shape: f32[80,128], index: 3, kind: output, shape index: {}]  }
   0x1   :  { %v29_v0 = vld [vmem:[%s4904_s2 + $0x18] sm:$0xff]  ;;  %v28_v1 = vld [vmem:[%s4904_s2 + $0x10] sm:$0xff]  ;;  %v3500_v2 = vld [vmem:[%s4905_s0] sm:$0xff]  ;;  %s3466_s29 = smov 122   ;;  %s3467_s30 = smov 124  }
   0x2   :  { %89 = vmatpush.msra.mxu0 %v29_v0  ;;  %v3507_v3 = vld [vmem:[%s4905_s0 + $0x8] sm:$0xff]  ;;  %v16_v4 = vld [vmem:[%s4905_s0 + $0x10] sm:$0xff]  ;;  %v17_v5 = vld [vmem:[%s4905_s0 + $0x18] sm:$0xff]  ;;  %s3468_s22 = smov 2   ;;  %s3469_s15 = smov 64  }
   0x3   :  { %v3522_v6 = vld [vmem:[%s4905_s0 + $0x20] sm:$0xff]  ;;  %v3529_v7 = vld [vmem:[%s4905_s0 + $0x28] sm:$0xff]  ;;  %v3536_v8 = vld [vmem:[%s4905_s0 + $0x30] sm:$0xff]  ;;  %s3470_s16 = smov 96  }
   0x4   :  { %90 = vmatpush.msra.mxu0 %v28_v1  ;;  %v3543_v9 = vld [vmem:[%s4905_s0 + $0x38] sm:$0xff]  ;;  %v22_v10 = vld [vmem:[%s4905_s0 + $0x40] sm:$0xff]  ;;  %v23_v11 = vld [vmem:[%s4905_s0 + $0x48] sm:$0xff] }
   0x5   :  { %3064 = vmatmul.msk.f32.vlgmr.msra.gmra.mxu0 %vm32_vm0, %v3500_v2  ;;  %v3558_v12 = vld [vmem:[%s4905_s0 + $0x50] sm:$0xff]  ;;  %v3565_v13 = vld [vmem:[%s4905_s0 + $0x58] sm:$0xff]  ;;  %v3572_v14 = vld [vmem:[%s4905_s0 + $0x60] sm:$0xff] }
   0x6   :  { %v3587_v19 = vld [vmem:[%s4904_s2 + $0xe9] ss:$0 sm:$0xff] }
   0xd   :  { %3065 = vmatmul.msk.f32.gmra.mxu0 %vm32_vm0, %v3507_v3 }
  0x15   :  { %3066 = vmatmul.msk.f32.gmra.mxu0 %vm32_vm0, %v16_v4 }
  0x1d   :  { %3067 = vmatmul.msk.f32.gmra.mxu0 %vm32_vm0, %v17_v5 }
  0x25   :  { %3068 = vmatmul.msk.f32.gmra.mxu0 %vm32_vm0, %v3522_v6 }
  0x2d   :  { %3069 = vmatmul.msk.f32.gmra.mxu0 %vm32_vm0, %v3529_v7 }
  0x35   :  { %3070 = vmatmul.msk.f32.gmra.mxu0 %vm32_vm0, %v3536_v8 }
  0x3d   :  { %3071 = vmatmul.msk.f32.gmra.mxu0 %vm32_vm0, %v3543_v9 }
  0x45   :  { %3072 = vmatmul.msk.f32.gmra.mxu0 %vm32_vm0, %v22_v10 }
  0x4d   :  { %3073 = vmatmul.msk.f32.gmra.mxu0 %vm32_vm0, %v23_v11 }
  0x55   :  { %3074 = vmatmul.msk.f32.gmra.mxu0 %vm32_vm0, %v3558_v12 }
  0x5d   :  { %3075 = vmatmul.msk.f32.gmra.mxu0 %vm32_vm0, %v3565_v13 }
  0x65   :  { %3076 = vmatmul.msk.f32.gmra.mxu0 %vm32_vm0, %v3572_v14 }
  0x82   :  { %v3576_v15 = vpop.f32.mrf.mxu0 }
  0x8a   :  { %v3578_v16 = vpop.f32.mrf.mxu0 }
  0x92   :  { %v3580_v17 = vpop.f32.mrf.mxu0 }
  0x9a   :  { %v3582_v18 = vpop.f32.mrf.mxu0 }
  0xa2   :  { %v104_v20 = vpop.f32.mrf.mxu0 }
  0xa3   :  { %v105_v21 = vadd.f32 %v3587_v19, %v104_v20 }
  0xa5   :  { %v3082_v22 = vmul.f32 -1.442695, %v105_v21 }
  0xa7   :  { %3316 = vpow2.f32 %v3082_v22 }
  0xaa   :  { %v107_v23 = vpop.f32.mrf.mxu0 }
  0xab   :  { %v108_v24 = vadd.f32 %v3587_v19, %v107_v23 }
  0xad   :  { %v3317_v25 = vpop.eup %3316  ;;  %v3083_v26 = vmul.f32 -1.442695, %v108_v24 }
  0xae   :  { %v180_v27 = vadd.f32 1.0, %v3317_v25 }
  0xaf   :  { %3318 = vpow2.f32 %v3083_v26 }
  0xb0   :  { %3320 = vrcp.f32 %v180_v27  ;;  %v261_v58 = vand.u32 2147483648, %v180_v27  ;;  %vm255_vm6 = vweird.f32 %v180_v27  ;;  %v259_v59 = vand.u32 2147483647, %v180_v27 }
  0xb2   :  { %v110_v28 = vpop.f32.mrf.mxu0  ;;  %v262_v63 = vor.u32 1.1754944e-38, %v261_v58  ;;  %vm260_vm8 = vcmp.eq.f32.partialorder %v259_v59, 8.507059e+37 }
  0xb3   :  { %v111_v29 = vadd.f32 %v3587_v19, %v110_v28 }
  0xb5   :  { %v3319_v30 = vpop.eup %3318  ;;  %v3084_v31 = vmul.f32 -1.442695, %v111_v29 }
  0xb6   :  { %v181_v32 = vadd.f32 1.0, %v3319_v30  ;;  %v3321_v33 = vpop.eup %3320 }
  0xb7   :  { %3322 = vpow2.f32 %v3084_v31  ;;  %v251_v38 = vmul.f32 %v3321_v33, %v180_v27  ;;  %vm256_vm5 = vweird.f32 %v3321_v33  ;;  %v96_v27 = vadd.f32 %v3587_v19, %v3578_v16 }
  0xb8   :  { %3324 = vrcp.f32 %v181_v32  ;;  %v276_v45 = vand.u32 2147483648, %v181_v32  ;;  %v274_v47 = vand.u32 2147483647, %v181_v32  ;;  %vm270_vm2 = vweird.f32 %v181_v32  ;;  %vm257_vm7 = vmor %vm255_vm6, %vm256_vm5 }
  0xb9   :  { %v252_v43 = vsub.f32 1.0, %v251_v38 }
  0xba   :  { %v113_v34 = vpop.f32.mrf.mxu0  ;;  %v277_v52 = vor.u32 1.1754944e-38, %v276_v45  ;;  %vm275_vm4 = vcmp.eq.f32.partialorder %v274_v47, 8.507059e+37 }
  0xbb   :  { %v114_v35 = vadd.f32 %v3587_v19, %v113_v34  ;;  %v253_v50 = vmul.f32 %v3321_v33, %v252_v43 }
  0xbd   :  { %v3323_v36 = vpop.eup %3322  ;;  %v3085_v37 = vmul.f32 -1.442695, %v114_v35  ;;  %v254_v55 = vadd.f32 %v3321_v33, %v253_v50 }
  0xbe   :  { %v3325_v39 = vpop.eup %3324  ;;  %v3593_v41 = vadd.f32 1.0, %v3323_v36 }
  0xbf   :  { %3326 = vpow2.f32 %v3085_v37  ;;  %v266_v40 = vmul.f32 %v3325_v39, %v181_v32  ;;  %vm271_vm1 = vweird.f32 %v3325_v39  ;;  %v258_v60 = vsel %vm257_vm7, %v3321_v33, %v254_v55 }
  0xc0   :  { %3328 = vrcp.f32 %v3593_v41  ;;  %vm272_vm3 = vmor %vm270_vm2, %vm271_vm1  ;;  %v3605_v1 = vsel %vm260_vm8, %v262_v63, %v258_v60  ;;  %vm285_vm13 = vweird.f32 %v3593_v41  ;;  %v291_v30 = vand.u32 2147483648, %v3593_v41 }
  0xc1   :  { %v267_v42 = vsub.f32 1.0, %v266_v40  ;;  %v289_v32 = vand.u32 2147483647, %v3593_v41  ;;  %v3079_v33 = vmul.f32 -1.442695, %v96_v27 }
  0xc2   :  { %v3595_v44 = vpop.f32.mrf.mxu0  ;;  %v292_v35 = vor.u32 1.1754944e-38, %v291_v30 }
  0xc3   :  { %v268_v46 = vmul.f32 %v3325_v39, %v267_v42  ;;  %vm290_vm1 = vcmp.eq.f32.partialorder %v289_v32, 8.507059e+37 }
  0xc5   :  { %v3327_v48 = vpop.eup %3326  ;;  %v269_v49 = vadd.f32 %v3325_v39, %v268_v46  ;;  %v3633_v46 = vld [vmem:[%s4905_s0 + $0x68] sm:$0xff] }
  0xc6   :  { %v183_v51 = vadd.f32 1.0, %v3327_v48  ;;  %v3329_v56 = vpop.eup %3328  ;;  %3077 = vmatmul.msk.f32.gmra.mxu0 %vm32_vm0, %v3633_v46 }
  0xc7   :  { %v273_v53 = vsel %vm272_vm3, %v3325_v39, %v269_v49  ;;  %v281_v61 = vmul.f32 %v3329_v56, %v3593_v41  ;;  %vm286_vm14 = vweird.f32 %v3329_v56  ;;  %v99_v39 = vadd.f32 %v3587_v19, %v3580_v17 }
  0xc8   :  { %3330 = vrcp.f32 %v183_v51  ;;  %v3598_v54 = vsel %vm275_vm4, %v277_v52, %v273_v53  ;;  %vm300_vm9 = vweird.f32 %v183_v51  ;;  %v306_v4 = vand.u32 2147483648, %v183_v51  ;;  %vm287_vm15 = vmor %vm285_vm13, %vm286_vm14 }
  0xc9   :  { %438 = vrot.lane.b32.xlu0 %v3598_v54, %s3464_s17  ;;  %v304_v10 = vand.u32 2147483647, %v183_v51  ;;  %v282_v11 = vsub.f32 1.0, %v281_v61  ;;  %v3080_v41 = vmul.f32 -1.442695, %v99_v39 }
  0xca   :  { %v3602_v57 = vpop.f32.mrf.mxu0  ;;  %v307_v23 = vor.u32 1.1754944e-38, %v306_v4 }
  0xcb   :  { %vm305_vm12 = vcmp.eq.f32.partialorder %v304_v10, 8.507059e+37  ;;  %v283_v26 = vmul.f32 %v3329_v56, %v282_v11 }
  0xcd   :  { %v284_v31 = vadd.f32 %v3329_v56, %v283_v26 }
  0xce   :  { %v3331_v62 = vpop.eup %3330 }
  0xcf   :  { %v296_v0 = vmul.f32 %v3331_v62, %v183_v51  ;;  %vm301_vm10 = vweird.f32 %v3331_v62  ;;  %v288_v38 = vsel %vm287_vm15, %v3329_v56, %v284_v31  ;;  %v117_v51 = vadd.f32 %v3587_v19, %v3595_v44 }
  0xd0   :  { %vm302_vm11 = vmor %vm300_vm9, %vm301_vm10  ;;  %v3624_v42 = vsel %vm290_vm1, %v292_v35, %v288_v38 }
  0xd1   :  { %436 = vrot.lane.b32.xlu0 %v3605_v1, %s3464_s17  ;;  %v297_v5 = vsub.f32 1.0, %v296_v0  ;;  %v3086_v53 = vmul.f32 -1.442695, %v117_v51 }
  0xd2   :  { %v122_v20 = vpop.f32.mrf.mxu0 }
  0xd3   :  { %v123_v21 = vadd.f32 %v3587_v19, %v122_v20  ;;  %v298_v22 = vmul.f32 %v3331_v62, %v297_v5 }
  0xd5   :  { %v3088_v24 = vmul.f32 -1.442695, %v123_v21  ;;  %v299_v25 = vadd.f32 %v3331_v62, %v298_v22 }
  0xd7   :  { %3332 = vpow2.f32 %v3088_v24  ;;  %v303_v28 = vsel %vm302_vm11, %v3331_v62, %v299_v25 }
  0xd8   :  { %v3613_v29 = vsel %vm305_vm12, %v307_v23, %v303_v28  ;;  %3334 = vpow2.f32 %v3079_v33 }
  0xd9   :  { %4918 = vst [vmem:[#allocation4_spill] sm:$0xff] %v3613_v29  ;;  %442 = vrot.lane.b32.xlu1 %v3613_v29, %s3464_s17 }
  0xda   :  { %v125_v34 = vpop.f32.mrf.mxu0 }
  0xdb   :  { %v126_v16 = vadd.f32 %v3587_v19, %v125_v34  ;;  %v404_v34 = vmul.f32 %v3605_v1, %v3522_v6 }
  0xdd   :  { %v3333_v36 = vpop.eup %3332  ;;  %v3089_v37 = vmul.f32 -1.442695, %v126_v16 }
  0xde   :  { %v3622_v40 = vadd.f32 1.0, %v3333_v36  ;;  %v3335_v17 = vpop.eup %3334 }
  0xdf   :  { %3336 = vpow2.f32 %v3089_v37  ;;  %v3637_v50 = vadd.f32 1.0, %v3335_v17 }
  0xe0   :  { %3338 = vrcp.f32 %v3622_v40  ;;  %vm345_vm6 = vweird.f32 %v3622_v40  ;;  %v351_v26 = vand.u32 2147483648, %v3622_v40  ;;  %v349_v30 = vand.u32 2147483647, %v3622_v40 }
  0xe1   :  { %440 = vrot.lane.b32.xlu1 %v3624_v42, %s3464_s17  ;;  %3340 = vpow2.f32 %v3080_v41  ;;  %vm210_vm15 = vweird.f32 %v3637_v50 }
  0xe2   :  { %v128_v43 = vpop.f32.mrf.mxu0  ;;  %v352_v39 = vor.u32 1.1754944e-38, %v351_v26  ;;  %vm350_vm11 = vcmp.eq.f32.partialorder %v349_v30, 8.507059e+37 }
  0xe3   :  { %v129_v45 = vadd.f32 %v3587_v19, %v128_v43 }
  0xe5   :  { %v3337_v47 = vpop.eup %3336  ;;  %v3090_v48 = vmul.f32 -1.442695, %v129_v45 }
  0xe6   :  { %v187_v49 = vadd.f32 1.0, %v3337_v47  ;;  %v3339_v52 = vpop.eup %3338 }
  0xe7   :  { %3342 = vpow2.f32 %v3090_v48  ;;  %v341_v55 = vmul.f32 %v3339_v52, %v3622_v40  ;;  %v3341_v56 = vpop.eup %3340  ;;  %vm346_vm7 = vweird.f32 %v3339_v52 }
  0xe8   :  { %3344 = vrcp.f32 %v187_v49  ;;  %v3643_v63 = vadd.f32 1.0, %v3341_v56  ;;  %v366_v0 = vand.u32 2147483648, %v187_v49  ;;  %vm360_vm2 = vweird.f32 %v187_v49  ;;  %vm3663_vm8 = vmor %vm345_vm6, %vm346_vm7 }
  0xe9   :  { %3346 = vrcp.f32 %v3637_v50  ;;  %v342_v62 = vsub.f32 1.0, %v341_v55  ;;  %v364_v5 = vand.u32 2147483647, %v187_v49  ;;  %v216_v56 = vand.u32 2147483648, %v3637_v50 }
  0xea   :  { %3348 = vpow2.f32 %v3086_v53  ;;  %v367_v21 = vor.u32 1.1754944e-38, %v366_v0 }
  0xeb   :  { %v343_v11 = vmul.f32 %v3339_v52, %v342_v62  ;;  %vm365_vm5 = vcmp.eq.f32.partialorder %v364_v5, 8.507059e+37  ;;  %v217_v62 = vor.u32 1.1754944e-38, %v216_v56  ;;  %v3114_v56 = vld [vmem:[%s4906_s1 + $0x70] sm:$0xff] }
  0xed   :  { %v3343_v58 = vpop.eup %3342  ;;  %v344_v28 = vadd.f32 %v3339_v52, %v343_v11 }
  0xee   :  { %v3345_v59 = vpop.eup %3344  ;;  %v188_v60 = vadd.f32 1.0, %v3343_v58  ;;  %v214_v58 = vand.u32 2147483647, %v3637_v50 }
  0xef   :  { %v356_v61 = vmul.f32 %v3345_v59, %v187_v49  ;;  %v3645_v44 = vpop.eup %3346  ;;  %vm361_vm3 = vweird.f32 %v3345_v59  ;;  %v348_v40 = vsel %vm3663_vm8, %v3339_v52, %v344_v28 }
  0xf0   :  { %3350 = vrcp.f32 %v188_v60  ;;  %vm3648_vm4 = vmor %vm360_vm2, %vm361_vm3  ;;  %v206_v22 = vmul.f32 %v3645_v44, %v3637_v50  ;;  %v3349_v23 = vpop.eup %3348  ;;  %v381_v16 = vand.u32 2147483648, %v188_v60  ;;  %vm375_vm9 = vweird.f32 %v188_v60 }
  0xf1   :  { %v357_v4 = vsub.f32 1.0, %v356_v61  ;;  %3352 = vrcp.f32 %v3643_v63  ;;  %v3659_v32 = vadd.f32 1.0, %v3349_v23  ;;  %v379_v37 = vand.u32 2147483647, %v188_v60 }
  0xf2   :  { %v207_v35 = vsub.f32 1.0, %v206_v22  ;;  %v382_v43 = vor.u32 1.1754944e-38, %v381_v16  ;;  %v3674_v48 = vsel %vm350_vm11, %v352_v39, %v348_v40  ;;  %vm211_vm14 = vweird.f32 %v3645_v44  ;;  %v3104_v16 = vld [vmem:[%s4906_s1 + $0x40] sm:$0xff] }
  0xf3   :  { %v358_v10 = vmul.f32 %v3345_v59, %v357_v4  ;;  %3354 = vrcp.f32 %v3659_v32  ;;  %vm380_vm13 = vcmp.eq.f32.partialorder %v379_v37, 8.507059e+37  ;;  %4923 = vst [vmem:[#allocation5_spill] sm:$0xff] %v3674_v48  ;;  %vm212_vm1 = vmor %vm210_vm15, %vm211_vm14  ;;  %vm215_vm2 = vcmp.eq.f32.partialorder %v214_v58, 8.507059e+37 }
  0xf4   :  { %v208_v17 = vmul.f32 %v3645_v44, %v207_v35  ;;  %v229_v50 = vand.u32 2147483647, %v3643_v63  ;;  %vm315_vm7 = vweird.f32 %v3659_v32  ;;  %v321_v22 = vand.u32 2147483648, %v3659_v32 }
  0xf5   :  { %v359_v24 = vadd.f32 %v3345_v59, %v358_v10  ;;  %v231_v10 = vand.u32 2147483648, %v3643_v63  ;;  %vm488_vm11 = vcmask 261120   ;;  %v407_v39 = vmul.f32 %v3613_v29, %v3543_v9 }
  0xf6   :  { %v3351_v25 = vpop.eup %3350  ;;  %v209_v52 = vadd.f32 %v3645_v44, %v208_v17  ;;  %vm230_vm6 = vcmp.eq.f32.partialorder %v229_v50, 8.507059e+37  ;;  %v1112_v50 = vld [vmem:[%s4904_s2] sm:$0xff] }
  0xf7   :  { %v363_v27 = vsel %vm3648_vm4, %v3345_v59, %v359_v24  ;;  %v371_v31 = vmul.f32 %v3351_v25, %v188_v60  ;;  %vm376_vm10 = vweird.f32 %v3351_v25  ;;  %v3353_v38 = vpop.eup %3352  ;;  %vm225_vm4 = vweird.f32 %v3643_v63 }
  0xf8   :  { %v3661_v33 = vsel %vm365_vm5, %v367_v21, %v363_v27  ;;  %vm377_vm12 = vmor %vm375_vm9, %vm376_vm10  ;;  %v221_v47 = vmul.f32 %v3353_v38, %v3643_v63  ;;  %v213_v59 = vsel %vm212_vm1, %v3645_v44, %v209_v52  ;;  %vm226_vm3 = vweird.f32 %v3353_v38 }
  0xf9   :  { %450 = vrot.lane.b32.xlu2 %v3661_v33, %s3464_s17  ;;  %v372_v36 = vsub.f32 1.0, %v371_v31  ;;  %v3355_v55 = vpop.eup %3354  ;;  %v3689_v0 = vsel %vm215_vm2, %v217_v62, %v213_v59  ;;  %vm227_vm5 = vmor %vm225_vm4, %vm226_vm3  ;;  %v232_v20 = vor.u32 1.1754944e-38, %v231_v10  ;;  %v319_v24 = vand.u32 2147483647, %v3659_v32  ;;  %v1113_v10 = vld [vmem:[%s4904_s2 + $0x8] sm:$0xff] }
  0xfa   :  { %v222_v53 = vsub.f32 1.0, %v221_v47  ;;  %v311_v61 = vmul.f32 %v3355_v55, %v3659_v32  ;;  %vm316_vm8 = vweird.f32 %v3355_v55  ;;  %v322_v63 = vor.u32 1.1754944e-38, %v321_v22  ;;  %v3107_v47 = vld [vmem:[%s4906_s1 + $0x58] sm:$0xff] }
  0xfb   :  { %v373_v41 = vmul.f32 %v3351_v25, %v372_v36  ;;  %vm317_vm9 = vmor %vm315_vm7, %vm316_vm8  ;;  %vm320_vm10 = vcmp.eq.f32.partialorder %v319_v24, 8.507059e+37  ;;  %v405_v32 = vmul.f32 %v3598_v54, %v3529_v7 }
  0xfc   :  { %v223_v60 = vmul.f32 %v3353_v38, %v222_v53  ;;  %v312_v5 = vsub.f32 1.0, %v311_v61  ;;  %v3115_v61 = vld [vmem:[%s4906_s1 + $0x78] sm:$0xff] }
  0xfd   :  { %v374_v45 = vadd.f32 %v3351_v25, %v373_v41  ;;  %v406_v41 = vmul.f32 %v3624_v42, %v3536_v8 }
  0xfe   :  { %v224_v4 = vadd.f32 %v3353_v38, %v223_v60  ;;  %v313_v11 = vmul.f32 %v3355_v55, %v312_v5 }
  0xff   :  { %v378_v49 = vsel %vm377_vm12, %v3351_v25, %v374_v45 }
 0x100   :  { %v3676_v51 = vsel %vm380_vm13, %v382_v43, %v378_v49  ;;  %v228_v44 = vsel %vm227_vm5, %v3353_v38, %v224_v4  ;;  %v314_v23 = vadd.f32 %v3355_v55, %v313_v11  ;;  %v3106_v43 = vld [vmem:[%s4906_s1 + $0x50] sm:$0xff] }
 0x101   :  { %4924 = vst [vmem:[#allocation6_spill] sm:$0xff] %v3676_v51  ;;  %448 = vrot.lane.b32.xlu2 %v3674_v48, %s3464_s17  ;;  %452 = vrot.lane.b32.xlu1 %v3676_v51, %s3464_s17  ;;  %v3697_v21 = vsel %vm230_vm6, %v232_v20, %v228_v44 }
 0x102   :  { %v318_v25 = vsel %vm317_vm9, %v3355_v55, %v314_v23 }
 0x103   :  { %v3703_v26 = vsel %vm320_vm10, %v322_v63, %v318_v25  ;;  %v3128_v63 = vld [vmem:[%s4906_s1 + $0xa0] sm:$0xff] }
 0x104   :  { %4925 = vst [vmem:[#allocation7_spill] sm:$0xff] %v3703_v26 }
 0x109   :  { %430 = vrot.lane.b32.xlu1 %v3689_v0, %s3464_s17 }
 0x111   :  { %432 = vrot.lane.b32.xlu1 %v3697_v21, %s3464_s17 }
 0x119   :  { %444 = vrot.lane.b32.xlu1 %v3703_v26, %s3464_s17 }
 0x13b   :  { %v439_v27 = vpop.permute.xlu0 %438 }
 0x13c   :  { %v475_v28 = vmul.f32 %v439_v27, %v3529_v7  ;;  %v3105_v7 = vld [vmem:[%s4906_s1 + $0x48] sm:$0xff] }
 0x13d   :  { %v3129_v27 = vld [vmem:[%s4906_s1 + $0xa8] sm:$0xff] }
 0x13e   :  { %637 = vmatpush.msra.mxu3 %v475_v28  ;;  %v3130_v28 = vld [vmem:[%s4906_s1 + $0xb0] sm:$0xff] }
 0x143   :  { %v437_v30 = vpop.permute.xlu0 %436  ;;  %v131_v49 = vpop.f32.mrf.mxu0 }
 0x144   :  { %v474_v31 = vmul.f32 %v437_v30, %v3522_v6  ;;  %v132_v52 = vadd.f32 %v3587_v19, %v131_v49  ;;  %v3131_v30 = vld [vmem:[%s4906_s1 + $0xb8] sm:$0xff]  ;;  %v3835_v49 = vld [vmem:[%s4906_s1 + $0x8] sm:$0xff] }
 0x146   :  { %638 = vmatpush.msra.mxu3 %v474_v31  ;;  %v3091_v53 = vmul.f32 -1.442695, %v132_v52  ;;  %v3138_v52 = vld [vmem:[%s4906_s1 + $0xd0] sm:$0xff] }
 0x148   :  { %639 = vmatpush.msra.mxu3 %v405_v32  ;;  %3356 = vpow2.f32 %v3091_v53  ;;  %v3139_v53 = vld [vmem:[%s4906_s1 + $0xd8] sm:$0xff] }
 0x14a   :  { %640 = vmatpush.msra.mxu3 %v404_v34 }
 0x14b   :  { %v443_v35 = vpop.permute.xlu1 %442  ;;  %3108 = vmatmul.msk.f32.vlgmr.msra.gmra.mxu3 %vm488_vm11, %v3104_v16 }
 0x14c   :  { %v477_v36 = vmul.f32 %v443_v35, %v3543_v9  ;;  %v411_v9 = vmul.f32 %v3661_v33, %v3565_v13 }
 0x14e   :  { %699 = vmatpush.msra.mxu1 %v477_v36  ;;  %3281 = vmatpush.msrb.mxu3 %v477_v36  ;;  %v3357_v55 = vpop.eup %3356 }
 0x153   :  { %v451_v37 = vpop.permute.xlu2 %450  ;;  %v441_v38 = vpop.permute.xlu1 %440  ;;  %3109 = vmatmul.msk.f32.gmra.mxu3 %vm488_vm11, %v3105_v7 }
 0x154   :  { %v476_v6 = vmul.f32 %v441_v38, %v3536_v8  ;;  %v481_v40 = vmul.f32 %v451_v37, %v3565_v13  ;;  %v410_v8 = vmul.f32 %v3674_v48, %v3558_v12  ;;  %v3113_v13 = vld [vmem:[%s4906_s1 + $0x68] sm:$0xff] }
 0x156   :  { %700 = vmatpush.msra.mxu1 %v476_v6  ;;  %3282 = vmatpush.msrb.mxu3 %v476_v6  ;;  %v412_v6 = vmul.f32 %v3676_v51, %v3572_v14 }
 0x158   :  { %701 = vmatpush.msra.mxu1 %v407_v39  ;;  %3283 = vmatpush.msrb.mxu3 %v407_v39 }
 0x15a   :  { %702 = vmatpush.msra.mxu1 %v406_v41  ;;  %3284 = vmatpush.msrb.mxu3 %v406_v41 }
 0x15b   :  { %v449_v45 = vpop.permute.xlu2 %448  ;;  %3110 = vmatmul.msk.f32.gmra.mxu3 %vm488_vm11, %v3106_v43 }
 0x15c   :  { %v480_v17 = vmul.f32 %v449_v45, %v3558_v12  ;;  %823 = vmatpush.msra.mxu3 %v481_v40  ;;  %v189_v12 = vadd.f32 1.0, %v3357_v55  ;;  %v3112_v45 = vld [vmem:[%s4906_s1 + $0x60] sm:$0xff]  ;;  %v3311_v55 = vld [vmem:[%s4904_s2 + $0xe8] ss:$0 sm:$0xff] }
 0x15d   :  { %3116 = vmatmul.msk.f32.vlgmr.msra.gmra.mxu1 %vm488_vm11, %v3112_v45 }
 0x15e   :  { %824 = vmatpush.msra.mxu3 %v480_v17  ;;  %3358 = vrcp.f32 %v189_v12  ;;  %v396_v44 = vand.u32 2147483648, %v189_v12  ;;  %vm390_vm12 = vweird.f32 %v189_v12  ;;  %v394_v22 = vand.u32 2147483647, %v189_v12 }
 0x160   :  { %825 = vmatpush.msra.mxu3 %v411_v9  ;;  %v397_v23 = vor.u32 1.1754944e-38, %v396_v44  ;;  %vm395_vm15 = vcmp.eq.f32.partialorder %v394_v22, 8.507059e+37  ;;  %v3137_v9 = vld [vmem:[%s4906_s1 + $0xc8] sm:$0xff] }
 0x162   :  { %826 = vmatpush.msra.mxu3 %v410_v8 }
 0x163   :  { %3111 = vmatmul.msk.f32.gmra.mxu3 %vm488_vm11, %v3107_v47  ;;  %v3828_v47 = vld [vmem:[%s4906_s1] sm:$0xff] }
 0x164   :  { %v3359_v59 = vpop.eup %3358 }
 0x165   :  { %v386_v60 = vmul.f32 %v3359_v59, %v189_v12  ;;  %vm391_vm13 = vweird.f32 %v3359_v59 }
 0x166   :  { %vm392_vm14 = vmor %vm390_vm12, %vm391_vm13  ;;  %vm1255_vm13 = vcmask 523264  }
 0x167   :  { %v387_v62 = vsub.f32 1.0, %v386_v60 }
 0x169   :  { %v388_v4 = vmul.f32 %v3359_v59, %v387_v62  ;;  %v3864_v62 = vld [vmem:[%s4906_s1 + $0x18] sm:$0xff] }
 0x16b   :  { %3117 = vmatmul.msk.f32.vlgmr.msrb.gmra.mxu3 %vm488_vm11, %v3113_v13  ;;  %v389_v20 = vadd.f32 %v3359_v59, %v388_v4 }
 0x16c   :  { %1141 = vmatpush.msrb.mxu3 %v1113_v10 }
 0x16d   :  { %v393_v24 = vsel %vm392_vm14, %v3359_v59, %v389_v20  ;;  %v102_v20 = vadd.f32 %v3587_v19, %v3582_v18  ;;  %vm1035_vm14 = vcmask 1043456  }
 0x16e   :  { %1142 = vmatpush.msrb.mxu3 %v1112_v50  ;;  %v3764_v25 = vsel %vm395_vm15, %v397_v23, %v393_v24  ;;  %v93_v50 = vadd.f32 %v3587_v19, %v3576_v15  ;;  %vm974_vm15 = vcmask 15360  }
 0x16f   :  { %4926 = vst [vmem:[#allocation8_spill] sm:$0xff] %v3764_v25  ;;  %454 = vrot.lane.b32.xlu0 %v3764_v25, %s3464_s17  ;;  %v3081_v22 = vmul.f32 -1.442695, %v102_v20  ;;  %v3926_v20 = vld [vmem:[%s4904_s2 + $0x38] sm:$0xff] }
 0x170   :  { %v3078_v44 = vmul.f32 -1.442695, %v93_v50  ;;  %v3919_v50 = vld [vmem:[%s4904_s2 + $0x40] sm:$0xff] }
 0x172   :  { %3360 = vpow2.f32 %v3078_v44 }
 0x173   :  { %v453_v58 = vpop.permute.xlu1 %452  ;;  %3118 = vmatmul.msk.f32.gmra.mxu3 %vm488_vm11, %v3114_v56  ;;  %3362 = vpow2.f32 %v3081_v22 }
 0x174   :  { %v482_v7 = vmul.f32 %v453_v58, %v3572_v14  ;;  %v3136_v14 = vld [vmem:[%s4906_s1 + $0xc0] sm:$0xff] }
 0x178   :  { %v3361_v23 = vpop.eup %3360 }
 0x17b   :  { %3119 = vmatmul.msk.f32.gmra.mxu3 %vm488_vm11, %v3115_v61  ;;  %v431_v5 = vpop.permute.xlu1 %430  ;;  %v3857_v61 = vld [vmem:[%s4906_s1 + $0x10] sm:$0xff] }
 0x17c   :  { %v471_v11 = vmul.f32 %v431_v5, %v3507_v3 }
 0x17e   :  { %513 = vmatpush.msra.mxu2 %v471_v11 }
 0x183   :  { %3132 = vmatmul.msk.f32.vlgmr.msra.gmra.mxu3 %vm488_vm11, %v3128_v63  ;;  %v120_v63 = vadd.f32 %v3587_v19, %v3602_v57 }
 0x18b   :  { %3133 = vmatmul.msk.f32.gmra.mxu3 %vm488_vm11, %v3129_v27  ;;  %v176_v27 = vadd.f32 1.0, %v3361_v23 }
 0x18d   :  { %3364 = vrcp.f32 %v176_v27  ;;  %vm195_vm1 = vweird.f32 %v176_v27 }
 0x193   :  { %3134 = vmatmul.msk.f32.gmra.mxu3 %vm488_vm11, %v3130_v28  ;;  %v3087_v28 = vmul.f32 -1.442695, %v120_v63 }
 0x195   :  { %3366 = vpow2.f32 %v3087_v28  ;;  %v3935_v28 = vld [vmem:[%s4904_s2 + $0x30] sm:$0xff] }
 0x19b   :  { %3135 = vmatmul.msk.f32.gmra.mxu3 %vm488_vm11, %v3131_v30  ;;  %v3363_v30 = vpop.eup %3362 }
 0x19c   :  { %v3884_v15 = vadd.f32 1.0, %v3363_v30 }
 0x19e   :  { %3368 = vrcp.f32 %v3884_v15  ;;  %v246_v30 = vand.u32 2147483648, %v3884_v15  ;;  %vm240_vm5 = vweird.f32 %v3884_v15 }
 0x1a3   :  { %3159 = vmatmul.msk.f32.vlgmr.msrb.gmra.mxu3 %vm32_vm0, %v3500_v2  ;;  %v413_v2 = vmul.f32 %v3764_v25, %v3633_v46 }
 0x1ab   :  { %3160 = vmatmul.msk.f32.gmra.mxu3 %vm32_vm0, %v3507_v3 }
 0x1ce   :  { %v3785_v31 = vpop.f32.mrf.mxu3 }
 0x1d6   :  { %v3787_v32 = vpop.f32.mrf.mxu3 }
 0x1da   :  { %v3868_v4 = vpop.f32.mrf.mxu1 }
 0x1db   :  { %4934 = vst [vmem:[#allocation16_spill] sm:$0xff] %v3868_v4 }
 0x1de   :  { %v3789_v34 = vpop.f32.mrf.mxu3 }
 0x1e1   :  { %v455_v36 = vpop.permute.xlu0 %454 }
 0x1e2   :  { %v483_v37 = vmul.f32 %v455_v36, %v3633_v46 }
 0x1e4   :  { %885 = vmatpush.msrb.mxu1 %v483_v37 }
 0x1e6   :  { %v3791_v16 = vpop.f32.mrf.mxu3  ;;  %886 = vmatpush.msrb.mxu1 %v482_v7  ;;  %v3365_v7 = vpop.eup %3364 }
 0x1e7   :  { %v3367_v18 = vpop.eup %3366  ;;  %v191_v37 = vmul.f32 %v3365_v7, %v176_v27 }
 0x1e8   :  { %887 = vmatpush.msrb.mxu1 %v413_v2  ;;  %v3889_v2 = vadd.f32 1.0, %v3367_v18  ;;  %v3369_v19 = vpop.eup %3368  ;;  %v3945_v18 = vld [vmem:[%s4904_s2 + $0x28] sm:$0xff] }
 0x1e9   :  { %v192_v45 = vsub.f32 1.0, %v191_v37  ;;  %vm241_vm4 = vweird.f32 %v3369_v19 }
 0x1ea   :  { %888 = vmatpush.msrb.mxu1 %v412_v6  ;;  %3370 = vrcp.f32 %v3889_v2  ;;  %vm242_vm6 = vmor %vm240_vm5, %vm241_vm4  ;;  %vm330_vm8 = vweird.f32 %v3889_v2 }
 0x1eb   :  { %3140 = vmatmul.msk.f32.vlgmr.msrb.gmra.mxu1 %vm488_vm11, %v3136_v14  ;;  %v193_v57 = vmul.f32 %v3365_v7, %v192_v45  ;;  %v236_v14 = vmul.f32 %v3369_v19, %v3884_v15 }
 0x1ee   :  { %v3793_v35 = vpop.f32.mrf.mxu3 }
 0x1ef   :  { %4927 = vst [vmem:[#allocation9_spill] sm:$0xff] %v3793_v35 }
 0x1f3   :  { %3141 = vmatmul.msk.f32.gmra.mxu1 %vm488_vm11, %v3137_v9  ;;  %v194_v9 = vadd.f32 %v3365_v7, %v193_v57  ;;  %v247_v57 = vor.u32 1.1754944e-38, %v246_v30 }
 0x1f6   :  { %v3797_v38 = vpop.f32.mrf.mxu3 }
 0x1f7   :  { %4928 = vst [vmem:[#allocation10_spill] sm:$0xff] %v3797_v38 }
 0x1fb   :  { %3142 = vmatmul.msk.f32.gmra.mxu1 %vm488_vm11, %v3138_v52  ;;  %v3899_v52 = vld [vmem:[%s4904_s2 + $0x58] sm:$0xff] }
 0x1fe   :  { %v3803_v39 = vpop.f32.mrf.mxu3 }
 0x1ff   :  { %4929 = vst [vmem:[#allocation11_spill] sm:$0xff] %v3803_v39 }
 0x203   :  { %3143 = vmatmul.msk.f32.gmra.mxu1 %vm488_vm11, %v3139_v53  ;;  %v3904_v53 = vld [vmem:[%s4904_s2 + $0x50] sm:$0xff] }
 0x206   :  { %v3805_v40 = vpop.f32.mrf.mxu3 }
 0x207   :  { %4930 = vst [vmem:[#allocation12_spill] sm:$0xff] %v3805_v40 }
 0x20e   :  { %v3807_v41 = vpop.f32.mrf.mxu3 }
 0x20f   :  { %4931 = vst [vmem:[#allocation13_spill] sm:$0xff] %v3807_v41 }
 0x216   :  { %v3809_v43 = vpop.f32.mrf.mxu3 }
 0x217   :  { %4932 = vst [vmem:[#allocation14_spill] sm:$0xff] %v3809_v43 }
 0x21e   :  { %v3815_v46 = vpop.f32.mrf.mxu3 }
 0x21f   :  { %4933 = vst [vmem:[#allocation15_spill] sm:$0xff] %v3815_v46 }
 0x226   :  { %v1144_v17 = vpop.f32.mrf.mxu3 }
 0x22e   :  { %v1147_v8 = vpop.f32.mrf.mxu3 }
 0x22f   :  { %1171 = vmatpush.msra.mxu3 %v1147_v8  ;;  %v237_v8 = vsub.f32 1.0, %v236_v14  ;;  %v336_v14 = vand.u32 2147483648, %v3889_v2 }
 0x231   :  { %1172 = vmatpush.msra.mxu3 %v1144_v17 }
 0x232   :  { %3161 = vmatmul.msk.f32.vlgmr.msra.gmra.mxu3 %vm32_vm0, %v3828_v47 }
 0x233   :  { %1270 = vmatpush.msrb.mxu3 %v3899_v52 }
 0x235   :  { %1271 = vmatpush.msrb.mxu3 %v3904_v53 }
 0x23a   :  { %3162 = vmatmul.msk.f32.gmra.mxu3 %vm32_vm0, %v3835_v49  ;;  %vm196_vm0 = vweird.f32 %v3365_v7 }
 0x23b   :  { %vm197_vm2 = vmor %vm195_vm1, %vm196_vm0  ;;  %vm992_vm0 = vcmask 31744  }
 0x268   :  { %v3870_v5 = vpop.f32.mrf.mxu1 }
 0x269   :  { %4935 = vst [vmem:[#allocation17_spill] sm:$0xff] %v3870_v5 }
 0x270   :  { %v3872_v10 = vpop.f32.mrf.mxu1 }
 0x271   :  { %4936 = vst [vmem:[#allocation18_spill] sm:$0xff] %v3872_v10 }
 0x278   :  { %v3876_v11 = vpop.f32.mrf.mxu1 }
 0x279   :  { %4937 = vst [vmem:[#allocation19_spill] sm:$0xff] %v3876_v11 }
 0x280   :  { %v3880_v24 = vpop.f32.mrf.mxu1 }
 0x281   :  { %4938 = vst [vmem:[#allocation20_spill] sm:$0xff] %v3880_v24 }
 0x2b5   :  { %v1174_v13 = vpop.f32.mrf.mxu3 }
 0x2b6   :  { %v1175_v56 = vadd.f32 %v3311_v55, %v1174_v13  ;;  %v3371_v13 = vpop.eup %3370 }
 0x2b7   :  { %vm331_vm9 = vweird.f32 %v3371_v13 }
 0x2b8   :  { %v1180_v60 = vmax.f32 %v1175_v56, 0.0  ;;  %v3911_v56 = vld [vmem:[%s4904_s2 + $0x48] sm:$0xff]  ;;  %vm332_vm10 = vmor %vm330_vm8, %vm331_vm9 }
 0x2b9   :  { %1272 = vmatpush.msrb.mxu3 %v3911_v56 }
 0x2bb   :  { %1273 = vmatpush.msrb.mxu3 %v3919_v50 }
 0x2bd   :  { %v1177_v12 = vpop.f32.mrf.mxu3  ;;  %1274 = vmatpush.msrb.mxu3 %v3926_v20 }
 0x2be   :  { %v1178_v58 = vadd.f32 %v3311_v55, %v1177_v12  ;;  %v201_v55 = vand.u32 2147483648, %v176_v27  ;;  %v199_v12 = vand.u32 2147483647, %v176_v27 }
 0x2bf   :  { %1275 = vmatpush.msrb.mxu3 %v3935_v28 }
 0x2c0   :  { %v1181_v59 = vmax.f32 %v1178_v58, 0.0  ;;  %v198_v58 = vsel %vm197_vm2, %v3365_v7, %v194_v9  ;;  %v202_v44 = vor.u32 1.1754944e-38, %v201_v55  ;;  %vm200_vm3 = vcmp.eq.f32.partialorder %v199_v12, 8.507059e+37 }
 0x2c1   :  { %v244_v7 = vand.u32 2147483647, %v3884_v15  ;;  %1276 = vmatpush.msrb.mxu3 %v3945_v18  ;;  %v337_v9 = vor.u32 1.1754944e-38, %v336_v14 }
 0x2c2   :  { %1228 = vmatpush.msra.mxu1 %v1181_v59  ;;  %v203_v23 = vsel %vm200_vm3, %v202_v44, %v198_v58  ;;  %v401_v44 = vmul.f32 %v3689_v0, %v3507_v3  ;;  %v4001_v3 = vld [vmem:[%s4904_s2 + $0x88] sm:$0xff] }
 0x2c3   :  { %vm245_vm7 = vcmp.eq.f32.partialorder %v244_v7, 8.507059e+37  ;;  %v3457_v7 = vld [vmem:[%s4905_s0 + $0x18] sm:$0xff] }
 0x2c4   :  { %1229 = vmatpush.msra.mxu1 %v1180_v60 }
 0x2c6   :  { %1230 = vmatpush.msra.mxu1 %v1181_v59  ;;  %v238_v59 = vmul.f32 %v3369_v19, %v237_v8 }
 0x2c8   :  { %1231 = vmatpush.msra.mxu1 %v1180_v60  ;;  %v326_v60 = vmul.f32 %v3371_v13, %v3889_v2  ;;  %v239_v63 = vadd.f32 %v3369_v19, %v238_v59  ;;  %v3456_v59 = vld [vmem:[%s4905_s0] sm:$0xff] }
 0x2c9   :  { %3163 = vmatmul.msk.f32.vlgmr.msra.gmra.mxu1 %vm488_vm11, %v3828_v47 }
 0x2ca   :  { %1508 = vmatpush.msrb.mxu1 %v3899_v52  ;;  %v327_v27 = vsub.f32 1.0, %v326_v60  ;;  %v243_v37 = vsel %vm242_vm6, %v3369_v19, %v239_v63  ;;  %v3995_v63 = vld [vmem:[%s4904_s2 + $0x90] sm:$0xff] }
 0x2cb   :  { %v3952_v15 = vsel %vm245_vm7, %v247_v57, %v243_v37 }
 0x2cc   :  { %1509 = vmatpush.msrb.mxu1 %v3904_v53  ;;  %v328_v45 = vmul.f32 %v3371_v13, %v327_v27  ;;  %v433_v27 = vpop.permute.xlu1 %432 }
 0x2ce   :  { %1510 = vmatpush.msrb.mxu1 %v3911_v56  ;;  %v329_v19 = vadd.f32 %v3371_v13, %v328_v45 }
 0x2d0   :  { %1511 = vmatpush.msrb.mxu1 %v3919_v50  ;;  %v333_v8 = vsel %vm332_vm10, %v3371_v13, %v329_v19 }
 0x2d1   :  { %3164 = vmatmul.msk.f32.gmra.mxu1 %vm488_vm11, %v3835_v49 }
 0x2d2   :  { %1512 = vmatpush.msrb.mxu1 %v3926_v20 }
 0x2d4   :  { %1513 = vmatpush.msrb.mxu1 %v3935_v28  ;;  %v445_v14 = vpop.permute.xlu1 %444 }
 0x2d6   :  { %1514 = vmatpush.msrb.mxu1 %v3945_v18 }
 0x2d9   :  { %3165 = vmatmul.msk.f32.gmra.mxu1 %vm488_vm11, %v3857_v61 }
 0x2e1   :  { %3166 = vmatmul.msk.f32.gmra.mxu1 %vm488_vm11, %v3864_v62 }
 0x346   :  { %v3886_v36 = vpop.f32.mrf.mxu1 }
 0x34e   :  { %v3891_v6 = vpop.f32.mrf.mxu1 }
 0x356   :  { %v1239_v17 = vpop.f32.mrf.mxu1 }
 0x357   :  { %1247 = vrot.lane.b32.xlu2 %v1239_v17, %s3465_s13  ;;  %v334_v17 = vand.u32 2147483647, %v3889_v2  ;;  %v3971_v2 = vld [vmem:[%s4904_s2 + $0x20] sm:$0xff] }
 0x358   :  { %1277 = vmatpush.msrb.mxu3 %v3971_v2  ;;  %1515 = vmatpush.msrb.mxu1 %v3971_v2 }
 0x359   :  { %vm335_vm12 = vcmp.eq.f32.partialorder %v334_v17, 8.507059e+37 }
 0x35a   :  { %v3959_v55 = vsel %vm335_vm12, %v337_v9, %v333_v8  ;;  %v3460_v9 = vld [vmem:[%s4905_s0 + $0x40] sm:$0xff] }
 0x35b   :  { %v478_v8 = vmul.f32 %v3460_v9, %v445_v14 }
 0x35e   :  { %v1242_v22 = vpop.f32.mrf.mxu1 }
 0x35f   :  { %1249 = vrot.lane.b32.xlu0 %v1242_v22, %s3465_s13  ;;  %428 = vrot.lane.b32.xlu2 %v203_v23, %s3464_s17  ;;  %v400_v22 = vmul.f32 %v3456_v59, %v203_v23 }
 0x367   :  { %434 = vrot.lane.b32.xlu0 %v3952_v15, %s3464_s17  ;;  %538 = vrot.lane.b32.xlu2 %v203_v23, %s3466_s29 }
 0x36f   :  { %446 = vrot.lane.b32.xlu0 %v3959_v55, %s3464_s17  ;;  %540 = vrot.lane.b32.xlu2 %v3689_v0, %s3466_s29 }
 0x377   :  { %530 = vrot.lane.b32.xlu0 %v203_v23, %s3467_s30  ;;  %532 = vrot.lane.b32.xlu2 %v3689_v0, %s3467_s30  ;;  %v4007_v0 = vld [vmem:[%s4904_s2 + $0x80] sm:$0xff] }
 0x3b1   :  { %v1248_v13 = vpop.permute.xlu2 %1247 }
 0x3b2   :  { %v1253_v12 = vsel %vm488_vm11, %v3886_v36, %v1248_v13  ;;  %v3990_v36 = vld [vmem:[%s4904_s2 + $0x98] sm:$0xff] }
 0x3b3   :  { %3167 = vmatmul.msk.f32.vlgmr.msrb.gmra.mxu3 %vm1255_vm13, %v1253_v12  ;;  %1301 = vmatpush.msrb.mxu0 %v3990_v36  ;;  %v408_v12 = vmul.f32 %v3460_v9, %v3703_v26 }
 0x3b5   :  { %1302 = vmatpush.msrb.mxu0 %v3995_v63 }
 0x3b7   :  { %1303 = vmatpush.msrb.mxu0 %v4001_v3 }
 0x3b9   :  { %v429_v58 = vpop.permute.xlu2 %428  ;;  %1304 = vmatpush.msrb.mxu0 %v4007_v0 }
 0x3ba   :  { %v470_v60 = vmul.f32 %v3456_v59, %v429_v58  ;;  %v4043_v58 = vld [vmem:[%s4904_s2 + $0x70] sm:$0xff]  ;;  %v4049_v59 = vld [vmem:[%s4904_s2 + $0x68] sm:$0xff] }
 0x3bc   :  { %514 = vmatpush.msra.mxu2 %v470_v60  ;;  %v4055_v60 = vld [vmem:[%s4904_s2 + $0x60] sm:$0xff] }
 0x3be   :  { %515 = vmatpush.msra.mxu2 %v401_v44  ;;  %v4061_v44 = vld [vmem:[%s4904_s2 + $0xea] ss:$0 sm:$0xff] }
 0x3c0   :  { %516 = vmatpush.msra.mxu2 %v400_v22 }
 0x3c1   :  { %3092 = vmatmul.msk.f32.vlgmr.msra.gmra.mxu2 %vm488_vm11, %v3828_v47  ;;  %v4013_v47 = vld [vmem:[%s4904_s2 + $0x78] sm:$0xff] }
 0x3c2   :  { %1305 = vmatpush.msrb.mxu0 %v4013_v47 }
 0x3c4   :  { %1306 = vmatpush.msrb.mxu0 %v4043_v58 }
 0x3c6   :  { %1307 = vmatpush.msrb.mxu0 %v4049_v59 }
 0x3c8   :  { %1308 = vmatpush.msrb.mxu0 %v4055_v60 }
 0x3c9   :  { %3093 = vmatmul.msk.f32.gmra.mxu2 %vm488_vm11, %v3835_v49 }
 0x3d1   :  { %v1250_v49 = vpop.permute.xlu0 %1249  ;;  %3094 = vmatmul.msk.f32.gmra.mxu2 %vm488_vm11, %v3857_v61  ;;  %v3458_v61 = vld [vmem:[%s4905_s0 + $0x10] sm:$0xff] }
 0x3d2   :  { %v1254_v23 = vsel %vm488_vm11, %v3891_v6, %v1250_v49  ;;  %v472_v45 = vmul.f32 %v3458_v61, %v433_v27  ;;  %v403_v6 = vmul.f32 %v3457_v7, %v3952_v15  ;;  %v402_v57 = vmul.f32 %v3458_v61, %v3697_v21  ;;  %v4068_v27 = vld [vmem:[%s4906_s1 + $0x20] sm:$0xff]  ;;  %v4087_v61 = vld [vmem:[%s4904_s2 + $0xb0] sm:$0xff] }
 0x3d3   :  { %3168 = vmatmul.msk.f32.gmra.mxu3 %vm1255_vm13, %v1254_v23 }
 0x3d9   :  { %v435_v30 = vpop.permute.xlu0 %434  ;;  %3095 = vmatmul.msk.f32.gmra.mxu2 %vm488_vm11, %v3864_v62  ;;  %v3459_v62 = vld [vmem:[%s4905_s0 + $0x48] sm:$0xff] }
 0x3da   :  { %v473_v37 = vmul.f32 %v3457_v7, %v435_v30  ;;  %v409_v13 = vmul.f32 %v3459_v62, %v3959_v55  ;;  %v4075_v7 = vld [vmem:[%s4906_s1 + $0x28] sm:$0xff] }
 0x3dc   :  { %575 = vmatpush.msrb.mxu2 %v473_v37  ;;  %v4082_v37 = vld [vmem:[%s4904_s2 + $0xb8] sm:$0xff] }
 0x3dd   :  { %1336 = vmatpush.msra.mxu3 %v4082_v37  ;;  %1574 = vmatpush.msra.mxu1 %v4082_v37 }
 0x3de   :  { %576 = vmatpush.msrb.mxu2 %v472_v45 }
 0x3df   :  { %1337 = vmatpush.msra.mxu3 %v4087_v61  ;;  %1575 = vmatpush.msra.mxu1 %v4087_v61 }
 0x3e0   :  { %577 = vmatpush.msrb.mxu2 %v403_v6  ;;  %v4096_v6 = vld [vmem:[%s4906_s1 + $0x30] sm:$0xff] }
 0x3e1   :  { %v447_v19 = vpop.permute.xlu0 %446 }
 0x3e2   :  { %v479_v17 = vmul.f32 %v3459_v62, %v447_v19  ;;  %578 = vmatpush.msrb.mxu2 %v402_v57  ;;  %v539_v57 = vpop.permute.xlu2 %538  ;;  %v4103_v62 = vld [vmem:[%s4906_s1 + $0x38] sm:$0xff] }
 0x3e3   :  { %3100 = vmatmul.msk.f32.vlgmr.msrb.gmra.mxu2 %vm488_vm11, %v4068_v27 }
 0x3e4   :  { %761 = vmatpush.msra.mxu2 %v479_v17 }
 0x3e6   :  { %762 = vmatpush.msra.mxu2 %v478_v8 }
 0x3e8   :  { %763 = vmatpush.msra.mxu2 %v409_v13 }
 0x3ea   :  { %764 = vmatpush.msra.mxu2 %v408_v12  ;;  %v541_v13 = vpop.permute.xlu2 %540 }
 0x3eb   :  { %3101 = vmatmul.msk.f32.gmra.mxu2 %vm488_vm11, %v4075_v7 }
 0x3f3   :  { %3102 = vmatmul.msk.f32.gmra.mxu2 %vm488_vm11, %v4096_v6 }
 0x3fb   :  { %3103 = vmatmul.msk.f32.gmra.mxu2 %vm488_vm11, %v4103_v62 }
 0x436   :  { %v1279_v22 = vpop.f32.mrf.mxu3 }
 0x437   :  { %v1280_v49 = vadd.f32 %v4061_v44, %v1279_v22 }
 0x439   :  { %v1285_v23 = vmax.f32 %v1280_v49, 0.0  ;;  %v3120_v49 = vld [vmem:[%s4906_s1 + $0x80] sm:$0xff] }
 0x43a   :  { %3124 = vmatmul.msk.f32.vlgmr.msra.gmra.mxu2 %vm488_vm11, %v3120_v49 }
 0x43b   :  { %3169 = vmatmul.msk.f32.vlgmr.msrb.gmra.mxu0 %vm1255_vm13, %v1285_v23  ;;  %v3121_v23 = vld [vmem:[%s4906_s1 + $0x88] sm:$0xff] }
 0x442   :  { %3125 = vmatmul.msk.f32.gmra.mxu2 %vm488_vm11, %v3121_v23 }
 0x444   :  { %v518_v30 = vpop.f32.mrf.mxu2 }
 0x44c   :  { %v521_v45 = vpop.f32.mrf.mxu2 }
 0x454   :  { %v524_v14 = vpop.f32.mrf.mxu2 }
 0x455   :  { %v544_v19 = vmul.f32 %v539_v57, %v524_v14  ;;  %v4122_v57 = vld [vmem:[%s4904_s2 + $0xa8] sm:$0xff]  ;;  %v4128_v14 = vld [vmem:[%s4904_s2 + $0xa0] sm:$0xff] }
 0x456   :  { %v1282_v17 = vpop.f32.mrf.mxu3  ;;  %1338 = vmatpush.msra.mxu3 %v4122_v57  ;;  %1576 = vmatpush.msra.mxu1 %v4122_v57 }
 0x457   :  { %v1283_v9 = vadd.f32 %v4061_v44, %v1282_v17  ;;  %932 = vrot.lane.b32.xlu1 %v544_v19, %s3468_s22  ;;  %v3122_v19 = vld [vmem:[%s4906_s1 + $0x90] sm:$0xff]  ;;  %v3123_v17 = vld [vmem:[%s4906_s1 + $0x98] sm:$0xff] }
 0x458   :  { %3126 = vmatmul.msk.f32.gmra.mxu2 %vm488_vm11, %v3122_v19  ;;  %1339 = vmatpush.msra.mxu3 %v4128_v14 }
 0x459   :  { %v1286_v8 = vmax.f32 %v1283_v9, 0.0  ;;  %1577 = vmatpush.msra.mxu1 %v4128_v14  ;;  %v989_v9 = vld [vmem:[%s4904_s2 + $0xc0] sm:$0xf] }
 0x45a   :  { %1539 = vmatpush.msrb.mxu3 %v3990_v36  ;;  %3144 = vmatpush.msk.msrb.mxu2 %vm1035_vm14, %v989_v9 }
 0x45b   :  { %3170 = vmatmul.msk.f32.gmra.mxu0 %vm1255_vm13, %v1286_v8  ;;  %v4155_v8 = vld [vmem:[%s4904_s2 + $0xeb] ss:$0 sm:$0xff] }
 0x45c   :  { %v527_v12 = vpop.f32.mrf.mxu2  ;;  %1540 = vmatpush.msrb.mxu3 %v3995_v63 }
 0x45d   :  { %v545_v22 = vmul.f32 %v541_v13, %v527_v12 }
 0x45e   :  { %1541 = vmatpush.msrb.mxu3 %v4001_v3 }
 0x45f   :  { %934 = vrot.lane.b32.xlu0 %v545_v22, %s3468_s22  ;;  %v531_v22 = vpop.permute.xlu0 %530 }
 0x460   :  { %3127 = vmatmul.msk.f32.gmra.mxu2 %vm488_vm11, %v3123_v17  ;;  %1542 = vmatpush.msrb.mxu3 %v4007_v0  ;;  %v536_v49 = vmul.f32 %v531_v22, %v518_v30  ;;  %v533_v17 = vpop.permute.xlu2 %532 }
 0x461   :  { %v537_v9 = vmul.f32 %v533_v17, %v521_v45  ;;  %v4190_v17 = vld [vmem:[%s4904_s2 + $0xec] ss:$0 sm:$0xff] }
 0x462   :  { %1543 = vmatpush.msrb.mxu3 %v4013_v47 }
 0x464   :  { %1544 = vmatpush.msrb.mxu3 %v4043_v58 }
 0x466   :  { %1545 = vmatpush.msrb.mxu3 %v4049_v59  ;;  %v4171_v30 = vpop.f32.mrf.mxu2 }
 0x468   :  { %1546 = vmatpush.msrb.mxu3 %v4055_v60 }
 0x46e   :  { %v4173_v22 = vpop.f32.mrf.mxu2 }
 0x4b8   :  { %v1310_v13 = vpop.f32.mrf.mxu0 }
 0x4b9   :  { %v4158_v12 = vadd.f32 %v4155_v8, %v1310_v13 }
 0x4bb   :  { %3171 = vmatmul.msk.f32.vlgmr.msra.gmra.mxu3 %vm488_vm11, %v4158_v12 }
 0x4c9   :  { %v933_v23 = vpop.permute.xlu1 %932 }
 0x4ca   :  { %v975_v19 = vsel %vm974_vm15, %v536_v49, %v933_v23  ;;  %v4175_v49 = vpop.f32.mrf.mxu2 }
 0x4cb   :  { %3145 = vmatmul.msk.f32.vlgmr.msrb.gmra.mxu2 %vm992_vm0, %v975_v19 }
 0x4d1   :  { %v935_v10 = vpop.permute.xlu0 %934 }
 0x4d2   :  { %v976_v5 = vsel %vm974_vm15, %v537_v9, %v935_v10  ;;  %v4177_v23 = vpop.f32.mrf.mxu2 }
 0x4d3   :  { %3146 = vmatmul.msk.f32.gmra.mxu2 %vm992_vm0, %v976_v5 }
 0x4d8   :  { %v1313_v13 = vpop.f32.mrf.mxu0 }
 0x4d9   :  { %v4167_v41 = vadd.f32 %v4155_v8, %v1313_v13 }
 0x4da   :  { %v4179_v45 = vpop.f32.mrf.mxu2 }
 0x4db   :  { %3172 = vmatmul.msk.f32.gmra.mxu3 %vm488_vm11, %v4167_v41  ;;  %4939 = vst [vmem:[#allocation21_spill] sm:$0xff] %v4179_v45 }
 0x4e2   :  { %v4181_v10 = vpop.f32.mrf.mxu2 }
 0x4e3   :  { %4940 = vst [vmem:[#allocation22_spill] sm:$0xff] %v4181_v10 }
 0x4ea   :  { %v4183_v5 = vpop.f32.mrf.mxu2 }
 0x4eb   :  { %4941 = vst [vmem:[#allocation23_spill] sm:$0xff] %v4183_v5 }
 0x4f2   :  { %v4185_v19 = vpop.f32.mrf.mxu2 }
 0x4f3   :  { %4942 = vst [vmem:[#allocation24_spill] sm:$0xff] %v4185_v19 }
 0x53e   :  { %v1341_v40 = vpop.f32.mrf.mxu3 }
 0x54e   :  { %v1056_v9 = vpop.f32.mrf.mxu2 }
 0x54f   :  { %v1057_v13 = vadd.f32 %v4190_v17, %v1056_v9 }
 0x551   :  { %v1347_v35 = vadd.f32 %v1341_v40, %v1057_v13 }
 0x553   :  { %1389 = vrot.lane.b32.xlu2 %v1347_v35, %s3465_s13  ;;  %v3173_v4 = vmul.f32 -1.442695, %v1347_v35 }
 0x555   :  { %3372 = vpow2.f32 %v3173_v4 }
 0x556   :  { %v1059_v24 = vpop.f32.mrf.mxu2 }
 0x557   :  { %v1060_v45 = vadd.f32 %v4190_v17, %v1059_v24 }
 0x55b   :  { %v3373_v43 = vpop.eup %3372 }
 0x55c   :  { %v1355_v5 = vadd.f32 1.0, %v3373_v43 }
 0x55e   :  { %v1344_v10 = vpop.f32.mrf.mxu3  ;;  %3374 = vrcp.f32 %v1355_v5  ;;  %v1368_v13 = vand.u32 2147483648, %v1355_v5  ;;  %vm1362_vm2 = vweird.f32 %v1355_v5  ;;  %v1366_v48 = vand.u32 2147483647, %v1355_v5 }
 0x55f   :  { %v1348_v46 = vadd.f32 %v1344_v10, %v1060_v45 }
 0x560   :  { %v1369_v45 = vor.u32 1.1754944e-38, %v1368_v13  ;;  %vm1367_vm4 = vcmp.eq.f32.partialorder %v1366_v48, 8.507059e+37 }
 0x561   :  { %1391 = vrot.lane.b32.xlu1 %v1348_v46, %s3465_s13  ;;  %v3174_v19 = vmul.f32 -1.442695, %v1348_v46 }
 0x563   :  { %3376 = vpow2.f32 %v3174_v19 }
 0x564   :  { %v3375_v39 = vpop.eup %3374 }
 0x565   :  { %v1358_v11 = vmul.f32 %v3375_v39, %v1355_v5  ;;  %vm1363_vm1 = vweird.f32 %v3375_v39 }
 0x566   :  { %vm1364_vm3 = vmor %vm1362_vm2, %vm1363_vm1 }
 0x567   :  { %v1359_v38 = vsub.f32 1.0, %v1358_v11 }
 0x569   :  { %v1360_v9 = vmul.f32 %v3375_v39, %v1359_v38  ;;  %v3377_v43 = vpop.eup %3376 }
 0x56a   :  { %v1356_v11 = vadd.f32 1.0, %v3377_v43 }
 0x56b   :  { %v1361_v40 = vadd.f32 %v3375_v39, %v1360_v9 }
 0x56c   :  { %3378 = vrcp.f32 %v1356_v11  ;;  %v1383_v5 = vand.u32 2147483648, %v1356_v11  ;;  %vm1377_vm6 = vweird.f32 %v1356_v11 }
 0x56d   :  { %v1365_v24 = vsel %vm1364_vm3, %v3375_v39, %v1361_v40  ;;  %v1381_v39 = vand.u32 2147483647, %v1356_v11 }
 0x56e   :  { %v1370_v4 = vsel %vm1367_vm4, %v1369_v45, %v1365_v24  ;;  %v1384_v19 = vor.u32 1.1754944e-38, %v1383_v5 }
 0x56f   :  { %vm1382_vm8 = vcmp.eq.f32.partialorder %v1381_v39, 8.507059e+37 }
 0x572   :  { %v3379_v38 = vpop.eup %3378 }
 0x573   :  { %v1373_v9 = vmul.f32 %v3379_v38, %v1356_v11  ;;  %vm1378_vm5 = vweird.f32 %v3379_v38 }
 0x574   :  { %vm1379_vm7 = vmor %vm1377_vm6, %vm1378_vm5 }
 0x575   :  { %v1374_v29 = vsub.f32 1.0, %v1373_v9  ;;  %v1409_v9 = vsub.f32 1.0, %v1370_v4 }
 0x577   :  { %v1375_v25 = vmul.f32 %v3379_v38, %v1374_v29 }
 0x579   :  { %v1376_v51 = vadd.f32 %v3379_v38, %v1375_v25 }
 0x57b   :  { %v1380_v48 = vsel %vm1379_vm7, %v3379_v38, %v1376_v51 }
 0x57c   :  { %v1385_v13 = vsel %vm1382_vm8, %v1384_v19, %v1380_v48 }
 0x57d   :  { %v1410_v11 = vsub.f32 1.0, %v1385_v13 }
 0x5ad   :  { %v1390_v10 = vpop.permute.xlu2 %1389 }
 0x5ae   :  { %v1395_v26 = vmul.f32 %v1390_v10, %v1370_v4 }
 0x5b0   :  { %1399 = vrot.lane.b32.xlu1 %v1395_v26, %s3469_s15 }
 0x5d3   :  { %v1392_v40 = vpop.permute.xlu1 %1391 }
 0x5d4   :  { %v1396_v24 = vmul.f32 %v1392_v40, %v1385_v13 }
 0x5d6   :  { %1401 = vrot.lane.b32.xlu0 %v1396_v24, %s3469_s15 }
 0x5de   :  { %1423 = vrot.lane.b32.xlu0 %v4167_v41, %s3465_s13 }
 0x622   :  { %v1400_v26 = vpop.permute.xlu1 %1399 }
 0x623   :  { %v1405_v45 = vadd.f32 %v1400_v26, %v1347_v35 }
 0x625   :  { %3380 = vtanh.f32 %v1405_v45 }
 0x62b   :  { %v3381_v29 = vpop.eup %3380 }
 0x62c   :  { %1413 = vrot.lane.b32.xlu1 %v3381_v29, %s3470_s16 }
 0x648   :  { %v1402_v25 = vpop.permute.xlu0 %1401 }
 0x649   :  { %v1406_v10 = vadd.f32 %v1402_v25, %v1348_v46 }
 0x64b   :  { %3382 = vtanh.f32 %v1406_v10 }
 0x650   :  { %v1424_v38 = vpop.permute.xlu0 %1423 }
 0x651   :  { %v3383_v51 = vpop.eup %3382  ;;  %v1428_v39 = vmul.f32 %v1424_v38, %v1385_v13 }
 0x652   :  { %1415 = vrot.lane.b32.xlu2 %v3383_v51, %s3470_s16 }
 0x65a   :  { %1421 = vrot.lane.b32.xlu2 %v4158_v12, %s3465_s13 }
 0x69e   :  { %v1414_v41 = vpop.permute.xlu1 %1413 }
 0x69f   :  { %v1419_v48 = vmul.f32 %v1414_v41, %v1409_v9 }
 0x6ac   :  { %v1416_v43 = vpop.permute.xlu2 %1415 }
 0x6ad   :  { %v1420_v35 = vmul.f32 %v1416_v43, %v1410_v11 }
 0x6af   :  { %v1430_v40 = vadd.f32 %v1428_v39, %v1420_v35 }
 0x6b4   :  { %v1422_v5 = vpop.permute.xlu2 %1421 }
 0x6b5   :  { %v1427_v19 = vmul.f32 %v1422_v5, %v1370_v4 }
 0x6b7   :  { %v1429_v24 = vadd.f32 %v1427_v19, %v1419_v48 }
 0x6b9   :  { %v3300_v46 = vpack.i.bf16 %v1429_v24, %v1430_v40 }
 0x6bb   :  { %3301 = vrot.lane.b32.xlu0 %v3300_v46, %s3470_s16 }
 0x6c3   :  { %600 = vrot.lane.b32.xlu0 %v3697_v21, %s3466_s29 }
 0x72d   :  { %v3302_v26 = vpop.permute.xlu0 %3301 }
 0x72e   :  { %v3303_v12 = vunpack.i.l.bf16 %v3302_v26  ;;  %v3304_v45 = vunpack.i.h.bf16 %v3302_v26 }
 0x730   :  { %1467 = vmatpush.msra.mxu0 %v3303_v12 }
 0x732   :  { %1468 = vmatpush.msra.mxu0 %v3304_v45 }
 0x734   :  { %1469 = vmatpush.msra.mxu0 %v3303_v12 }
 0x735   :  { %v601_v29 = vpop.permute.xlu0 %600 }
 0x736   :  { %v606_v25 = vmul.f32 %v601_v29, %v4175_v49  ;;  %1470 = vmatpush.msra.mxu0 %v3304_v45 }
 0x737   :  { %3179 = vmatmul.msk.f32.vlgmr.msra.gmra.mxu0 %vm488_vm11, %v4068_v27 }
 0x738   :  { %936 = vrot.lane.b32.xlu0 %v606_v25, %s3468_s22  ;;  %1746 = vmatpush.msrb.mxu0 %v3899_v52 }
 0x73a   :  { %1747 = vmatpush.msrb.mxu0 %v3904_v53 }
 0x73c   :  { %1748 = vmatpush.msrb.mxu0 %v3911_v56 }
 0x73e   :  { %1749 = vmatpush.msrb.mxu0 %v3919_v50 }
 0x73f   :  { %3180 = vmatmul.msk.f32.gmra.mxu0 %vm488_vm11, %v4075_v7 }
 0x740   :  { %1750 = vmatpush.msrb.mxu0 %v3926_v20 }
 0x742   :  { %1751 = vmatpush.msrb.mxu0 %v3935_v28 }
 0x744   :  { %1752 = vmatpush.msrb.mxu0 %v3945_v18 }
 0x746   :  { %1753 = vmatpush.msrb.mxu0 %v3971_v2 }
 0x747   :  { %3181 = vmatmul.msk.f32.gmra.mxu0 %vm488_vm11, %v4096_v6 }
 0x748   :  { %1812 = vmatpush.msra.mxu0 %v4082_v37 }
 0x74a   :  { %1813 = vmatpush.msra.mxu0 %v4087_v61 }
 0x74c   :  { %1814 = vmatpush.msra.mxu0 %v4122_v57 }
 0x74e   :  { %1815 = vmatpush.msra.mxu0 %v4128_v14 }
 0x74f   :  { %3182 = vmatmul.msk.f32.gmra.mxu0 %vm488_vm11, %v4103_v62 }
 0x7aa   :  { %v937_v2 = vpop.permute.xlu0 %936 }
 0x7b4   :  { %v1472_v52 = vpop.f32.mrf.mxu0 }
 0x7bc   :  { %v1475_v53 = vpop.f32.mrf.mxu0 }
 0x7c4   :  { %v1478_v56 = vpop.f32.mrf.mxu0 }
 0x7c5   :  { %1486 = vrot.lane.b32.xlu1 %v1478_v56, %s3465_s13 }
 0x7cc   :  { %v1481_v50 = vpop.f32.mrf.mxu0 }
 0x7cd   :  { %602 = vrot.lane.b32.xlu1 %v3952_v15, %s3466_s29  ;;  %1488 = vrot.lane.b32.xlu2 %v1481_v50, %s3465_s13 }
 0x7d5   :  { %594 = vrot.lane.b32.xlu1 %v3952_v15, %s3467_s30  ;;  %592 = vrot.lane.b32.xlu2 %v3697_v21, %s3467_s30 }
 0x827   :  { %v1489_v20 = vpop.permute.xlu2 %1488 }
 0x828   :  { %v1493_v61 = vsel %vm488_vm11, %v1475_v53, %v1489_v20 }
 0x82f   :  { %v593_v28 = vpop.permute.xlu2 %592 }
 0x830   :  { %v598_v18 = vmul.f32 %v593_v28, %v4171_v30 }
 0x832   :  { %v977_v27 = vsel %vm974_vm15, %v598_v18, %v937_v2 }
 0x833   :  { %3147 = vmatmul.msk.f32.gmra.mxu2 %vm992_vm0, %v977_v27 }
 0x837   :  { %v1487_v7 = vpop.permute.xlu1 %1486 }
 0x838   :  { %v1492_v37 = vsel %vm488_vm11, %v1472_v52, %v1487_v7 }
 0x839   :  { %3183 = vmatmul.msk.f32.vlgmr.msrb.gmra.mxu1 %vm1255_vm13, %v1492_v37 }
 0x83a   :  { %1777 = vmatpush.msrb.mxu1 %v3990_v36 }
 0x83c   :  { %1778 = vmatpush.msrb.mxu1 %v3995_v63 }
 0x83e   :  { %1779 = vmatpush.msrb.mxu1 %v4001_v3 }
 0x83f   :  { %v603_v21 = vpop.permute.xlu1 %602 }
 0x840   :  { %v607_v15 = vmul.f32 %v603_v21, %v4177_v23  ;;  %1780 = vmatpush.msrb.mxu1 %v4007_v0 }
 0x841   :  { %3184 = vmatmul.msk.f32.gmra.mxu1 %vm1255_vm13, %v1493_v61 }
 0x842   :  { %938 = vrot.lane.b32.xlu2 %v607_v15, %s3468_s22  ;;  %1781 = vmatpush.msrb.mxu1 %v4013_v47 }
 0x844   :  { %1782 = vmatpush.msrb.mxu1 %v4043_v58 }
 0x846   :  { %1783 = vmatpush.msrb.mxu1 %v4049_v59 }
 0x847   :  { %v595_v36 = vpop.permute.xlu1 %594 }
 0x848   :  { %1784 = vmatpush.msrb.mxu1 %v4055_v60  ;;  %v599_v63 = vmul.f32 %v595_v36, %v4173_v22 }
 0x89c   :  { %v939_v3 = vpop.permute.xlu2 %938 }
 0x89d   :  { %v978_v6 = vsel %vm974_vm15, %v599_v63, %v939_v3 }
 0x89e   :  { %3148 = vmatmul.msk.f32.gmra.mxu2 %vm992_vm0, %v978_v6 }
 0x8b6   :  { %v1517_v0 = vpop.f32.mrf.mxu1  ;;  %v1062_v49 = vpop.f32.mrf.mxu2 }
 0x8b7   :  { %v1518_v62 = vadd.f32 %v4061_v44, %v1517_v0  ;;  %v1063_v23 = vadd.f32 %v4190_v17, %v1062_v49 }
 0x8b9   :  { %v1523_v57 = vmax.f32 %v1518_v62, 0.0 }
 0x8bb   :  { %3185 = vmatmul.msk.f32.vlgmr.msrb.gmra.mxu3 %vm1255_vm13, %v1523_v57 }
 0x8be   :  { %v1520_v47 = vpop.f32.mrf.mxu1 }
 0x8bf   :  { %v1521_v58 = vadd.f32 %v4061_v44, %v1520_v47 }
 0x8c1   :  { %v1524_v59 = vmax.f32 %v1521_v58, 0.0 }
 0x8c3   :  { %3186 = vmatmul.msk.f32.gmra.mxu3 %vm1255_vm13, %v1524_v59 }
 0x921   :  { %v1065_v10 = vpop.f32.mrf.mxu2 }
 0x922   :  { %v1066_v51 = vadd.f32 %v4190_v17, %v1065_v10 }
 0x93e   :  { %v1548_v60 = vpop.f32.mrf.mxu3 }
 0x93f   :  { %v4262_v14 = vadd.f32 %v4155_v8, %v1548_v60 }
 0x941   :  { %3187 = vmatmul.msk.f32.vlgmr.msra.gmra.mxu1 %vm488_vm11, %v4262_v14 }
 0x946   :  { %v1551_v30 = vpop.f32.mrf.mxu3 }
 0x947   :  { %v1552_v22 = vadd.f32 %v4155_v8, %v1551_v30 }
 0x949   :  { %3188 = vmatmul.msk.f32.gmra.mxu1 %vm488_vm11, %v1552_v22 }
 0x9be   :  { %v1579_v4 = vpop.f32.mrf.mxu1 }
 0x9bf   :  { %v1585_v13 = vadd.f32 %v1579_v4, %v1063_v23 }
 0x9c1   :  { %1627 = vrot.lane.b32.xlu1 %v1585_v13, %s3465_s13  ;;  %v3189_v38 = vmul.f32 -1.442695, %v1585_v13 }
 0x9c3   :  { %3384 = vpow2.f32 %v3189_v38  ;;  %v3191_v38 = vld [vmem:[%s4906_s1 + $0x40] sm:$0xff] }
 0x9c6   :  { %v1582_v43 = vpop.f32.mrf.mxu1 }
 0x9c7   :  { %v1586_v11 = vadd.f32 %v1582_v43, %v1066_v51 }
 0x9c9   :  { %1629 = vrot.lane.b32.xlu0 %v1586_v11, %s3465_s13  ;;  %v3190_v41 = vmul.f32 -1.442695, %v1586_v11  ;;  %v3385_v9 = vpop.eup %3384 }
 0x9ca   :  { %v1593_v35 = vadd.f32 1.0, %v3385_v9 }
 0x9cb   :  { %3386 = vpow2.f32 %v3190_v41 }
 0x9cc   :  { %3388 = vrcp.f32 %v1593_v35  ;;  %v1606_v29 = vand.u32 2147483648, %v1593_v35  ;;  %vm1600_vm10 = vweird.f32 %v1593_v35  ;;  %v1604_v25 = vand.u32 2147483647, %v1593_v35 }
 0x9ce   :  { %v1607_v56 = vor.u32 1.1754944e-38, %v1606_v29  ;;  %vm1605_vm14 = vcmp.eq.f32.partialorder %v1604_v25, 8.507059e+37 }
 0x9d1   :  { %v3387_v5 = vpop.eup %3386 }
 0x9d2   :  { %v1594_v39 = vadd.f32 1.0, %v3387_v5  ;;  %v3389_v48 = vpop.eup %3388  ;;  %v3193_v5 = vld [vmem:[%s4906_s1 + $0x50] sm:$0xff] }
 0x9d3   :  { %v1596_v19 = vmul.f32 %v3389_v48, %v1593_v35  ;;  %vm1601_vm9 = vweird.f32 %v3389_v48  ;;  %v3192_v35 = vld [vmem:[%s4906_s1 + $0x48] sm:$0xff] }
 0x9d4   :  { %3390 = vrcp.f32 %v1594_v39  ;;  %vm1602_vm12 = vmor %vm1600_vm10, %vm1601_vm9  ;;  %v1621_v2 = vand.u32 2147483648, %v1594_v39  ;;  %vm1615_vm2 = vweird.f32 %v1594_v39  ;;  %v1619_v27 = vand.u32 2147483647, %v1594_v39 }
 0x9d5   :  { %v1597_v40 = vsub.f32 1.0, %v1596_v19 }
 0x9d6   :  { %v1622_v37 = vor.u32 1.1754944e-38, %v1621_v2  ;;  %vm1620_vm4 = vcmp.eq.f32.partialorder %v1619_v27, 8.507059e+37 }
 0x9d7   :  { %v1598_v46 = vmul.f32 %v3389_v48, %v1597_v40 }
 0x9d9   :  { %v1599_v12 = vadd.f32 %v3389_v48, %v1598_v46 }
 0x9da   :  { %v3391_v24 = vpop.eup %3390 }
 0x9db   :  { %v1611_v26 = vmul.f32 %v3391_v24, %v1594_v39  ;;  %v1603_v52 = vsel %vm1602_vm12, %v3389_v48, %v1599_v12  ;;  %vm1616_vm1 = vweird.f32 %v3391_v24 }
 0x9dc   :  { %v1608_v20 = vsel %vm1605_vm14, %v1607_v56, %v1603_v52  ;;  %vm1617_vm3 = vmor %vm1615_vm2, %vm1616_vm1 }
 0x9dd   :  { %v1612_v45 = vsub.f32 1.0, %v1611_v26  ;;  %v1647_v30 = vsub.f32 1.0, %v1608_v20 }
 0x9df   :  { %v1613_v53 = vmul.f32 %v3391_v24, %v1612_v45 }
 0x9e1   :  { %v1614_v18 = vadd.f32 %v3391_v24, %v1613_v53 }
 0x9e3   :  { %v1618_v7 = vsel %vm1617_vm3, %v3391_v24, %v1614_v18 }
 0x9e4   :  { %v1623_v15 = vsel %vm1620_vm4, %v1622_v37, %v1618_v7 }
 0x9e5   :  { %v1648_v47 = vsub.f32 1.0, %v1623_v15 }
 0xa33   :  { %v1628_v50 = vpop.permute.xlu1 %1627 }
 0xa34   :  { %v1633_v28 = vmul.f32 %v1628_v50, %v1608_v20 }
 0xa36   :  { %1637 = vrot.lane.b32.xlu0 %v1633_v28, %s3469_s15 }
 0xa3b   :  { %v1630_v21 = vpop.permute.xlu0 %1629 }
 0xa3c   :  { %v1634_v61 = vmul.f32 %v1630_v21, %v1623_v15 }
 0xa3e   :  { %1639 = vrot.lane.b32.xlu2 %v1634_v61, %s3469_s15 }
 0xa46   :  { %1661 = vrot.lane.b32.xlu2 %v1552_v22, %s3465_s13 }
 0xa98   :  { %v1640_v36 = vpop.permute.xlu2 %1639 }
 0xa99   :  { %v1644_v63 = vadd.f32 %v1640_v36, %v1586_v11 }
 0xa9b   :  { %3392 = vtanh.f32 %v1644_v63 }
 0xaa0   :  { %v1662_v58 = vpop.permute.xlu2 %1661 }
 0xaa1   :  { %v3393_v3 = vpop.eup %3392  ;;  %v1666_v49 = vmul.f32 %v1662_v58, %v1623_v15 }
 0xaa2   :  { %1653 = vrot.lane.b32.xlu1 %v3393_v3, %s3470_s16 }
 0xaa8   :  { %v1638_v6 = vpop.permute.xlu0 %1637 }
 0xaa9   :  { %v1643_v0 = vadd.f32 %v1638_v6, %v1585_v13 }
 0xaaa   :  { %1659 = vrot.lane.b32.xlu1 %v4262_v14, %s3465_s13 }
 0xaab   :  { %3394 = vtanh.f32 %v1643_v0 }
 0xab1   :  { %v3395_v62 = vpop.eup %3394 }
 0xab2   :  { %1651 = vrot.lane.b32.xlu0 %v3395_v62, %s3470_s16 }
 0xb14   :  { %v1654_v57 = vpop.permute.xlu1 %1653 }
 0xb15   :  { %v1658_v60 = vmul.f32 %v1654_v57, %v1648_v47 }
 0xb17   :  { %v1668_v10 = vadd.f32 %v1666_v49, %v1658_v60 }
 0xb1c   :  { %v1660_v59 = vpop.permute.xlu1 %1659 }
 0xb1d   :  { %v1665_v23 = vmul.f32 %v1660_v59, %v1608_v20 }
 0xb24   :  { %v1652_v22 = vpop.permute.xlu0 %1651 }
 0xb25   :  { %v1657_v4 = vmul.f32 %v1652_v22, %v1647_v30 }
 0xb27   :  { %v1667_v51 = vadd.f32 %v1665_v23, %v1657_v4 }
 0xb29   :  { %v3305_v13 = vpack.i.bf16 %v1667_v51, %v1668_v10 }
 0xb2b   :  { %3306 = vrot.lane.b32.xlu2 %v3305_v13, %s3470_s16 }
 0xb33   :  { %662 = vrot.lane.b32.xlu2 %v3605_v1, %s3466_s29 }
 0xb85   :  { %v3307_v14 = vpop.permute.xlu2 %3306 }
 0xb86   :  { %v3308_v43 = vunpack.i.l.bf16 %v3307_v14  ;;  %v3309_v11 = vunpack.i.h.bf16 %v3307_v14 }
 0xb88   :  { %1705 = vmatpush.msra.mxu3 %v3308_v43 }
 0xb8a   :  { %1706 = vmatpush.msra.mxu3 %v3309_v11 }
 0xb8c   :  { %1707 = vmatpush.msra.mxu3 %v3308_v43 }
 0xb8d   :  { %v663_v41 = vpop.permute.xlu2 %662 }
 0xb8e   :  { %v668_v9 = vmul.f32 %v663_v41, %v3789_v34  ;;  %1708 = vmatpush.msra.mxu3 %v3309_v11  ;;  %v3194_v34 = vld [vmem:[%s4906_s1 + $0x58] sm:$0xff] }
 0xb8f   :  { %3195 = vmatmul.msk.f32.vlgmr.msra.gmra.mxu3 %vm488_vm11, %v3191_v38 }
 0xb90   :  { %940 = vrot.lane.b32.xlu2 %v668_v9, %s3468_s22 }
 0xb97   :  { %3196 = vmatmul.msk.f32.gmra.mxu3 %vm488_vm11, %v3192_v35 }
 0xb9f   :  { %3197 = vmatmul.msk.f32.gmra.mxu3 %vm488_vm11, %v3193_v5 }
 0xba7   :  { %3198 = vmatmul.msk.f32.gmra.mxu3 %vm488_vm11, %v3194_v34 }
 0xbea   :  { %v941_v52 = vpop.permute.xlu2 %940 }
 0xc12   :  { %v1710_v39 = vpop.f32.mrf.mxu3 }
 0xc1a   :  { %v1713_v48 = vpop.f32.mrf.mxu3 }
 0xc22   :  { %v1716_v19 = vpop.f32.mrf.mxu3 }
 0xc23   :  { %1724 = vrot.lane.b32.xlu0 %v1716_v19, %s3465_s13 }
 0xc2a   :  { %v1719_v40 = vpop.f32.mrf.mxu3 }
 0xc2b   :  { %664 = vrot.lane.b32.xlu0 %v3598_v54, %s3466_s29  ;;  %1726 = vrot.lane.b32.xlu1 %v1719_v40, %s3465_s13 }
 0xc33   :  { %656 = vrot.lane.b32.xlu0 %v3598_v54, %s3467_s30  ;;  %654 = vrot.lane.b32.xlu1 %v3605_v1, %s3467_s30 }
 0xc95   :  { %v1725_v24 = vpop.permute.xlu0 %1724 }
 0xc96   :  { %v1730_v46 = vsel %vm488_vm11, %v1710_v39, %v1725_v24 }
 0xc97   :  { %3199 = vmatmul.msk.f32.vlgmr.msrb.gmra.mxu0 %vm1255_vm13, %v1730_v46 }
 0xc9d   :  { %v665_v26 = vpop.permute.xlu0 %664  ;;  %v1727_v12 = vpop.permute.xlu1 %1726 }
 0xc9e   :  { %v669_v45 = vmul.f32 %v665_v26, %v3791_v16  ;;  %v1731_v29 = vsel %vm488_vm11, %v1713_v48, %v1727_v12 }
 0xc9f   :  { %3200 = vmatmul.msk.f32.gmra.mxu0 %vm1255_vm13, %v1731_v29 }
 0xca0   :  { %942 = vrot.lane.b32.xlu1 %v669_v45, %s3468_s22 }
 0xca5   :  { %v655_v25 = vpop.permute.xlu1 %654  ;;  %v657_v53 = vpop.permute.xlu0 %656 }
 0xca6   :  { %v660_v54 = vmul.f32 %v655_v25, %v3785_v31  ;;  %v661_v56 = vmul.f32 %v657_v53, %v3787_v32 }
 0xca8   :  { %v979_v1 = vsel %vm974_vm15, %v660_v54, %v941_v52  ;;  %v4943_v54 = vld [vmem:[#allocation6_spill] sm:$0xff]  ;;  %v4944_v52 = vld [vmem:[#allocation8_spill] sm:$0xff] }
 0xca9   :  { %3149 = vmatmul.msk.f32.gmra.mxu2 %vm992_vm0, %v979_v1 }
 0xd12   :  { %v943_v50 = vpop.permute.xlu1 %942 }
 0xd13   :  { %v980_v16 = vsel %vm974_vm15, %v661_v56, %v943_v50 }
 0xd14   :  { %3150 = vmatmul.msk.f32.gmra.mxu2 %vm992_vm0, %v980_v16  ;;  %v1755_v20 = vpop.f32.mrf.mxu0 }
 0xd15   :  { %v1756_v28 = vadd.f32 %v4061_v44, %v1755_v20 }
 0xd17   :  { %v1761_v18 = vmax.f32 %v1756_v28, 0.0 }
 0xd19   :  { %3201 = vmatmul.msk.f32.vlgmr.msrb.gmra.mxu1 %vm1255_vm13, %v1761_v18 }
 0xd1c   :  { %v1758_v31 = vpop.f32.mrf.mxu0 }
 0xd1d   :  { %v1759_v2 = vadd.f32 %v4061_v44, %v1758_v31 }
 0xd1f   :  { %v1762_v27 = vmax.f32 %v1759_v2, 0.0 }
 0xd21   :  { %3202 = vmatmul.msk.f32.gmra.mxu1 %vm1255_vm13, %v1762_v27 }
 0xd2c   :  { %v1068_v15 = vpop.f32.mrf.mxu2 }
 0xd2d   :  { %v1069_v61 = vadd.f32 %v4190_v17, %v1068_v15  ;;  %v4947_v15 = vld [vmem:[#allocation5_spill] sm:$0xff] }
 0xd96   :  { %v1786_v7 = vpop.f32.mrf.mxu1 }
 0xd97   :  { %v4325_v32 = vadd.f32 %v4155_v8, %v1786_v7  ;;  %v1071_v63 = vpop.f32.mrf.mxu2 }
 0xd98   :  { %v1072_v3 = vadd.f32 %v4190_v17, %v1071_v63  ;;  %v4949_v63 = vld [vmem:[#allocation10_spill] sm:$0xff] }
 0xd99   :  { %3203 = vmatmul.msk.f32.vlgmr.msra.gmra.mxu0 %vm488_vm11, %v4325_v32 }
 0xd9e   :  { %v1789_v37 = vpop.f32.mrf.mxu1 }
 0xd9f   :  { %v1790_v21 = vadd.f32 %v4155_v8, %v1789_v37 }
 0xda1   :  { %3204 = vmatmul.msk.f32.gmra.mxu0 %vm488_vm11, %v1790_v21 }
 0xe16   :  { %v1817_v36 = vpop.f32.mrf.mxu0 }
 0xe17   :  { %v1823_v44 = vadd.f32 %v1817_v36, %v1069_v61  ;;  %v4948_v36 = vld [vmem:[#allocation24_spill] sm:$0xff] }
 0xe19   :  { %1865 = vrot.lane.b32.xlu0 %v1823_v44, %s3465_s13  ;;  %v3205_v47 = vmul.f32 -1.442695, %v1823_v44 }
 0xe1e   :  { %v1820_v6 = vpop.f32.mrf.mxu0 }
 0xe1f   :  { %v1824_v0 = vadd.f32 %v1820_v6, %v1072_v3 }
 0xe21   :  { %1867 = vrot.lane.b32.xlu2 %v1824_v0, %s3465_s13  ;;  %v3206_v62 = vmul.f32 -1.442695, %v1824_v0 }
 0xe23   :  { %3396 = vpow2.f32 %v3206_v62  ;;  %v4950_v62 = vld [vmem:[#allocation19_spill] sm:$0xff] }
 0xe29   :  { %v3397_v57 = vpop.eup %3396 }
 0xe2a   :  { %v1832_v8 = vadd.f32 1.0, %v3397_v57 }
 0xe2c   :  { %3398 = vrcp.f32 %v1832_v8  ;;  %v1859_v4 = vand.u32 2147483648, %v1832_v8  ;;  %vm1853_vm6 = vweird.f32 %v1832_v8  ;;  %v1857_v10 = vand.u32 2147483647, %v1832_v8 }
 0xe2d   :  { %3400 = vpow2.f32 %v3205_v47 }
 0xe2e   :  { %v1860_v14 = vor.u32 1.1754944e-38, %v1859_v4  ;;  %vm1858_vm8 = vcmp.eq.f32.partialorder %v1857_v10, 8.507059e+37  ;;  %v3209_v10 = vld [vmem:[%s4906_s1 + $0x70] sm:$0xff] }
 0xe32   :  { %v3399_v58 = vpop.eup %3398 }
 0xe33   :  { %v3401_v59 = vpop.eup %3400  ;;  %v1849_v60 = vmul.f32 %v3399_v58, %v1832_v8  ;;  %vm1854_vm5 = vweird.f32 %v3399_v58 }
 0xe34   :  { %v1831_v30 = vadd.f32 1.0, %v3401_v59  ;;  %vm1855_vm7 = vmor %vm1853_vm6, %vm1854_vm5 }
 0xe35   :  { %v1850_v22 = vsub.f32 1.0, %v1849_v60  ;;  %v3208_v60 = vld [vmem:[%s4906_s1 + $0x68] sm:$0xff] }
 0xe36   :  { %3402 = vrcp.f32 %v1831_v30  ;;  %v1844_v5 = vand.u32 2147483648, %v1831_v30  ;;  %vm1838_vm10 = vweird.f32 %v1831_v30  ;;  %v1842_v34 = vand.u32 2147483647, %v1831_v30 }
 0xe37   :  { %v1851_v49 = vmul.f32 %v3399_v58, %v1850_v22  ;;  %v4952_v22 = vld [vmem:[#allocation23_spill] sm:$0xff] }
 0xe38   :  { %v1845_v48 = vor.u32 1.1754944e-38, %v1844_v5  ;;  %vm1843_vm14 = vcmp.eq.f32.partialorder %v1842_v34, 8.507059e+37 }
 0xe39   :  { %v1852_v23 = vadd.f32 %v3399_v58, %v1851_v49 }
 0xe3b   :  { %v1856_v51 = vsel %vm1855_vm7, %v3399_v58, %v1852_v23  ;;  %v4951_v58 = vld [vmem:[#allocation11_spill] sm:$0xff]  ;;  %v4953_v23 = vld [vmem:[#allocation14_spill] sm:$0xff] }
 0xe3c   :  { %v3403_v17 = vpop.eup %3402  ;;  %v1861_v11 = vsel %vm1858_vm8, %v1860_v14, %v1856_v51  ;;  %v4954_v51 = vld [vmem:[#allocation16_spill] sm:$0xff] }
 0xe3d   :  { %v1834_v13 = vmul.f32 %v3403_v17, %v1831_v30  ;;  %vm1839_vm9 = vweird.f32 %v3403_v17  ;;  %v1886_v53 = vsub.f32 1.0, %v1861_v11 }
 0xe3e   :  { %vm1840_vm12 = vmor %vm1838_vm10, %vm1839_vm9 }
 0xe3f   :  { %v1835_v41 = vsub.f32 1.0, %v1834_v13 }
 0xe41   :  { %v1836_v9 = vmul.f32 %v3403_v17, %v1835_v41  ;;  %v4955_v41 = vld [vmem:[#allocation15_spill] sm:$0xff] }
 0xe43   :  { %v1837_v35 = vadd.f32 %v3403_v17, %v1836_v9 }
 0xe45   :  { %v1841_v39 = vsel %vm1840_vm12, %v3403_v17, %v1837_v35  ;;  %v4956_v35 = vld [vmem:[#allocation20_spill] sm:$0xff] }
 0xe46   :  { %v1846_v40 = vsel %vm1843_vm14, %v1845_v48, %v1841_v39  ;;  %v4957_v39 = vld [vmem:[#allocation9_spill] sm:$0xff] }
 0xe47   :  { %v1885_v18 = vsub.f32 1.0, %v1846_v40 }
 0xe7b   :  { %v1868_v43 = vpop.permute.xlu2 %1867 }
 0xe7c   :  { %v1872_v38 = vmul.f32 %v1868_v43, %v1861_v11 }
 0xe7e   :  { %1877 = vrot.lane.b32.xlu1 %v1872_v38, %s3469_s15 }
 0xe86   :  { %1899 = vrot.lane.b32.xlu1 %v1790_v21, %s3465_s13  ;;  %v4946_v21 = vld [vmem:[#allocation7_spill] sm:$0xff] }
 0xe8b   :  { %v1866_v19 = vpop.permute.xlu0 %1865 }
 0xe8c   :  { %v1871_v24 = vmul.f32 %v1866_v19, %v1846_v40 }
 0xe8e   :  { %1875 = vrot.lane.b32.xlu2 %v1871_v24, %s3469_s15 }
 0xee8   :  { %v1876_v46 = vpop.permute.xlu2 %1875 }
 0xee9   :  { %v1881_v26 = vadd.f32 %v1876_v46, %v1823_v44  ;;  %v4958_v46 = vld [vmem:[#allocation21_spill] sm:$0xff] }
 0xeeb   :  { %3404 = vtanh.f32 %v1881_v26 }
 0xef0   :  { %v1878_v12 = vpop.permute.xlu1 %1877 }
 0xef1   :  { %v3405_v45 = vpop.eup %3404  ;;  %v1882_v29 = vadd.f32 %v1878_v12, %v1824_v0 }
 0xef2   :  { %1889 = vrot.lane.b32.xlu2 %v3405_v45, %s3470_s16 }
 0xef3   :  { %3406 = vtanh.f32 %v1882_v29 }
 0xef8   :  { %v1900_v1 = vpop.permute.xlu1 %1899 }
 0xef9   :  { %v3407_v25 = vpop.eup %3406  ;;  %v1904_v50 = vmul.f32 %v1900_v1, %v1861_v11  ;;  %v3210_v11 = vld [vmem:[%s4906_s1 + $0x78] sm:$0xff] }
 0xefa   :  { %1891 = vrot.lane.b32.xlu0 %v3407_v25, %s3470_s16 }
 0xf02   :  { %1897 = vrot.lane.b32.xlu0 %v4325_v32, %s3465_s13  ;;  %v4945_v32 = vld [vmem:[#allocation4_spill] sm:$0xff] }
 0xf0a   :  { %724 = vrot.lane.b32.xlu0 %v3624_v42, %s3466_s29 }
 0xf12   :  { %788 = vrot.lane.b32.xlu0 %v3959_v55, %s3466_s29 }
 0xf1a   :  { %850 = vrot.lane.b32.xlu0 %v3661_v33, %s3466_s29 }
 0xf22   :  { %910 = vrot.lane.b32.xlu0 %v4943_v54, %s3466_s29 }
 0xf2a   :  { %912 = vrot.lane.b32.xlu0 %v4944_v52, %s3466_s29 }
 0xf4c   :  { %v1890_v28 = vpop.permute.xlu2 %1889 }
 0xf4d   :  { %v1895_v2 = vmul.f32 %v1890_v28, %v1885_v18  ;;  %v4437_v28 = vld [vmem:[%s4904_s2 + $0x48] sm:$0xff]  ;;  %v4960_v18 = vld [vmem:[#allocation12_spill] sm:$0xff] }
 0xf6c   :  { %v1892_v56 = vpop.permute.xlu0 %1891 }
 0xf6d   :  { %v1896_v16 = vmul.f32 %v1892_v56, %v1886_v53 }
 0xf6f   :  { %v1906_v20 = vadd.f32 %v1904_v50, %v1896_v16  ;;  %v4425_v16 = vld [vmem:[%s4904_s2 + $0x58] sm:$0xff] }
 0xf70   :  { %3285 = vmatpush.msra.mxu2 %v4425_v16  ;;  %2006 = vmatpush.msrb.mxu0 %v4425_v16 }
 0xf71   :  { %1911 = vrot.lane.b32.xlu1 %v1906_v20, %s3470_s16  ;;  %v4430_v20 = vld [vmem:[%s4904_s2 + $0x50] sm:$0xff] }
 0xf72   :  { %3286 = vmatpush.msra.mxu2 %v4430_v20  ;;  %2007 = vmatpush.msrb.mxu0 %v4430_v20 }
 0xf74   :  { %v1898_v31 = vpop.permute.xlu0 %1897  ;;  %3287 = vmatpush.msra.mxu2 %v4437_v28  ;;  %2008 = vmatpush.msrb.mxu0 %v4437_v28 }
 0xf75   :  { %v1903_v27 = vmul.f32 %v1898_v31, %v1846_v40 }
 0xf77   :  { %v1905_v7 = vadd.f32 %v1903_v27, %v1895_v2  ;;  %v4446_v2 = vld [vmem:[%s4904_s2 + $0x40] sm:$0xff] }
 0xf78   :  { %3288 = vmatpush.msra.mxu2 %v4446_v2  ;;  %2009 = vmatpush.msrb.mxu0 %v4446_v2 }
 0xf79   :  { %1909 = vrot.lane.b32.xlu2 %v1905_v7, %s3470_s16  ;;  %726 = vrot.lane.b32.xlu1 %v4945_v32, %s3466_s29 }
 0xf7c   :  { %v725_v37 = vpop.permute.xlu0 %724 }
 0xf7d   :  { %v730_v3 = vmul.f32 %v725_v37, %v4949_v63  ;;  %v4455_v37 = vld [vmem:[%s4904_s2 + $0x38] sm:$0xff] }
 0xf7e   :  { %3289 = vmatpush.msra.mxu2 %v4455_v37  ;;  %2010 = vmatpush.msrb.mxu0 %v4455_v37 }
 0xf81   :  { %786 = vrot.lane.b32.xlu2 %v4946_v21, %s3466_s29  ;;  %848 = vrot.lane.b32.xlu1 %v4947_v15, %s3466_s29 }
 0xf84   :  { %v789_v61 = vpop.permute.xlu0 %788 }
 0xf85   :  { %v793_v44 = vmul.f32 %v789_v61, %v4948_v36  ;;  %v4961_v36 = vld [vmem:[#allocation13_spill] sm:$0xff] }
 0xf87   :  { %950 = vrot.lane.b32.xlu0 %v793_v44, %s3468_s22 }
 0xf89   :  { %716 = vrot.lane.b32.xlu2 %v3624_v42, %s3467_s30  ;;  %944 = vrot.lane.b32.xlu1 %v730_v3, %s3468_s22 }
 0xf8c   :  { %v851_v6 = vpop.permute.xlu0 %850 }
 0xf8d   :  { %v855_v9 = vmul.f32 %v851_v6, %v4955_v41  ;;  %v4537_v41 = vld [vmem:[%s4904_s2 + $0x70] sm:$0xff] }
 0xf8f   :  { %842 = vrot.lane.b32.xlu0 %v3661_v33, %s3467_s30  ;;  %v3207_v33 = vld [vmem:[%s4906_s1 + $0x60] sm:$0xff] }
 0xf91   :  { %718 = vrot.lane.b32.xlu2 %v4945_v32, %s3467_s30 }
 0xf94   :  { %v911_v0 = vpop.permute.xlu0 %910 }
 0xf95   :  { %v916_v57 = vmul.f32 %v911_v0, %v4950_v62  ;;  %v4962_v0 = vld [vmem:[#allocation17_spill] sm:$0xff] }
 0xf97   :  { %956 = vrot.lane.b32.xlu0 %v916_v57, %s3468_s22 }
 0xf99   :  { %778 = vrot.lane.b32.xlu2 %v4946_v21, %s3467_s30  ;;  %v4463_v21 = vld [vmem:[%s4904_s2 + $0x30] sm:$0xff] }
 0xf9a   :  { %3290 = vmatpush.msra.mxu2 %v4463_v21  ;;  %2011 = vmatpush.msrb.mxu0 %v4463_v21 }
 0xf9c   :  { %v913_v38 = vpop.permute.xlu0 %912 }
 0xf9d   :  { %v917_v5 = vmul.f32 %v913_v38, %v4956_v35  ;;  %v4549_v35 = vld [vmem:[%s4904_s2 + $0x60] sm:$0xff] }
 0xfa1   :  { %780 = vrot.lane.b32.xlu2 %v3959_v55, %s3467_s30 }
 0xfd3   :  { %v1910_v42 = vpop.permute.xlu2 %1909 }
 0xfd4   :  { %1915 = vst.msk [vmem:[#allocation3] sm:$0xff] %vm488_vm11, %v1910_v42 }
 0xfdb   :  { %v787_v55 = vpop.permute.xlu2 %786 }
 0xfdc   :  { %v792_v49 = vmul.f32 %v787_v55, %v4952_v22  ;;  %v4481_v55 = vld [vmem:[%s4904_s2 + $0x28] sm:$0xff] }
 0xfdd   :  { %2012 = vmatpush.msrb.mxu0 %v4481_v55  ;;  %3291 = vmatpush.msra.mxu2 %v4481_v55 }
 0xfe3   :  { %v1912_v8 = vpop.permute.xlu1 %1911  ;;  %v717_v4 = vpop.permute.xlu2 %716 }
 0xfe4   :  { %1916 = vst.msk [vmem:[#allocation3 + $0x8] sm:$0xff] %vm488_vm11, %v1912_v8  ;;  %1965 = vmatpush.msra.mxu1 %v1912_v8  ;;  %v722_v13 = vmul.f32 %v717_v4, %v4954_v51  ;;  %v4504_v4 = vld [vmem:[%s4904_s2 + $0x90] sm:$0xff]  ;;  %v4516_v51 = vld [vmem:[%s4904_s2 + $0x80] sm:$0xff] }
 0xfe6   :  { %1966 = vmatpush.msra.mxu1 %v1910_v42 }
 0xfe8   :  { %1967 = vmatpush.msra.mxu1 %v1912_v8 }
 0xfea   :  { %1968 = vmatpush.msra.mxu1 %v1910_v42 }
 0xfeb   :  { %3211 = vmatmul.msk.f32.vlgmr.msra.gmra.mxu1 %vm488_vm11, %v3207_v33  ;;  %v727_v47 = vpop.permute.xlu1 %726  ;;  %v719_v34 = vpop.permute.xlu2 %718  ;;  %v4963_v33 = vld [vmem:[#allocation18_spill] sm:$0xff] }
 0xfec   :  { %v731_v59 = vmul.f32 %v727_v47, %v4951_v58  ;;  %v723_v48 = vmul.f32 %v719_v34, %v4957_v39  ;;  %v4566_v39 = vld [vmem:[%s4904_s2 + $0xb8] sm:$0xff] }
 0xfed   :  { %2332 = vmatpush.msrb.mxu1 %v4566_v39 }
 0xfee   :  { %946 = vrot.lane.b32.xlu1 %v731_v59, %s3468_s22 }
 0xff3   :  { %3212 = vmatmul.msk.f32.gmra.mxu1 %vm488_vm11, %v3208_v60  ;;  %v849_v30 = vpop.permute.xlu1 %848  ;;  %v779_v19 = vpop.permute.xlu2 %778  ;;  %v4488_v60 = vld [vmem:[%s4904_s2 + $0x20] sm:$0xff] }
 0xff4   :  { %v854_v17 = vmul.f32 %v849_v30, %v4953_v23  ;;  %v784_v26 = vmul.f32 %v779_v19, %v4958_v46  ;;  %2013 = vmatpush.msrb.mxu0 %v4488_v60  ;;  %3292 = vmatpush.msra.mxu2 %v4488_v60 }
 0xff6   :  { %948 = vrot.lane.b32.xlu1 %v792_v49, %s3468_s22  ;;  %952 = vrot.lane.b32.xlu2 %v854_v17, %s3468_s22  ;;  %v4499_v17 = vld [vmem:[%s4904_s2 + $0x98] sm:$0xff] }
 0xff7   :  { %2037 = vmatpush.msrb.mxu3 %v4499_v17  ;;  %2072 = vmatpush.msra.mxu0 %v4566_v39 }
 0xff9   :  { %v951_v1 = vpop.permute.xlu0 %950  ;;  %2038 = vmatpush.msrb.mxu3 %v4504_v4 }
 0xffb   :  { %3213 = vmatmul.msk.f32.gmra.mxu1 %vm488_vm11, %v3209_v10  ;;  %v945_v14 = vpop.permute.xlu1 %944  ;;  %v781_v25 = vpop.permute.xlu2 %780  ;;  %v4510_v10 = vld [vmem:[%s4904_s2 + $0x88] sm:$0xff] }
 0xffc   :  { %v981_v43 = vsel %vm974_vm15, %v722_v13, %v945_v14  ;;  %2039 = vmatpush.msrb.mxu3 %v4510_v10  ;;  %v4522_v13 = vld [vmem:[%s4904_s2 + $0x78] sm:$0xff] }
 0xffd   :  { %3151 = vmatmul.msk.f32.gmra.mxu2 %vm992_vm0, %v981_v43 }
 0xffe   :  { %840 = vrot.lane.b32.xlu1 %v4947_v15, %s3467_s30  ;;  %902 = vrot.lane.b32.xlu2 %v4943_v54, %s3467_s30  ;;  %v4959_v54 = vld [vmem:[#allocation22_spill] sm:$0xff] }
 0xfff   :  { %2040 = vmatpush.msrb.mxu3 %v4516_v51 }
0x1001   :  { %v843_v15 = vpop.permute.xlu0 %842  ;;  %2041 = vmatpush.msrb.mxu3 %v4522_v13 }
0x1002   :  { %v847_v44 = vmul.f32 %v843_v15, %v4961_v36 }
0x1003   :  { %3214 = vmatmul.msk.f32.gmra.mxu1 %vm488_vm11, %v3210_v11  ;;  %2042 = vmatpush.msrb.mxu3 %v4537_v41 }
0x1006   :  { %954 = vrot.lane.b32.xlu1 %v855_v9, %s3468_s22  ;;  %958 = vrot.lane.b32.xlu2 %v917_v5, %s3468_s22  ;;  %v4543_v9 = vld [vmem:[%s4904_s2 + $0x68] sm:$0xff] }
0x1007   :  { %2043 = vmatpush.msrb.mxu3 %v4543_v9 }
0x1009   :  { %v957_v57 = vpop.permute.xlu0 %956  ;;  %2044 = vmatpush.msrb.mxu3 %v4549_v35 }
0x100b   :  { %2266 = vmatpush.msra.mxu3 %v4425_v16 }
0x100d   :  { %2267 = vmatpush.msra.mxu3 %v4430_v20 }
0x100e   :  { %904 = vrot.lane.b32.xlu1 %v4944_v52, %s3467_s30  ;;  %v785_v52 = vmul.f32 %v781_v25, %v4959_v54  ;;  %v4594_v54 = vld [vmem:[%s4904_s2 + $0xa8] sm:$0xff] }
0x100f   :  { %2268 = vmatpush.msra.mxu3 %v4437_v28 }
0x1010   :  { %v984_v56 = vsel %vm974_vm15, %v785_v52, %v951_v1  ;;  %v4600_v52 = vld [vmem:[%s4904_s2 + $0xa0] sm:$0xff] }
0x1011   :  { %2269 = vmatpush.msra.mxu3 %v4446_v2 }
0x1013   :  { %2270 = vmatpush.msra.mxu3 %v4455_v37 }
0x1015   :  { %2271 = vmatpush.msra.mxu3 %v4463_v21 }
0x1017   :  { %2272 = vmatpush.msra.mxu3 %v4481_v55 }
0x1019   :  { %2273 = vmatpush.msra.mxu3 %v4488_v60 }
0x1050   :  { %v953_v27 = vpop.permute.xlu2 %952 }
0x1058   :  { %v903_v6 = vpop.permute.xlu2 %902 }
0x1059   :  { %v908_v62 = vmul.f32 %v903_v6, %v4962_v0 }
0x105b   :  { %v987_v42 = vsel %vm974_vm15, %v908_v62, %v957_v57 }
0x1060   :  { %v947_v40 = vpop.permute.xlu1 %946  ;;  %v959_v58 = vpop.permute.xlu2 %958 }
0x1061   :  { %v982_v24 = vsel %vm974_vm15, %v723_v48, %v947_v40  ;;  %v4571_v48 = vld [vmem:[%s4904_s2 + $0xb0] sm:$0xff] }
0x1062   :  { %3152 = vmatmul.msk.f32.gmra.mxu2 %vm992_vm0, %v982_v24  ;;  %2073 = vmatpush.msra.mxu0 %v4571_v48  ;;  %v4583_v24 = vld [vmem:[%s4904_s2 + $0xea] ss:$0 sm:$0xff] }
0x1063   :  { %2333 = vmatpush.msrb.mxu1 %v4571_v48 }
0x1064   :  { %2074 = vmatpush.msra.mxu0 %v4594_v54 }
0x1065   :  { %2334 = vmatpush.msrb.mxu1 %v4594_v54 }
0x1066   :  { %2075 = vmatpush.msra.mxu0 %v4600_v52 }
0x1067   :  { %2335 = vmatpush.msrb.mxu1 %v4600_v52 }
0x1068   :  { %v1970_v12 = vpop.f32.mrf.mxu1  ;;  %v949_v45 = vpop.permute.xlu1 %948 }
0x1069   :  { %v983_v29 = vsel %vm974_vm15, %v784_v26, %v949_v45  ;;  %2557 = vmatpush.msra.mxu1 %v4499_v17 }
0x106a   :  { %3153 = vmatmul.msk.f32.gmra.mxu2 %vm992_vm0, %v983_v29 }
0x106b   :  { %2558 = vmatpush.msra.mxu1 %v4504_v4 }
0x106d   :  { %2559 = vmatpush.msra.mxu1 %v4510_v10 }
0x106f   :  { %2560 = vmatpush.msra.mxu1 %v4516_v51 }
0x1070   :  { %v1973_v53 = vpop.f32.mrf.mxu1  ;;  %v841_v50 = vpop.permute.xlu1 %840 }
0x1071   :  { %v846_v31 = vmul.f32 %v841_v50, %v4960_v18  ;;  %2561 = vmatpush.msra.mxu1 %v4522_v13 }
0x1072   :  { %3154 = vmatmul.msk.f32.gmra.mxu2 %vm992_vm0, %v984_v56 }
0x1073   :  { %v985_v32 = vsel %vm974_vm15, %v846_v31, %v953_v27  ;;  %2562 = vmatpush.msra.mxu1 %v4537_v41  ;;  %v4644_v31 = vld [vmem:[%s4904_s2 + $0xec] ss:$0 sm:$0xff] }
0x1075   :  { %2563 = vmatpush.msra.mxu1 %v4543_v9 }
0x1077   :  { %2564 = vmatpush.msra.mxu1 %v4549_v35 }
0x1078   :  { %v1976_v7 = vpop.f32.mrf.mxu1  ;;  %v955_v61 = vpop.permute.xlu1 %954 }
0x1079   :  { %1984 = vrot.lane.b32.xlu0 %v1976_v7, %s3465_s13  ;;  %v986_v3 = vsel %vm974_vm15, %v847_v44, %v955_v61 }
0x107a   :  { %3155 = vmatmul.msk.f32.gmra.mxu2 %vm992_vm0, %v985_v32 }
0x1080   :  { %v1979_v63 = vpop.f32.mrf.mxu1  ;;  %v905_v8 = vpop.permute.xlu1 %904 }
0x1081   :  { %1986 = vrot.lane.b32.xlu1 %v1979_v63, %s3465_s13  ;;  %v909_v47 = vmul.f32 %v905_v8, %v4963_v33  ;;  %v4526_v14 = vpop.f32.mrf.mxu2 }
0x1082   :  { %3156 = vmatmul.msk.f32.gmra.mxu2 %vm992_vm0, %v986_v3  ;;  %v1075_v27 = vadd.f32 %v4644_v31, %v4526_v14 }
0x1083   :  { %v988_v59 = vsel %vm974_vm15, %v909_v47, %v959_v58 }
0x108a   :  { %3157 = vmatmul.msk.f32.gmra.mxu2 %vm992_vm0, %v987_v42 }
0x1092   :  { %3158 = vmatmul.msk.f32.gmra.mxu2 %vm992_vm0, %v988_v59 }
0x10e5   :  { %v4528_v43 = vpop.f32.mrf.mxu2 }
0x10e6   :  { %v1078_v15 = vadd.f32 %v4644_v31, %v4528_v43 }
0x10eb   :  { %v1985_v30 = vpop.permute.xlu0 %1984 }
0x10ec   :  { %v1990_v22 = vsel %vm488_vm11, %v1970_v12, %v1985_v30 }
0x10ed   :  { %3215 = vmatmul.msk.f32.vlgmr.msrb.gmra.mxu0 %vm1255_vm13, %v1990_v22  ;;  %v4530_v11 = vpop.f32.mrf.mxu2 }
0x10ee   :  { %2297 = vmatpush.msrb.mxu0 %v4499_v17 }
0x10f0   :  { %2298 = vmatpush.msrb.mxu0 %v4504_v4 }
0x10f2   :  { %2299 = vmatpush.msrb.mxu0 %v4510_v10 }
0x10f3   :  { %v1987_v49 = vpop.permute.xlu1 %1986 }
0x10f4   :  { %v1991_v23 = vsel %vm488_vm11, %v1973_v53, %v1987_v49  ;;  %2300 = vmatpush.msrb.mxu0 %v4516_v51  ;;  %v4624_v53 = vld [vmem:[%s4904_s2 + $0xeb] ss:$0 sm:$0xff] }
0x10f5   :  { %3216 = vmatmul.msk.f32.vlgmr.msra.gmra.mxu2 %vm1255_vm13, %v1991_v23  ;;  %v4532_v38 = vpop.f32.mrf.mxu2 }
0x10f6   :  { %2301 = vmatpush.msrb.mxu0 %v4522_v13 }
0x10f8   :  { %2302 = vmatpush.msrb.mxu0 %v4537_v41 }
0x10fa   :  { %2303 = vmatpush.msrb.mxu0 %v4543_v9 }
0x10fc   :  { %2304 = vmatpush.msrb.mxu0 %v4549_v35 }
0x10fd   :  { %v4553_v5 = vpop.f32.mrf.mxu2 }
0x1105   :  { %v4560_v34 = vpop.f32.mrf.mxu2 }
0x110d   :  { %v4578_v19 = vpop.f32.mrf.mxu2 }
0x1115   :  { %v4587_v12 = vpop.f32.mrf.mxu2 }
0x116a   :  { %v2015_v40 = vpop.f32.mrf.mxu0 }
0x116b   :  { %v2016_v46 = vadd.f32 %v4583_v24, %v2015_v40 }
0x116d   :  { %v2021_v26 = vmax.f32 %v2016_v46, 0.0 }
0x116f   :  { %3217 = vmatmul.msk.f32.vlgmr.msrb.gmra.mxu3 %vm1255_vm13, %v2021_v26 }
0x1178   :  { %v2018_v45 = vpop.f32.mrf.mxu2 }
0x1179   :  { %v2019_v29 = vadd.f32 %v4583_v24, %v2018_v45 }
0x117b   :  { %v2022_v25 = vmax.f32 %v2019_v29, 0.0 }
0x117d   :  { %3218 = vmatmul.msk.f32.gmra.mxu3 %vm1255_vm13, %v2022_v25 }
0x11f2   :  { %v2046_v1 = vpop.f32.mrf.mxu3 }
0x11f3   :  { %v4627_v56 = vadd.f32 %v4624_v53, %v2046_v1 }
0x11f5   :  { %3219 = vmatmul.msk.f32.vlgmr.msra.gmra.mxu0 %vm488_vm11, %v4627_v56 }
0x11f6   :  { %2526 = vmatpush.msra.mxu0 %v4425_v16 }
0x11f8   :  { %2527 = vmatpush.msra.mxu0 %v4430_v20 }
0x11fa   :  { %2528 = vmatpush.msra.mxu0 %v4437_v28 }
0x11fc   :  { %2529 = vmatpush.msra.mxu0 %v4446_v2 }
0x11fe   :  { %2530 = vmatpush.msra.mxu0 %v4455_v37 }
0x1200   :  { %v2049_v50 = vpop.f32.mrf.mxu3  ;;  %2531 = vmatpush.msra.mxu0 %v4463_v21 }
0x1201   :  { %v2050_v18 = vadd.f32 %v4624_v53, %v2049_v50 }
0x1202   :  { %2532 = vmatpush.msra.mxu0 %v4481_v55 }
0x1203   :  { %3220 = vmatmul.msk.f32.gmra.mxu0 %vm488_vm11, %v2050_v18 }
0x1204   :  { %2533 = vmatpush.msra.mxu0 %v4488_v60 }
0x1272   :  { %v2077_v7 = vpop.f32.mrf.mxu0 }
0x1273   :  { %v2083_v32 = vadd.f32 %v2077_v7, %v1075_v27 }
0x1275   :  { %2125 = vrot.lane.b32.xlu0 %v2083_v32, %s3465_s13  ;;  %v3221_v3 = vmul.f32 -1.442695, %v2083_v32 }
0x1280   :  { %v2080_v61 = vpop.f32.mrf.mxu0 }
0x1281   :  { %v2084_v36 = vadd.f32 %v2080_v61, %v1078_v15 }
0x1283   :  { %2127 = vrot.lane.b32.xlu2 %v2084_v36, %s3465_s13  ;;  %v3222_v44 = vmul.f32 -1.442695, %v2084_v36 }
0x1285   :  { %3408 = vpow2.f32 %v3222_v44 }
0x1286   :  { %3410 = vpow2.f32 %v3221_v3 }
0x128b   :  { %v3409_v63 = vpop.eup %3408 }
0x128c   :  { %v2092_v6 = vadd.f32 1.0, %v3409_v63  ;;  %v3411_v0 = vpop.eup %3410 }
0x128d   :  { %v2091_v57 = vadd.f32 1.0, %v3411_v0 }
0x128e   :  { %3412 = vrcp.f32 %v2092_v6  ;;  %v2119_v30 = vand.u32 2147483648, %v2092_v6  ;;  %vm2113_vm0 = vweird.f32 %v2092_v6  ;;  %v2117_v22 = vand.u32 2147483647, %v2092_v6 }
0x128f   :  { %3414 = vrcp.f32 %v2091_v57  ;;  %v2104_v29 = vand.u32 2147483648, %v2091_v57  ;;  %vm2098_vm4 = vweird.f32 %v2091_v57  ;;  %v2102_v25 = vand.u32 2147483647, %v2091_v57 }
0x1290   :  { %v2120_v14 = vor.u32 1.1754944e-38, %v2119_v30  ;;  %vm2118_vm2 = vcmp.eq.f32.partialorder %v2117_v22, 8.507059e+37 }
0x1291   :  { %v2105_v50 = vor.u32 1.1754944e-38, %v2104_v29  ;;  %vm2103_vm6 = vcmp.eq.f32.partialorder %v2102_v25, 8.507059e+37 }
0x1294   :  { %v3413_v62 = vpop.eup %3412 }
0x1295   :  { %v2109_v42 = vmul.f32 %v3413_v62, %v2092_v6  ;;  %v3415_v33 = vpop.eup %3414  ;;  %vm2114_vm15 = vweird.f32 %v3413_v62 }
0x1296   :  { %v2094_v58 = vmul.f32 %v3415_v33, %v2091_v57  ;;  %vm2115_vm1 = vmor %vm2113_vm0, %vm2114_vm15  ;;  %vm2099_vm3 = vweird.f32 %v3415_v33 }
0x1297   :  { %v2110_v8 = vsub.f32 1.0, %v2109_v42  ;;  %vm2100_vm5 = vmor %vm2098_vm4, %vm2099_vm3 }
0x1298   :  { %v2095_v49 = vsub.f32 1.0, %v2094_v58 }
0x1299   :  { %v2111_v47 = vmul.f32 %v3413_v62, %v2110_v8 }
0x129a   :  { %v2096_v43 = vmul.f32 %v3415_v33, %v2095_v49  ;;  %v3223_v49 = vld [vmem:[%s4906_s1 + $0x80] sm:$0xff] }
0x129b   :  { %v2112_v59 = vadd.f32 %v3413_v62, %v2111_v47 }
0x129c   :  { %v2097_v45 = vadd.f32 %v3415_v33, %v2096_v43 }
0x129d   :  { %v2116_v23 = vsel %vm2115_vm1, %v3413_v62, %v2112_v59 }
0x129e   :  { %v2121_v46 = vsel %vm2118_vm2, %v2120_v14, %v2116_v23  ;;  %v2101_v1 = vsel %vm2100_vm5, %v3415_v33, %v2097_v45  ;;  %v3224_v23 = vld [vmem:[%s4906_s1 + $0x88] sm:$0xff]  ;;  %v3225_v14 = vld [vmem:[%s4906_s1 + $0x90] sm:$0xff] }
0x129f   :  { %v2106_v7 = vsel %vm2103_vm6, %v2105_v50, %v2101_v1  ;;  %v2146_v57 = vsub.f32 1.0, %v2121_v46 }
0x12a0   :  { %v2145_v47 = vsub.f32 1.0, %v2106_v7 }
0x12dd   :  { %v2128_v40 = vpop.permute.xlu2 %2127 }
0x12de   :  { %v2132_v26 = vmul.f32 %v2128_v40, %v2121_v46 }
0x12e0   :  { %2137 = vrot.lane.b32.xlu1 %v2132_v26, %s3469_s15 }
0x12e7   :  { %v2126_v27 = vpop.permute.xlu0 %2125 }
0x12e8   :  { %v2131_v15 = vmul.f32 %v2126_v27, %v2106_v7  ;;  %2159 = vrot.lane.b32.xlu1 %v2050_v18, %s3465_s13 }
0x12ea   :  { %2135 = vrot.lane.b32.xlu2 %v2131_v15, %s3469_s15 }
0x1344   :  { %v2136_v61 = vpop.permute.xlu2 %2135 }
0x1345   :  { %v2141_v44 = vadd.f32 %v2136_v61, %v2083_v32 }
0x1347   :  { %3416 = vtanh.f32 %v2141_v44 }
0x134d   :  { %v3417_v63 = vpop.eup %3416 }
0x134e   :  { %2149 = vrot.lane.b32.xlu2 %v3417_v63, %s3470_s16 }
0x1352   :  { %v2138_v3 = vpop.permute.xlu1 %2137 }
0x1353   :  { %v2142_v6 = vadd.f32 %v2138_v3, %v2084_v36 }
0x1355   :  { %3418 = vtanh.f32 %v2142_v6 }
0x135a   :  { %v2160_v62 = vpop.permute.xlu1 %2159 }
0x135b   :  { %v3419_v0 = vpop.eup %3418  ;;  %v2164_v42 = vmul.f32 %v2160_v62, %v2121_v46 }
0x135c   :  { %2151 = vrot.lane.b32.xlu0 %v3419_v0, %s3470_s16 }
0x1364   :  { %2157 = vrot.lane.b32.xlu0 %v4627_v56, %s3465_s13 }
0x13a8   :  { %v2150_v32 = vpop.permute.xlu2 %2149 }
0x13a9   :  { %v2155_v59 = vmul.f32 %v2150_v32, %v2145_v47 }
0x13ce   :  { %v2152_v18 = vpop.permute.xlu0 %2151 }
0x13cf   :  { %v2156_v8 = vmul.f32 %v2152_v18, %v2146_v57 }
0x13d1   :  { %v2166_v33 = vadd.f32 %v2164_v42, %v2156_v8 }
0x13d3   :  { %2171 = vrot.lane.b32.xlu1 %v2166_v33, %s3470_s16 }
0x13d6   :  { %v2158_v58 = vpop.permute.xlu0 %2157 }
0x13d7   :  { %v2163_v36 = vmul.f32 %v2158_v58, %v2106_v7 }
0x13d9   :  { %v2165_v30 = vadd.f32 %v2163_v36, %v2155_v59 }
0x13db   :  { %2169 = vrot.lane.b32.xlu2 %v2165_v30, %s3470_s16 }
0x1435   :  { %v2170_v22 = vpop.permute.xlu2 %2169 }
0x1436   :  { %2175 = vst.msk [vmem:[#allocation3 + $0x10] sm:$0xff] %vm488_vm11, %v2170_v22 }
0x1445   :  { %v2172_v56 = vpop.permute.xlu1 %2171 }
0x1446   :  { %2176 = vst.msk [vmem:[#allocation3 + $0x18] sm:$0xff] %vm488_vm11, %v2172_v56  ;;  %2225 = vmatpush.msrb.mxu2 %v2172_v56 }
0x1448   :  { %2226 = vmatpush.msrb.mxu2 %v2170_v22 }
0x144a   :  { %2227 = vmatpush.msrb.mxu2 %v2172_v56 }
0x144c   :  { %2228 = vmatpush.msrb.mxu2 %v2170_v22 }
0x144d   :  { %3227 = vmatmul.msk.f32.vlgmr.msrb.gmra.mxu2 %vm488_vm11, %v3223_v49 }
0x144e   :  { %2592 = vmatpush.msra.mxu2 %v4566_v39 }
0x1450   :  { %2593 = vmatpush.msra.mxu2 %v4571_v48 }
0x1452   :  { %2594 = vmatpush.msra.mxu2 %v4594_v54 }
0x1454   :  { %2595 = vmatpush.msra.mxu2 %v4600_v52 }
0x1455   :  { %3228 = vmatmul.msk.f32.gmra.mxu2 %vm488_vm11, %v3224_v23 }
0x1456   :  { %2817 = vmatpush.msrb.mxu2 %v4499_v17  ;;  %v3226_v17 = vld [vmem:[%s4906_s1 + $0x98] sm:$0xff] }
0x1458   :  { %2818 = vmatpush.msrb.mxu2 %v4504_v4 }
0x145a   :  { %2819 = vmatpush.msrb.mxu2 %v4510_v10 }
0x145c   :  { %2820 = vmatpush.msrb.mxu2 %v4516_v51 }
0x145d   :  { %3229 = vmatmul.msk.f32.gmra.mxu2 %vm488_vm11, %v3225_v14 }
0x145e   :  { %2821 = vmatpush.msrb.mxu2 %v4522_v13 }
0x1460   :  { %2822 = vmatpush.msrb.mxu2 %v4537_v41 }
0x1462   :  { %2823 = vmatpush.msrb.mxu2 %v4543_v9 }
0x1464   :  { %2824 = vmatpush.msrb.mxu2 %v4549_v35 }
0x1465   :  { %3230 = vmatmul.msk.f32.gmra.mxu2 %vm488_vm11, %v3226_v17 }
0x14d0   :  { %v2230_v4 = vpop.f32.mrf.mxu2 }
0x14d8   :  { %v2233_v10 = vpop.f32.mrf.mxu2 }
0x14e0   :  { %v2236_v43 = vpop.f32.mrf.mxu2 }
0x14e1   :  { %2244 = vrot.lane.b32.xlu0 %v2236_v43, %s3465_s13 }
0x14e8   :  { %v2239_v51 = vpop.f32.mrf.mxu2 }
0x14e9   :  { %2246 = vrot.lane.b32.xlu1 %v2239_v51, %s3465_s13 }
0x1553   :  { %v2245_v13 = vpop.permute.xlu0 %2244 }
0x1554   :  { %v2250_v41 = vsel %vm488_vm11, %v2230_v4, %v2245_v13 }
0x1555   :  { %3231 = vmatmul.msk.f32.vlgmr.msra.gmra.mxu3 %vm1255_vm13, %v2250_v41 }
0x155b   :  { %v2247_v40 = vpop.permute.xlu1 %2246 }
0x155c   :  { %v2251_v9 = vsel %vm488_vm11, %v2233_v10, %v2247_v40 }
0x155d   :  { %3232 = vmatmul.msk.f32.gmra.mxu3 %vm1255_vm13, %v2251_v9 }
0x15d8   :  { %v2275_v35 = vpop.f32.mrf.mxu3 }
0x15d9   :  { %v2276_v46 = vadd.f32 %v4583_v24, %v2275_v35 }
0x15db   :  { %v2281_v26 = vmax.f32 %v2276_v46, 0.0 }
0x15dd   :  { %3233 = vmatmul.msk.f32.vlgmr.msrb.gmra.mxu0 %vm1255_vm13, %v2281_v26 }
0x15e0   :  { %v2278_v45 = vpop.f32.mrf.mxu3 }
0x15e1   :  { %v2279_v29 = vadd.f32 %v4583_v24, %v2278_v45 }
0x15e3   :  { %v2282_v25 = vmax.f32 %v2279_v29, 0.0 }
0x15e5   :  { %3234 = vmatmul.msk.f32.gmra.mxu0 %vm1255_vm13, %v2282_v25 }
0x165a   :  { %v2306_v1 = vpop.f32.mrf.mxu0 }
0x165b   :  { %v4702_v50 = vadd.f32 %v4624_v53, %v2306_v1 }
0x165d   :  { %3235 = vmatmul.msk.f32.vlgmr.msrb.gmra.mxu1 %vm488_vm11, %v4702_v50 }
0x165e   :  { %2786 = vmatpush.msrb.mxu1 %v4425_v16  ;;  %v1081_v16 = vadd.f32 %v4644_v31, %v4530_v11 }
0x1660   :  { %2787 = vmatpush.msrb.mxu1 %v4430_v20 }
0x1662   :  { %v2309_v27 = vpop.f32.mrf.mxu0  ;;  %2788 = vmatpush.msrb.mxu1 %v4437_v28  ;;  %v1084_v28 = vadd.f32 %v4644_v31, %v4532_v38 }
0x1663   :  { %v2310_v7 = vadd.f32 %v4624_v53, %v2309_v27 }
0x1664   :  { %2789 = vmatpush.msrb.mxu1 %v4446_v2 }
0x1665   :  { %3236 = vmatmul.msk.f32.gmra.mxu1 %vm488_vm11, %v2310_v7 }
0x1666   :  { %2790 = vmatpush.msrb.mxu1 %v4455_v37 }
0x1668   :  { %2791 = vmatpush.msrb.mxu1 %v4463_v21 }
0x166a   :  { %2792 = vmatpush.msrb.mxu1 %v4481_v55 }
0x166c   :  { %2793 = vmatpush.msrb.mxu1 %v4488_v60 }
0x16da   :  { %v2337_v20 = vpop.f32.mrf.mxu1 }
0x16db   :  { %v2343_v15 = vadd.f32 %v2337_v20, %v1081_v16 }
0x16dd   :  { %2385 = vrot.lane.b32.xlu0 %v2343_v15, %s3465_s13  ;;  %v3237_v44 = vmul.f32 -1.442695, %v2343_v15 }
0x16e2   :  { %v2340_v2 = vpop.f32.mrf.mxu1 }
0x16e3   :  { %v2344_v61 = vadd.f32 %v2340_v2, %v1084_v28  ;;  %v3239_v28 = vld [vmem:[%s4906_s1 + $0xa0] sm:$0xff]  ;;  %v3240_v2 = vld [vmem:[%s4906_s1 + $0xa8] sm:$0xff] }
0x16e5   :  { %2387 = vrot.lane.b32.xlu2 %v2344_v61, %s3465_s13  ;;  %v3238_v37 = vmul.f32 -1.442695, %v2344_v61 }
0x16e7   :  { %3420 = vpow2.f32 %v3238_v37 }
0x16ed   :  { %v3421_v21 = vpop.eup %3420 }
0x16ee   :  { %v2352_v55 = vadd.f32 1.0, %v3421_v21 }
0x16f0   :  { %3422 = vrcp.f32 %v2352_v55  ;;  %v2379_v57 = vand.u32 2147483648, %v2352_v55  ;;  %vm2373_vm8 = vweird.f32 %v2352_v55  ;;  %v2377_v18 = vand.u32 2147483647, %v2352_v55 }
0x16f1   :  { %3424 = vpow2.f32 %v3237_v44 }
0x16f2   :  { %v2380_v33 = vor.u32 1.1754944e-38, %v2379_v57  ;;  %vm2378_vm10 = vcmp.eq.f32.partialorder %v2377_v18, 8.507059e+37 }
0x16f6   :  { %v3423_v60 = vpop.eup %3422 }
0x16f7   :  { %v3425_v11 = vpop.eup %3424  ;;  %v2369_v63 = vmul.f32 %v3423_v60, %v2352_v55  ;;  %vm2374_vm7 = vweird.f32 %v3423_v60 }
0x16f8   :  { %v2351_v3 = vadd.f32 1.0, %v3425_v11  ;;  %vm2375_vm9 = vmor %vm2373_vm8, %vm2374_vm7 }
0x16f9   :  { %v2370_v6 = vsub.f32 1.0, %v2369_v63 }
0x16fa   :  { %3426 = vrcp.f32 %v2351_v3  ;;  %v2364_v22 = vand.u32 2147483648, %v2351_v3  ;;  %vm2358_vm14 = vweird.f32 %v2351_v3  ;;  %v2362_v56 = vand.u32 2147483647, %v2351_v3 }
0x16fb   :  { %v2371_v0 = vmul.f32 %v3423_v60, %v2370_v6 }
0x16fc   :  { %v2365_v23 = vor.u32 1.1754944e-38, %v2364_v22  ;;  %vm2363_vm0 = vcmp.eq.f32.partialorder %v2362_v56, 8.507059e+37 }
0x16fd   :  { %v2372_v62 = vadd.f32 %v3423_v60, %v2371_v0 }
0x16ff   :  { %v2376_v42 = vsel %vm2375_vm9, %v3423_v60, %v2372_v62 }
0x1700   :  { %v3427_v38 = vpop.eup %3426  ;;  %v2381_v47 = vsel %vm2378_vm10, %v2380_v33, %v2376_v42 }
0x1701   :  { %v2354_v8 = vmul.f32 %v3427_v38, %v2351_v3  ;;  %vm2359_vm12 = vweird.f32 %v3427_v38  ;;  %v2406_v35 = vsub.f32 1.0, %v2381_v47 }
0x1702   :  { %vm2360_vm15 = vmor %vm2358_vm14, %vm2359_vm12 }
0x1703   :  { %v2355_v59 = vsub.f32 1.0, %v2354_v8  ;;  %v1087_v8 = vadd.f32 %v4644_v31, %v4553_v5 }
0x1705   :  { %v2356_v36 = vmul.f32 %v3427_v38, %v2355_v59 }
0x1707   :  { %v2357_v30 = vadd.f32 %v3427_v38, %v2356_v36 }
0x1709   :  { %v2361_v49 = vsel %vm2360_vm15, %v3427_v38, %v2357_v30 }
0x170a   :  { %v2366_v17 = vsel %vm2363_vm0, %v2365_v23, %v2361_v49 }
0x170b   :  { %v2405_v1 = vsub.f32 1.0, %v2366_v17 }
0x173f   :  { %v2388_v32 = vpop.permute.xlu2 %2387 }
0x1740   :  { %v2392_v58 = vmul.f32 %v2388_v32, %v2381_v47 }
0x1742   :  { %2397 = vrot.lane.b32.xlu1 %v2392_v58, %s3469_s15 }
0x174a   :  { %2419 = vrot.lane.b32.xlu1 %v2310_v7, %s3465_s13 }
0x174f   :  { %v2386_v14 = vpop.permute.xlu0 %2385 }
0x1750   :  { %v2391_v4 = vmul.f32 %v2386_v14, %v2366_v17 }
0x1752   :  { %2395 = vrot.lane.b32.xlu2 %v2391_v4, %s3469_s15 }
0x17ac   :  { %v2396_v10 = vpop.permute.xlu2 %2395 }
0x17ad   :  { %v2401_v43 = vadd.f32 %v2396_v10, %v2343_v15 }
0x17af   :  { %3428 = vtanh.f32 %v2401_v43 }
0x17b4   :  { %v2398_v51 = vpop.permute.xlu1 %2397 }
0x17b5   :  { %v3429_v13 = vpop.eup %3428  ;;  %v2402_v41 = vadd.f32 %v2398_v51, %v2344_v61  ;;  %v3241_v61 = vld [vmem:[%s4906_s1 + $0xb0] sm:$0xff] }
0x17b6   :  { %2409 = vrot.lane.b32.xlu2 %v3429_v13, %s3470_s16 }
0x17b7   :  { %3430 = vtanh.f32 %v2402_v41 }
0x17bc   :  { %v2420_v9 = vpop.permute.xlu1 %2419 }
0x17bd   :  { %v3431_v40 = vpop.eup %3430  ;;  %v2424_v26 = vmul.f32 %v2420_v9, %v2381_v47  ;;  %v1090_v47 = vadd.f32 %v4644_v31, %v4560_v34 }
0x17be   :  { %2411 = vrot.lane.b32.xlu0 %v3431_v40, %s3470_s16 }
0x17c6   :  { %2417 = vrot.lane.b32.xlu0 %v4702_v50, %s3465_s13 }
0x1810   :  { %v2410_v25 = vpop.permute.xlu2 %2409 }
0x1811   :  { %v2415_v7 = vmul.f32 %v2410_v25, %v2405_v1 }
0x1830   :  { %v2412_v46 = vpop.permute.xlu0 %2411 }
0x1831   :  { %v2416_v45 = vmul.f32 %v2412_v46, %v2406_v35 }
0x1833   :  { %v2426_v29 = vadd.f32 %v2424_v26, %v2416_v45 }
0x1835   :  { %2431 = vrot.lane.b32.xlu1 %v2426_v29, %s3470_s16 }
0x1838   :  { %v2418_v27 = vpop.permute.xlu0 %2417 }
0x1839   :  { %v2423_v16 = vmul.f32 %v2418_v27, %v2366_v17 }
0x183b   :  { %v2425_v20 = vadd.f32 %v2423_v16, %v2415_v7 }
0x183d   :  { %2429 = vrot.lane.b32.xlu2 %v2425_v20, %s3470_s16 }
0x1897   :  { %v2430_v15 = vpop.permute.xlu2 %2429 }
0x1898   :  { %2435 = vst.msk [vmem:[#allocation3 + $0x20] sm:$0xff] %vm488_vm11, %v2430_v15 }
0x18a7   :  { %v2432_v50 = vpop.permute.xlu1 %2431 }
0x18a8   :  { %2436 = vst.msk [vmem:[#allocation3 + $0x28] sm:$0xff] %vm488_vm11, %v2432_v50  ;;  %2485 = vmatpush.msrb.mxu3 %v2432_v50 }
0x18aa   :  { %2486 = vmatpush.msrb.mxu3 %v2430_v15 }
0x18ac   :  { %2487 = vmatpush.msrb.mxu3 %v2432_v50 }
0x18ae   :  { %2488 = vmatpush.msrb.mxu3 %v2430_v15 }
0x18af   :  { %3243 = vmatmul.msk.f32.vlgmr.msrb.gmra.mxu3 %vm488_vm11, %v3239_v28 }
0x18b0   :  { %2852 = vmatpush.msra.mxu3 %v4566_v39  ;;  %v3242_v39 = vld [vmem:[%s4906_s1 + $0xb8] sm:$0xff] }
0x18b2   :  { %2853 = vmatpush.msra.mxu3 %v4571_v48 }
0x18b4   :  { %2854 = vmatpush.msra.mxu3 %v4594_v54 }
0x18b6   :  { %2855 = vmatpush.msra.mxu3 %v4600_v52 }
0x18b7   :  { %3244 = vmatmul.msk.f32.gmra.mxu3 %vm488_vm11, %v3240_v2 }
0x18bf   :  { %3245 = vmatmul.msk.f32.gmra.mxu3 %vm488_vm11, %v3241_v61 }
0x18c7   :  { %3246 = vmatmul.msk.f32.gmra.mxu3 %vm488_vm11, %v3242_v39 }
0x1932   :  { %v2490_v48 = vpop.f32.mrf.mxu3 }
0x193a   :  { %v2493_v37 = vpop.f32.mrf.mxu3 }
0x1942   :  { %v2496_v21 = vpop.f32.mrf.mxu3 }
0x1943   :  { %2504 = vrot.lane.b32.xlu0 %v2496_v21, %s3465_s13 }
0x194a   :  { %v2499_v54 = vpop.f32.mrf.mxu3 }
0x194b   :  { %2506 = vrot.lane.b32.xlu1 %v2499_v54, %s3465_s13 }
0x19b5   :  { %v2505_v52 = vpop.permute.xlu0 %2504 }
0x19b6   :  { %v2510_v55 = vsel %vm488_vm11, %v2490_v48, %v2505_v52 }
0x19b7   :  { %3247 = vmatmul.msk.f32.vlgmr.msra.gmra.mxu0 %vm1255_vm13, %v2510_v55 }
0x19bd   :  { %v2507_v44 = vpop.permute.xlu1 %2506 }
0x19be   :  { %v2511_v60 = vsel %vm488_vm11, %v2493_v37, %v2507_v44 }
0x19bf   :  { %3248 = vmatmul.msk.f32.gmra.mxu0 %vm1255_vm13, %v2511_v60 }
0x1a34   :  { %v2535_v11 = vpop.f32.mrf.mxu0 }
0x1a35   :  { %v2536_v63 = vadd.f32 %v4583_v24, %v2535_v11 }
0x1a37   :  { %v2541_v3 = vmax.f32 %v2536_v63, 0.0 }
0x1a39   :  { %3249 = vmatmul.msk.f32.vlgmr.msra.gmra.mxu1 %vm1255_vm13, %v2541_v3 }
0x1a3c   :  { %v2538_v6 = vpop.f32.mrf.mxu0 }
0x1a3d   :  { %v2539_v0 = vadd.f32 %v4583_v24, %v2538_v6 }
0x1a3f   :  { %v2542_v62 = vmax.f32 %v2539_v0, 0.0 }
0x1a41   :  { %3250 = vmatmul.msk.f32.gmra.mxu1 %vm1255_vm13, %v2542_v62 }
0x1ab6   :  { %v2566_v38 = vpop.f32.mrf.mxu1 }
0x1ab7   :  { %v4764_v57 = vadd.f32 %v4624_v53, %v2566_v38 }
0x1ab9   :  { %3251 = vmatmul.msk.f32.vlgmr.msra.gmra.mxu2 %vm488_vm11, %v4764_v57 }
0x1abe   :  { %v2569_v18 = vpop.f32.mrf.mxu1 }
0x1abf   :  { %v2570_v42 = vadd.f32 %v4624_v53, %v2569_v18  ;;  %v3256_v18 = vld [vmem:[%s4906_s1 + $0xc8] sm:$0xff] }
0x1ac1   :  { %3252 = vmatmul.msk.f32.gmra.mxu2 %vm488_vm11, %v2570_v42 }
0x1b3c   :  { %v2597_v33 = vpop.f32.mrf.mxu2 }
0x1b3d   :  { %v2603_v32 = vadd.f32 %v2597_v33, %v1087_v8  ;;  %v3258_v8 = vld [vmem:[%s4906_s1 + $0xd8] sm:$0xff] }
0x1b3f   :  { %2645 = vrot.lane.b32.xlu0 %v2603_v32, %s3465_s13  ;;  %v3253_v56 = vmul.f32 -1.442695, %v2603_v32 }
0x1b44   :  { %v2600_v58 = vpop.f32.mrf.mxu2 }
0x1b45   :  { %v2604_v59 = vadd.f32 %v2600_v58, %v1090_v47 }
0x1b47   :  { %2647 = vrot.lane.b32.xlu2 %v2604_v59, %s3465_s13  ;;  %v3254_v36 = vmul.f32 -1.442695, %v2604_v59 }
0x1b49   :  { %3432 = vpow2.f32 %v3254_v36  ;;  %v2959_v36 = vld [vmem:[%s4904_s2 + $0xd8] sm:$0xff] }
0x1b4f   :  { %v3433_v30 = vpop.eup %3432 }
0x1b50   :  { %v2612_v22 = vadd.f32 1.0, %v3433_v30  ;;  %v2958_v30 = vld [vmem:[%s4904_s2 + $0xd0] sm:$0xff] }
0x1b52   :  { %3434 = vrcp.f32 %v2612_v22  ;;  %v2639_v43 = vand.u32 2147483648, %v2612_v22  ;;  %vm2633_vm2 = vweird.f32 %v2612_v22  ;;  %v2637_v51 = vand.u32 2147483647, %v2612_v22 }
0x1b53   :  { %3436 = vpow2.f32 %v3253_v56 }
0x1b54   :  { %v2640_v40 = vor.u32 1.1754944e-38, %v2639_v43  ;;  %vm2638_vm4 = vcmp.eq.f32.partialorder %v2637_v51, 8.507059e+37  ;;  %v2967_v43 = vld [vmem:[#allocation3 + $0x28] sm:$0xff] }
0x1b58   :  { %v3435_v49 = vpop.eup %3434 }
0x1b59   :  { %v3437_v5 = vpop.eup %3436  ;;  %v2629_v23 = vmul.f32 %v3435_v49, %v2612_v22  ;;  %vm2634_vm1 = vweird.f32 %v3435_v49  ;;  %v2957_v22 = vld [vmem:[%s4904_s2 + $0xc8] sm:$0xff] }
0x1b5a   :  { %v2611_v14 = vadd.f32 1.0, %v3437_v5  ;;  %vm2635_vm3 = vmor %vm2633_vm2, %vm2634_vm1 }
0x1b5b   :  { %v2630_v17 = vsub.f32 1.0, %v2629_v23 }
0x1b5c   :  { %3438 = vrcp.f32 %v2611_v14  ;;  %v2624_v25 = vand.u32 2147483648, %v2611_v14  ;;  %vm2618_vm6 = vweird.f32 %v2611_v14  ;;  %v2622_v1 = vand.u32 2147483647, %v2611_v14 }
0x1b5d   :  { %v2631_v4 = vmul.f32 %v3435_v49, %v2630_v17  ;;  %v2963_v17 = vld [vmem:[#allocation3 + $0x8] sm:$0xff] }
0x1b5e   :  { %v2625_v7 = vor.u32 1.1754944e-38, %v2624_v25  ;;  %vm2623_vm8 = vcmp.eq.f32.partialorder %v2622_v1, 8.507059e+37 }
0x1b5f   :  { %v2632_v10 = vadd.f32 %v3435_v49, %v2631_v4  ;;  %v2964_v4 = vld [vmem:[#allocation3 + $0x10] sm:$0xff] }
0x1b61   :  { %v2636_v13 = vsel %vm2635_vm3, %v3435_v49, %v2632_v10  ;;  %v2965_v10 = vld [vmem:[#allocation3 + $0x18] sm:$0xff] }
0x1b62   :  { %v3439_v34 = vpop.eup %3438  ;;  %v2641_v35 = vsel %vm2638_vm4, %v2640_v40, %v2636_v13 }
0x1b63   :  { %v2614_v41 = vmul.f32 %v3439_v34, %v2611_v14  ;;  %vm2619_vm5 = vweird.f32 %v3439_v34  ;;  %v2666_v21 = vsub.f32 1.0, %v2641_v35  ;;  %v2962_v14 = vld [vmem:[#allocation3] sm:$0xff] }
0x1b64   :  { %vm2620_vm7 = vmor %vm2618_vm6, %vm2619_vm5 }
0x1b65   :  { %v2615_v26 = vsub.f32 1.0, %v2614_v41 }
0x1b67   :  { %v2616_v45 = vmul.f32 %v3439_v34, %v2615_v26 }
0x1b69   :  { %v2617_v29 = vadd.f32 %v3439_v34, %v2616_v45  ;;  %v4836_v45 = vld [vmem:[%s4904_s2 + $0xed] ss:$0 sm:$0xff] }
0x1b6b   :  { %v2621_v27 = vsel %vm2620_vm7, %v3439_v34, %v2617_v29  ;;  %v2966_v34 = vld [vmem:[#allocation3 + $0x20] sm:$0xff] }
0x1b6c   :  { %v2626_v20 = vsel %vm2623_vm8, %v2625_v7, %v2621_v27 }
0x1b6d   :  { %v2665_v11 = vsub.f32 1.0, %v2626_v20 }
0x1ba1   :  { %v2648_v9 = vpop.permute.xlu2 %2647 }
0x1ba2   :  { %v2652_v46 = vmul.f32 %v2648_v9, %v2641_v35 }
0x1ba4   :  { %2657 = vrot.lane.b32.xlu1 %v2652_v46, %s3469_s15 }
0x1bac   :  { %2679 = vrot.lane.b32.xlu1 %v2570_v42, %s3465_s13  ;;  %v3257_v42 = vld [vmem:[%s4906_s1 + $0xd0] sm:$0xff] }
0x1bb1   :  { %v2646_v16 = vpop.permute.xlu0 %2645 }
0x1bb2   :  { %v2651_v15 = vmul.f32 %v2646_v16, %v2626_v20 }
0x1bb4   :  { %2655 = vrot.lane.b32.xlu2 %v2651_v15, %s3469_s15 }
0x1c0e   :  { %v2656_v50 = vpop.permute.xlu2 %2655 }
0x1c0f   :  { %v2661_v28 = vadd.f32 %v2656_v50, %v2603_v32 }
0x1c11   :  { %3440 = vtanh.f32 %v2661_v28 }
0x1c16   :  { %v2658_v2 = vpop.permute.xlu1 %2657 }
0x1c17   :  { %v3441_v61 = vpop.eup %3440  ;;  %v2662_v39 = vadd.f32 %v2658_v2, %v2604_v59  ;;  %v2960_v59 = vld [vmem:[%s4904_s2 + $0xe0] sm:$0xff] }
0x1c18   :  { %2669 = vrot.lane.b32.xlu2 %v3441_v61, %s3470_s16  ;;  %3015 = vmatpush.msra.mxu1 %v2960_v59 }
0x1c19   :  { %3442 = vtanh.f32 %v2662_v39 }
0x1c1a   :  { %3016 = vmatpush.msra.mxu1 %v2959_v36 }
0x1c1c   :  { %3017 = vmatpush.msra.mxu1 %v2958_v30 }
0x1c1e   :  { %v2680_v37 = vpop.permute.xlu1 %2679  ;;  %3018 = vmatpush.msra.mxu1 %v2957_v22 }
0x1c1f   :  { %v3443_v48 = vpop.eup %3442  ;;  %v2684_v52 = vmul.f32 %v2680_v37, %v2641_v35 }
0x1c20   :  { %2671 = vrot.lane.b32.xlu0 %v3443_v48, %s3470_s16 }
0x1c28   :  { %2677 = vrot.lane.b32.xlu0 %v4764_v57, %s3465_s13  ;;  %v3255_v57 = vld [vmem:[%s4906_s1 + $0xc0] sm:$0xff] }
0x1c72   :  { %v2670_v60 = vpop.permute.xlu2 %2669 }
0x1c73   :  { %v2675_v3 = vmul.f32 %v2670_v60, %v2665_v11 }
0x1c92   :  { %v2672_v54 = vpop.permute.xlu0 %2671 }
0x1c93   :  { %v2676_v55 = vmul.f32 %v2672_v54, %v2666_v21 }
0x1c95   :  { %v2686_v44 = vadd.f32 %v2684_v52, %v2676_v55 }
0x1c97   :  { %2691 = vrot.lane.b32.xlu1 %v2686_v44, %s3470_s16  ;;  %v1093_v44 = vadd.f32 %v4644_v31, %v4578_v19 }
0x1c9a   :  { %v2678_v63 = vpop.permute.xlu0 %2677 }
0x1c9b   :  { %v2683_v6 = vmul.f32 %v2678_v63, %v2626_v20  ;;  %v1096_v63 = vadd.f32 %v4644_v31, %v4587_v12 }
0x1c9d   :  { %v2685_v0 = vadd.f32 %v2683_v6, %v2675_v3 }
0x1c9f   :  { %2689 = vrot.lane.b32.xlu2 %v2685_v0, %s3470_s16 }
0x1cf9   :  { %v2690_v62 = vpop.permute.xlu2 %2689 }
0x1cfa   :  { %2695 = vst.msk [vmem:[#allocation3 + $0x30] sm:$0xff] %vm488_vm11, %v2690_v62 }
0x1d01   :  { %v2968_v51 = vld [vmem:[#allocation3 + $0x30] sm:$0xff] }
0x1d09   :  { %v2692_v38 = vpop.permute.xlu1 %2691 }
0x1d0a   :  { %2696 = vst.msk [vmem:[#allocation3 + $0x38] sm:$0xff] %vm488_vm11, %v2692_v38  ;;  %2745 = vmatpush.msrb.mxu0 %v2692_v38 }
0x1d0c   :  { %2746 = vmatpush.msrb.mxu0 %v2690_v62 }
0x1d0e   :  { %2747 = vmatpush.msrb.mxu0 %v2692_v38 }
0x1d10   :  { %2748 = vmatpush.msrb.mxu0 %v2690_v62 }
0x1d11   :  { %3259 = vmatmul.msk.f32.vlgmr.msrb.gmra.mxu0 %vm488_vm11, %v3255_v57  ;;  %v2969_v13 = vld [vmem:[#allocation3 + $0x38] sm:$0xff] }
0x1d19   :  { %3260 = vmatmul.msk.f32.gmra.mxu0 %vm488_vm11, %v3256_v18 }
0x1d21   :  { %3261 = vmatmul.msk.f32.gmra.mxu0 %vm488_vm11, %v3257_v42 }
0x1d29   :  { %3262 = vmatmul.msk.f32.gmra.mxu0 %vm488_vm11, %v3258_v8 }
0x1d8e   :  { %v2750_v33 = vpop.f32.mrf.mxu0 }
0x1d96   :  { %v2753_v32 = vpop.f32.mrf.mxu0 }
0x1d9e   :  { %v2756_v47 = vpop.f32.mrf.mxu0 }
0x1d9f   :  { %2764 = vrot.lane.b32.xlu0 %v2756_v47, %s3465_s13 }
0x1da6   :  { %v2759_v58 = vpop.f32.mrf.mxu0 }
0x1da7   :  { %2766 = vrot.lane.b32.xlu1 %v2759_v58, %s3465_s13 }
0x1e11   :  { %v2765_v56 = vpop.permute.xlu0 %2764 }
0x1e12   :  { %v2770_v49 = vsel %vm488_vm11, %v2750_v33, %v2765_v56 }
0x1e13   :  { %3263 = vmatmul.msk.f32.vlgmr.msrb.gmra.mxu1 %vm1255_vm13, %v2770_v49 }
0x1e19   :  { %v2767_v5 = vpop.permute.xlu1 %2766 }
0x1e1a   :  { %v2771_v23 = vsel %vm488_vm11, %v2753_v32, %v2767_v5 }
0x1e1b   :  { %3264 = vmatmul.msk.f32.gmra.mxu1 %vm1255_vm13, %v2771_v23 }
0x1e23   :  { %3271 = vmatmul.msk.f32.vlgmr.msra.gmra.mxu1 %vm488_vm11, %v2962_v14 }
0x1e2b   :  { %3272 = vmatmul.msk.f32.gmra.mxu1 %vm488_vm11, %v2963_v17 }
0x1e33   :  { %3273 = vmatmul.msk.f32.gmra.mxu1 %vm488_vm11, %v2964_v4 }
0x1e3b   :  { %3274 = vmatmul.msk.f32.gmra.mxu1 %vm488_vm11, %v2965_v10 }
0x1e43   :  { %3275 = vmatmul.msk.f32.gmra.mxu1 %vm488_vm11, %v2966_v34 }
0x1e4b   :  { %3276 = vmatmul.msk.f32.gmra.mxu1 %vm488_vm11, %v2967_v43 }
0x1e53   :  { %3277 = vmatmul.msk.f32.gmra.mxu1 %vm488_vm11, %v2968_v51 }
0x1e5b   :  { %3278 = vmatmul.msk.f32.gmra.mxu1 %vm488_vm11, %v2969_v13 }
0x1e90   :  { %v2795_v41 = vpop.f32.mrf.mxu1 }
0x1e91   :  { %v2796_v40 = vadd.f32 %v4583_v24, %v2795_v41 }
0x1e93   :  { %v2801_v9 = vmax.f32 %v2796_v40, 0.0 }
0x1e95   :  { %3265 = vmatmul.msk.f32.vlgmr.msrb.gmra.mxu2 %vm1255_vm13, %v2801_v9 }
0x1e98   :  { %v2798_v35 = vpop.f32.mrf.mxu1 }
0x1e99   :  { %v2799_v46 = vadd.f32 %v4583_v24, %v2798_v35 }
0x1e9b   :  { %v2802_v26 = vmax.f32 %v2799_v46, 0.0 }
0x1e9d   :  { %3266 = vmatmul.msk.f32.gmra.mxu2 %vm1255_vm13, %v2802_v26 }
0x1ea0   :  { %v3020_v29 = vpop.f32.mrf.mxu1 }
0x1ea1   :  { %v3021_v25 = vadd.f32 %v4836_v45, %v3020_v29 }
0x1ea3   :  { %3050 = vst [vmem:[%s4907_s3] sm:$0xff] %v3021_v25 }
0x1ea8   :  { %v3023_v1 = vpop.f32.mrf.mxu1 }
0x1ea9   :  { %v3024_v27 = vadd.f32 %v4836_v45, %v3023_v1 }
0x1eab   :  { %3051 = vst [vmem:[%s4907_s3 + $0x8] sm:$0xff] %v3024_v27 }
0x1eb0   :  { %v3026_v24 = vpop.f32.mrf.mxu1 }
0x1eb1   :  { %v3027_v7 = vadd.f32 %v4836_v45, %v3026_v24 }
0x1eb3   :  { %3052 = vst [vmem:[%s4907_s3 + $0x10] sm:$0xff] %v3027_v7 }
0x1eb8   :  { %v3029_v16 = vpop.f32.mrf.mxu1 }
0x1eb9   :  { %v3030_v20 = vadd.f32 %v4836_v45, %v3029_v16 }
0x1ebb   :  { %3053 = vst [vmem:[%s4907_s3 + $0x18] sm:$0xff] %v3030_v20 }
0x1ec0   :  { %v3032_v15 = vpop.f32.mrf.mxu1 }
0x1ec1   :  { %v3033_v50 = vadd.f32 %v4836_v45, %v3032_v15 }
0x1ec3   :  { %3054 = vst [vmem:[%s4907_s3 + $0x20] sm:$0xff] %v3033_v50 }
0x1ec8   :  { %v3035_v28 = vpop.f32.mrf.mxu1 }
0x1ec9   :  { %v3036_v2 = vadd.f32 %v4836_v45, %v3035_v28 }
0x1ecb   :  { %3055 = vst [vmem:[%s4907_s3 + $0x28] sm:$0xff] %v3036_v2 }
0x1ed0   :  { %v3038_v61 = vpop.f32.mrf.mxu1 }
0x1ed1   :  { %v3039_v39 = vadd.f32 %v4836_v45, %v3038_v61 }
0x1ed3   :  { %3056 = vst [vmem:[%s4907_s3 + $0x30] sm:$0xff] %v3039_v39 }
0x1ed8   :  { %v3041_v48 = vpop.f32.mrf.mxu1 }
0x1ed9   :  { %v3042_v37 = vadd.f32 %v4836_v45, %v3041_v48 }
0x1edb   :  { %3057 = vst [vmem:[%s4907_s3 + $0x38] sm:$0xff] %v3042_v37 }
0x1f18   :  { %v2826_v21 = vpop.f32.mrf.mxu2 }
0x1f19   :  { %v2827_v54 = vadd.f32 %v4624_v53, %v2826_v21 }
0x1f1b   :  { %3267 = vmatmul.msk.f32.vlgmr.msra.gmra.mxu3 %vm488_vm11, %v2827_v54 }
0x1f20   :  { %v2829_v52 = vpop.f32.mrf.mxu2 }
0x1f21   :  { %v4873_v55 = vadd.f32 %v4624_v53, %v2829_v52 }
0x1f23   :  { %3268 = vmatmul.msk.f32.gmra.mxu3 %vm488_vm11, %v4873_v55 }
0x1f9e   :  { %v2857_v60 = vpop.f32.mrf.mxu3 }
0x1f9f   :  { %v2863_v11 = vadd.f32 %v2857_v60, %v1093_v44 }
0x1fa1   :  { %2905 = vrot.lane.b32.xlu2 %v2863_v11, %s3465_s13  ;;  %v3269_v0 = vmul.f32 -1.442695, %v2863_v11 }
0x1fa3   :  { %3444 = vpow2.f32 %v3269_v0 }
0x1fa6   :  { %v2860_v3 = vpop.f32.mrf.mxu3 }
0x1fa7   :  { %v2864_v6 = vadd.f32 %v2860_v3, %v1096_v63 }
0x1fa9   :  { %2907 = vrot.lane.b32.xlu0 %v2864_v6, %s3465_s13  ;;  %v3445_v53 = vpop.eup %3444  ;;  %v3270_v19 = vmul.f32 -1.442695, %v2864_v6 }
0x1faa   :  { %v2871_v62 = vadd.f32 1.0, %v3445_v53 }
0x1fac   :  { %3446 = vrcp.f32 %v2871_v62  ;;  %v2884_v33 = vand.u32 2147483648, %v2871_v62  ;;  %vm2878_vm9 = vweird.f32 %v2871_v62  ;;  %v2882_v12 = vand.u32 2147483647, %v2871_v62 }
0x1fad   :  { %3448 = vpow2.f32 %v3270_v19 }
0x1fae   :  { %v2885_v47 = vor.u32 1.1754944e-38, %v2884_v33  ;;  %vm2883_vm12 = vcmp.eq.f32.partialorder %v2882_v12, 8.507059e+37 }
0x1fb2   :  { %v3447_v38 = vpop.eup %3446 }
0x1fb3   :  { %v2874_v57 = vmul.f32 %v3447_v38, %v2871_v62  ;;  %vm2879_vm13 = vweird.f32 %v3447_v38  ;;  %v3449_v31 = vpop.eup %3448 }
0x1fb4   :  { %vm2880_vm10 = vmor %vm2878_vm9, %vm2879_vm13  ;;  %v2872_v58 = vadd.f32 1.0, %v3449_v31 }
0x1fb5   :  { %v2875_v18 = vsub.f32 1.0, %v2874_v57 }
0x1fb6   :  { %3450 = vrcp.f32 %v2872_v58  ;;  %v2899_v14 = vand.u32 2147483648, %v2872_v58  ;;  %vm2893_vm15 = vweird.f32 %v2872_v58  ;;  %v2897_v17 = vand.u32 2147483647, %v2872_v58 }
0x1fb7   :  { %v2876_v42 = vmul.f32 %v3447_v38, %v2875_v18 }
0x1fb8   :  { %v2900_v10 = vor.u32 1.1754944e-38, %v2899_v14  ;;  %vm2898_vm1 = vcmp.eq.f32.partialorder %v2897_v17, 8.507059e+37 }
0x1fb9   :  { %v2877_v8 = vadd.f32 %v3447_v38, %v2876_v42 }
0x1fbb   :  { %v2881_v32 = vsel %vm2880_vm10, %v3447_v38, %v2877_v8 }
0x1fbc   :  { %v2886_v36 = vsel %vm2883_vm12, %v2885_v47, %v2881_v32  ;;  %v3451_v22 = vpop.eup %3450 }
0x1fbd   :  { %v2889_v56 = vmul.f32 %v3451_v22, %v2872_v58  ;;  %vm2894_vm14 = vweird.f32 %v3451_v22  ;;  %v2925_v29 = vsub.f32 1.0, %v2886_v36 }
0x1fbe   :  { %vm2895_vm0 = vmor %vm2893_vm15, %vm2894_vm14 }
0x1fbf   :  { %v2890_v49 = vsub.f32 1.0, %v2889_v56 }
0x1fc1   :  { %v2891_v5 = vmul.f32 %v3451_v22, %v2890_v49 }
0x1fc3   :  { %v2892_v23 = vadd.f32 %v3451_v22, %v2891_v5 }
0x1fc5   :  { %v2896_v4 = vsel %vm2895_vm0, %v3451_v22, %v2892_v23 }
0x1fc6   :  { %v2901_v43 = vsel %vm2898_vm1, %v2900_v10, %v2896_v4 }
0x1fc7   :  { %v2926_v16 = vsub.f32 1.0, %v2901_v43 }
0x1ffb   :  { %v2906_v59 = vpop.permute.xlu2 %2905 }
0x1ffc   :  { %v2911_v30 = vmul.f32 %v2906_v59, %v2886_v36 }
0x1ffe   :  { %2915 = vrot.lane.b32.xlu1 %v2911_v30, %s3469_s15 }
0x2006   :  { %2937 = vrot.lane.b32.xlu1 %v2827_v54, %s3465_s13 }
0x201b   :  { %v2908_v34 = vpop.permute.xlu0 %2907 }
0x201c   :  { %v2912_v51 = vmul.f32 %v2908_v34, %v2901_v43 }
0x201e   :  { %2917 = vrot.lane.b32.xlu2 %v2912_v51, %s3469_s15 }
0x2070   :  { %v2916_v13 = vpop.permute.xlu1 %2915 }
0x2071   :  { %v2921_v41 = vadd.f32 %v2916_v13, %v2863_v11 }
0x2073   :  { %3452 = vtanh.f32 %v2921_v41 }
0x2078   :  { %v2918_v40 = vpop.permute.xlu2 %2917  ;;  %v2938_v26 = vpop.permute.xlu1 %2937 }
0x2079   :  { %v3453_v9 = vpop.eup %3452  ;;  %v2922_v35 = vadd.f32 %v2918_v40, %v2864_v6  ;;  %v2943_v1 = vmul.f32 %v2938_v26, %v2886_v36 }
0x207a   :  { %2929 = vrot.lane.b32.xlu0 %v3453_v9, %s3470_s16 }
0x207b   :  { %3454 = vtanh.f32 %v2922_v35 }
0x2081   :  { %v3455_v46 = vpop.eup %3454 }
0x2082   :  { %2931 = vrot.lane.b32.xlu2 %v3455_v46, %s3470_s16  ;;  %2939 = vrot.lane.b32.xlu0 %v4873_v55, %s3465_s13 }
0x20dc   :  { %v2932_v7 = vpop.permute.xlu2 %2931 }
0x20dd   :  { %v2936_v15 = vmul.f32 %v2932_v7, %v2926_v16 }
0x20ec   :  { %v2930_v25 = vpop.permute.xlu0 %2929 }
0x20ed   :  { %v2935_v27 = vmul.f32 %v2930_v25, %v2925_v29 }
0x20ef   :  { %v2945_v24 = vadd.f32 %v2943_v1, %v2935_v27 }
0x20f1   :  { %2949 = vrot.lane.b32.xlu1 %v2945_v24, %s3470_s16 }
0x20f4   :  { %v2940_v20 = vpop.permute.xlu0 %2939 }
0x20f5   :  { %v2944_v50 = vmul.f32 %v2940_v20, %v2901_v43 }
0x20f7   :  { %v2946_v28 = vadd.f32 %v2944_v50, %v2936_v15 }
0x20f9   :  { %2951 = vrot.lane.b32.xlu2 %v2946_v28, %s3470_s16 }
0x2153   :  { %v2952_v2 = vpop.permute.xlu2 %2951 }
0x2154   :  { %2956 = vst.msk [vmem:[#allocation3 + $0x48] sm:$0xff] %vm488_vm11, %v2952_v2 }
0x215b   :  { %v2971_v48 = vld [vmem:[#allocation3 + $0x48] sm:$0xff] }
0x2163   :  { %v2950_v61 = vpop.permute.xlu1 %2949 }
0x2164   :  { %2955 = vst.msk [vmem:[#allocation3 + $0x40] sm:$0xff] %vm488_vm11, %v2950_v61 }
0x216b   :  { %v2970_v39 = vld [vmem:[#allocation3 + $0x40] sm:$0xff] }
0x216c   :  { %3279 = vmatmul.msk.f32.gmra.mxu1 %vm488_vm11, %v2970_v39 }
0x2174   :  { %3280 = vmatmul.msk.f32.gmra.mxu1 %vm488_vm11, %v2971_v48 }
0x21e9   :  { %v3044_v37 = vpop.f32.mrf.mxu1 }
0x21ea   :  { %v3045_v21 = vadd.f32 %v4836_v45, %v3044_v37 }
0x21ec   :  { %3058 = vst [vmem:[%s4907_s3 + $0x40] sm:$0xff] %v3045_v21 }
0x21f1   :  { %v3047_v54 = vpop.f32.mrf.mxu1 }
0x21f2   :  { %v3048_v52 = vadd.f32 %v4836_v45, %v3047_v54 }
0x21f4   :  { %3059 = vst [vmem:[%s4907_s3 + $0x48] sm:$0xff] %v3048_v52 }

</bundles_post_ra>
